<compile_context>
chip_gen: v6e
topology: v6e:2x2x1
jax: 0.10.0
libtpu: 0.0.40
codegen_flags: <defaults>
</compile_context>

<pallas_src>
import jax
import jax.numpy as jnp
from jax.experimental import pallas as pl
from jax.experimental.pallas import tpu as pltpu

BN_EPS = 1e-5
TAU = 0.8          # self.temperature
P = 18             # max dilation -> shared replication-pad width
DILATIONS = (6, 12, 18)


# --------------------------------------------------------------------------
# Row-tile picker: VMEM-budget aware, bf16-sublane aligned, megacore friendly
# --------------------------------------------------------------------------
def _pick_row_tile(N, H, W, C, budget_bytes=8 << 20, min_steps=4):
    """Largest row tile whose per-tile in-kernel temporaries fit the budget,
    preferring (rows*W) % 16 == 0 (bf16 sublane packing), then shrunk until the
    grid has >= min_steps steps so both v7x TensorCores stay busy."""
    per_row = W * (2 * 28 * C * 2        # bf16 tap slab (+ slice copies)
                   + 128 * 4             # f32 branch slab
                   + 64 * (4 + 2)        # feat f32 temp + bf16 output
                   + 3 * 4)              # cls / p1
    divs = [d for d in range(1, H + 1) if H % d == 0]
    ok = [d for d in divs if d * per_row <= budget_bytes] or [divs[0]]
    aligned = [d for d in ok if (d * W) % 16 == 0 or d == H] or ok
    tr = max(aligned)
    while N * (H // tr) < min_steps:
        smaller = [d for d in aligned if d < tr] or [d for d in ok if d < tr]
        if not smaller:
            break
        tr = max(smaller)
    return tr


# --------------------------------------------------------------------------
# Fused kernel: in-kernel tap extraction + branches + concat + conv1/bn1/relu
#               + feature_select + gumbel-softmax probability
# --------------------------------------------------------------------------
def fused_aspp_head(xp, gumbel, w_blockdiag, wc_top, wf, bias_row,
                    H, W, C, row_tile, tau=TAU):
    """xp: (N, H+36, W+36, C) edge-padded relu(x), bf16.
       Returns feat (N, HW, 64) bf16, cls logits (N, HW, 2) f32, p1 (N, HW, 1) f32."""
    N = xp.shape[0]
    Hp, Wp = H + 2 * P, W + 2 * P
    HW = H * W
    D = 28 * C
    Tr = row_tile
    nT = H // Tr
    T = Tr * W
    inv_tau = 1.0 / tau

    def kernel(xp_ref, g_ref, wbd_ref, wct_ref, wf_ref, bias_ref,
               feat_ref, cls_ref, p1_ref):
        # padded-row window covering this row tile's taps: rows [r0, r0+Tr+36)
        r0 = pl.program_id(1) * Tr
        win = xp_ref[pl.ds(r0, Tr + 2 * P), :, :]            # (Tr+36, Wp, C) bf16

        # --- build [relu(x) | 9 taps d=6 | 9 taps d=12 | 9 taps d=18] in VMEM
        taps = [win[P:P + Tr, P:P + W, :].reshape(T, C)]      # 1x1 branch tap
        for d in DILATIONS:
            for ky in range(3):
                for kx in range(3):
                    ro, co = P + (ky - 1) * d, P + (kx - 1) * d
                    taps.append(win[ro:ro + Tr, co:co + W, :].reshape(T, C))
        slab = jnp.concatenate(taps, axis=-1)                 # (T, 28C) bf16

        # --- four ASPP branches as one block-diagonal matmul -> (T, 128) slab
        br = jnp.dot(slab, wbd_ref[...], preferred_element_type=jnp.float32)
        br = jnp.maximum(br, 0.0)                             # [x1 | x2 | x3 | x4]

        # --- conv1 + bn1 + relu; GAP branch enters as a per-batch bias row
        feat = jnp.dot(br.astype(jnp.bfloat16), wct_ref[...],
                       preferred_element_type=jnp.float32) + bias_ref[...]
        feat = jnp.maximum(feat, 0.0)                         # (T, 64)
        feat_ref[...] = feat.astype(feat_ref.dtype)           # bf16 writeback

        # --- feature_select 1x1 conv -> class logits
        logits = jnp.dot(feat.astype(jnp.bfloat16), wf_ref[...],
                         preferred_element_type=jnp.float32)  # (T, 2)
        cls_ref[...] = logits

        # --- gumbel-softmax (tau, hard=False); channel-1 prob == sigmoid(a1-a0)
        a = (logits + g_ref[...]) * inv_tau
        diff = a[:, 1:2] - a[:, 0:1]
        p1_ref[...] = 1.0 / (1.0 + jnp.exp(-diff))

    return pl.pallas_call(
        kernel,
        grid=(N, nT),
        in_specs=[
            # full padded image resident per batch (block index constant in t)
            pl.BlockSpec((pl.Squeezed(), Hp, Wp, C), lambda n, t: (n, 0, 0, 0)),
            pl.BlockSpec((pl.Squeezed(), T, 2), lambda n, t: (n, t, 0)),
            pl.BlockSpec((D, 128), lambda n, t: (0, 0)),
            pl.BlockSpec((128, 64), lambda n, t: (0, 0)),
            pl.BlockSpec((64, 2), lambda n, t: (0, 0)),
            pl.BlockSpec((pl.Squeezed(), 1, 64), lambda n, t: (n, 0, 0)),
        ],
        out_specs=(
            pl.BlockSpec((pl.Squeezed(), T, 64), lambda n, t: (n, t, 0)),
            pl.BlockSpec((pl.Squeezed(), T, 2), lambda n, t: (n, t, 0)),
            pl.BlockSpec((pl.Squeezed(), T, 1), lambda n, t: (n, t, 0)),
        ),
        out_shape=(jax.ShapeDtypeStruct((N, HW, 64), jnp.bfloat16),
                   jax.ShapeDtypeStruct((N, HW, 2), jnp.float32),
                   jax.ShapeDtypeStruct((N, HW, 1), jnp.float32)),
        compiler_params=pltpu.CompilerParams(
            dimension_semantics=("parallel", "parallel")),
    )(xp, gumbel, w_blockdiag, wc_top, wf, bias_row)


# --------------------------------------------------------------------------
# Parameters (deterministic, kaiming_normal_-style init, fan_in mode)
# --------------------------------------------------------------------------
def kaiming_normal(key, shape, fan_in):
    std = (2.0 / fan_in) ** 0.5
    return std * jax.random.normal(key, shape, dtype=jnp.float32)


def init_params(key, inplanes):
    ks = jax.random.split(key, 7)
    c = inplanes
    # 3x3 weights stored as (9*Cin, Cout); row index = (ky*3 + kx)*Cin + ci
    return {
        "w_aspp1": kaiming_normal(ks[0], (c, 32), c),
        "w_aspp2": kaiming_normal(ks[1], (9 * c, 32), 9 * c),
        "w_aspp3": kaiming_normal(ks[2], (9 * c, 32), 9 * c),
        "w_aspp4": kaiming_normal(ks[3], (9 * c, 32), 9 * c),
        "w_gap":   kaiming_normal(ks[4], (c, 32), c),
        "w_conv1": kaiming_normal(ks[5], (160, 64), 160),
        "w_fs":    kaiming_normal(ks[6], (64, 2), 64),
    }


# --------------------------------------------------------------------------
# Wrapper: padding, BN folding, GAP bias row, gumbel noise, layout glue
# --------------------------------------------------------------------------
def aspp_forward(params, x_nchw, noise_key):
    N, C, H, W = x_nchw.shape
    HW = H * W
    x = jnp.transpose(x_nchw, (0, 2, 3, 1)).astype(jnp.float32)   # NHWC
    xr = jnp.maximum(x, 0.0)      # leading nn.ReLU() inside every _ASPPModule

    # eval-mode BN with freshly-initialized running stats -> pure scale, fold it
    s = 1.0 / (1.0 + BN_EPS) ** 0.5
    w1, w2 = params["w_aspp1"] * s, params["w_aspp2"] * s
    w3, w4 = params["w_aspp3"] * s, params["w_aspp4"] * s
    wg, wc = params["w_gap"] * s, params["w_conv1"] * s            # bn1 folded
    wf = params["w_fs"]                                            # no BN

    # block-diagonal branch weight: [relu(x) | taps6 | taps12 | taps18] -> 128 ch
    D = 28 * C
    wbd = jnp.zeros((D, 128), jnp.float32)
    wbd = wbd.at[0:C, 0:32].set(w1)
    wbd = wbd.at[C:10 * C, 32:64].set(w2)
    wbd = wbd.at[10 * C:19 * C, 64:96].set(w3)
    wbd = wbd.at[19 * C:28 * C, 96:128].set(w4)

    # single edge-padded ("replication") bf16 buffer shared by all dilated
    # branches; taps are extracted in-kernel (no (N, HW, 28C) HBM stack).
    xp = jnp.pad(xr, ((0, 0), (P, P), (P, P), (0, 0)),
                 mode="edge").astype(jnp.bfloat16)

    # GAP branch (no leading ReLU); bilinear upsample of a 1x1 map with
    # align_corners=True is a pure broadcast -> per-batch conv1 bias row.
    # Compute is trivial, so plain jnp (XLA fuses it) instead of a pallas_call.
    xm = jnp.mean(x.reshape(N, HW, C), axis=1)                     # (N, C)
    hg = jnp.maximum(xm @ wg, 0.0)                                 # (N, 32)
    bias_row = (hg @ wc[128:160, :]).reshape(N, 1, 64)             # (N, 1, 64)

    # Gumbel(0,1) noise for the 2-class gumbel-softmax, drawn on the host path
    # (the in-kernel TPU PRNG has no interpret/CPU lowering).
    gumbel = jax.random.gumbel(noise_key, (N, HW, 2), dtype=jnp.float32)

    Tr = _pick_row_tile(N, H, W, C)
    feat, clsmap, p1 = fused_aspp_head(
        xp, gumbel,
        wbd.astype(jnp.bfloat16),
        wc[:128, :].astype(jnp.bfloat16),
        wf.astype(jnp.bfloat16),
        bias_row, H, W, C, Tr)

    output = p1.reshape(N, H, W)
    # NCHW to match the PyTorch module; drop these transposes if the consumer
    # can take NHWC directly (they re-stream the largest output through HBM).
    feat_nchw = jnp.transpose(feat.astype(jnp.float32).reshape(N, H, W, 64),
                              (0, 3, 1, 2))
    clsmap_nchw = jnp.transpose(clsmap.reshape(N, H, W, 2), (0, 3, 1, 2))
    return output, feat_nchw, clsmap_nchw


# --------------------------------------------------------------------------
if __name__ == "__main__":
    key = jax.random.PRNGKey(0)
    k_param, k_x, k_noise = jax.random.split(key, 3)

    N, C, H, W = 2, 4, 16, 16
    params = init_params(k_param, C)
    x = jax.random.normal(k_x, (N, C, H, W), dtype=jnp.float32)

    fwd = jax.jit(aspp_forward)
    out, feat, clsmap = fwd(params, x, k_noise)
    jax.block_until_ready((out, feat, clsmap))

    assert out.shape == (N, H, W)
    assert feat.shape == (N, 64, H, W)
    assert clsmap.shape == (N, 2, H, W)
    assert bool(jnp.all(jnp.isfinite(out)))
    assert bool(jnp.all(jnp.isfinite(feat)))
    assert bool(jnp.all(jnp.isfinite(clsmap)))
    assert bool(jnp.all((out >= 0.0) & (out <= 1.0)))   # softmax probabilities
    assert bool(jnp.all(feat >= 0.0))                   # post-ReLU features

    print("KERNEL_OK")
</pallas_src>

<mosaic_0001>
module attributes {stable_mosaic.version = 11 : i64} {
  func.func @kernel(%arg0: i32, %arg1: i32, %arg2: memref<1x52x52x4xbf16, #tpu.memory_space<vmem>>, %arg3: memref<1x128x2xf32, #tpu.memory_space<vmem>>, %arg4: memref<112x128xbf16, #tpu.memory_space<vmem>>, %arg5: memref<128x64xbf16, #tpu.memory_space<vmem>>, %arg6: memref<64x2xbf16, #tpu.memory_space<vmem>>, %arg7: memref<1x1x64xf32, #tpu.memory_space<vmem>>, %arg8: memref<1x128x64xbf16, #tpu.memory_space<vmem>>, %arg9: memref<1x128x2xf32, #tpu.memory_space<vmem>>, %arg10: memref<1x128x1xf32, #tpu.memory_space<vmem>>) attributes {dimension_semantics = [#tpu.dimension_semantics<parallel>, #tpu.dimension_semantics<parallel>], iteration_bounds = array<i64: 2, 2>, scalar_prefetch = 0 : i64, scratch_operands = 0 : i64, tpu.core_type = #tpu.core_type<tc>, window_params = [{transform_indices = @transform_0, window_bounds = array<i64: 1, 52, 52, 4>}, {transform_indices = @transform_1, window_bounds = array<i64: 1, 128, 2>}, {pipeline_mode = #tpu.pipeline_mode<synchronous>, transform_indices = @transform_2, window_bounds = array<i64: 112, 128>}, {pipeline_mode = #tpu.pipeline_mode<synchronous>, transform_indices = @transform_3, window_bounds = array<i64: 128, 64>}, {pipeline_mode = #tpu.pipeline_mode<synchronous>, transform_indices = @transform_4, window_bounds = array<i64: 64, 2>}, {transform_indices = @transform_5, window_bounds = array<i64: 1, 1, 64>}, {transform_indices = @transform_6, window_bounds = array<i64: 1, 128, 64>}, {transform_indices = @transform_7, window_bounds = array<i64: 1, 128, 2>}, {transform_indices = @transform_8, window_bounds = array<i64: 1, 128, 1>}]} {
    %c8_i32 = arith.constant 8 : i32
    %0 = arith.muli %arg1, %c8_i32 : i32
    %c0 = arith.constant 0 : index
    %1 = arith.index_cast %0 : i32 to index
    %c0_0 = arith.constant 0 : index
    %c0_1 = arith.constant 0 : index
    %2 = vector.load %arg2[%c0, %1, %c0_0, %c0_1] : memref<1x52x52x4xbf16, #tpu.memory_space<vmem>>, vector<1x44x52x4xbf16>
    %3 = vector.shape_cast %2 : vector<1x44x52x4xbf16> to vector<44x52x4xbf16>
    %4 = vector.extract_strided_slice %3 {offsets = [18, 18, 0], sizes = [8, 16, 4], strides = [1, 1, 1]} : vector<44x52x4xbf16> to vector<8x16x4xbf16>
    %5 = vector.shape_cast %4 : vector<8x16x4xbf16> to vector<128x4xbf16>
    %6 = vector.extract_strided_slice %3 {offsets = [12, 12, 0], sizes = [8, 16, 4], strides = [1, 1, 1]} : vector<44x52x4xbf16> to vector<8x16x4xbf16>
    %7 = vector.shape_cast %6 : vector<8x16x4xbf16> to vector<128x4xbf16>
    %8 = vector.extract_strided_slice %3 {offsets = [12, 18, 0], sizes = [8, 16, 4], strides = [1, 1, 1]} : vector<44x52x4xbf16> to vector<8x16x4xbf16>
    %9 = vector.shape_cast %8 : vector<8x16x4xbf16> to vector<128x4xbf16>
    %10 = vector.extract_strided_slice %3 {offsets = [12, 24, 0], sizes = [8, 16, 4], strides = [1, 1, 1]} : vector<44x52x4xbf16> to vector<8x16x4xbf16>
    %11 = vector.shape_cast %10 : vector<8x16x4xbf16> to vector<128x4xbf16>
    %12 = vector.extract_strided_slice %3 {offsets = [18, 12, 0], sizes = [8, 16, 4], strides = [1, 1, 1]} : vector<44x52x4xbf16> to vector<8x16x4xbf16>
    %13 = vector.shape_cast %12 : vector<8x16x4xbf16> to vector<128x4xbf16>
    %14 = vector.extract_strided_slice %3 {offsets = [18, 18, 0], sizes = [8, 16, 4], strides = [1, 1, 1]} : vector<44x52x4xbf16> to vector<8x16x4xbf16>
    %15 = vector.shape_cast %14 : vector<8x16x4xbf16> to vector<128x4xbf16>
    %16 = vector.extract_strided_slice %3 {offsets = [18, 24, 0], sizes = [8, 16, 4], strides = [1, 1, 1]} : vector<44x52x4xbf16> to vector<8x16x4xbf16>
    %17 = vector.shape_cast %16 : vector<8x16x4xbf16> to vector<128x4xbf16>
    %18 = vector.extract_strided_slice %3 {offsets = [24, 12, 0], sizes = [8, 16, 4], strides = [1, 1, 1]} : vector<44x52x4xbf16> to vector<8x16x4xbf16>
    %19 = vector.shape_cast %18 : vector<8x16x4xbf16> to vector<128x4xbf16>
    %20 = vector.extract_strided_slice %3 {offsets = [24, 18, 0], sizes = [8, 16, 4], strides = [1, 1, 1]} : vector<44x52x4xbf16> to vector<8x16x4xbf16>
    %21 = vector.shape_cast %20 : vector<8x16x4xbf16> to vector<128x4xbf16>
    %22 = vector.extract_strided_slice %3 {offsets = [24, 24, 0], sizes = [8, 16, 4], strides = [1, 1, 1]} : vector<44x52x4xbf16> to vector<8x16x4xbf16>
    %23 = vector.shape_cast %22 : vector<8x16x4xbf16> to vector<128x4xbf16>
    %24 = vector.extract_strided_slice %3 {offsets = [6, 6, 0], sizes = [8, 16, 4], strides = [1, 1, 1]} : vector<44x52x4xbf16> to vector<8x16x4xbf16>
    %25 = vector.shape_cast %24 : vector<8x16x4xbf16> to vector<128x4xbf16>
    %26 = vector.extract_strided_slice %3 {offsets = [6, 18, 0], sizes = [8, 16, 4], strides = [1, 1, 1]} : vector<44x52x4xbf16> to vector<8x16x4xbf16>
    %27 = vector.shape_cast %26 : vector<8x16x4xbf16> to vector<128x4xbf16>
    %28 = vector.extract_strided_slice %3 {offsets = [6, 30, 0], sizes = [8, 16, 4], strides = [1, 1, 1]} : vector<44x52x4xbf16> to vector<8x16x4xbf16>
    %29 = vector.shape_cast %28 : vector<8x16x4xbf16> to vector<128x4xbf16>
    %30 = vector.extract_strided_slice %3 {offsets = [18, 6, 0], sizes = [8, 16, 4], strides = [1, 1, 1]} : vector<44x52x4xbf16> to vector<8x16x4xbf16>
    %31 = vector.shape_cast %30 : vector<8x16x4xbf16> to vector<128x4xbf16>
    %32 = vector.extract_strided_slice %3 {offsets = [18, 18, 0], sizes = [8, 16, 4], strides = [1, 1, 1]} : vector<44x52x4xbf16> to vector<8x16x4xbf16>
    %33 = vector.shape_cast %32 : vector<8x16x4xbf16> to vector<128x4xbf16>
    %34 = vector.extract_strided_slice %3 {offsets = [18, 30, 0], sizes = [8, 16, 4], strides = [1, 1, 1]} : vector<44x52x4xbf16> to vector<8x16x4xbf16>
    %35 = vector.shape_cast %34 : vector<8x16x4xbf16> to vector<128x4xbf16>
    %36 = vector.extract_strided_slice %3 {offsets = [30, 6, 0], sizes = [8, 16, 4], strides = [1, 1, 1]} : vector<44x52x4xbf16> to vector<8x16x4xbf16>
    %37 = vector.shape_cast %36 : vector<8x16x4xbf16> to vector<128x4xbf16>
    %38 = vector.extract_strided_slice %3 {offsets = [30, 18, 0], sizes = [8, 16, 4], strides = [1, 1, 1]} : vector<44x52x4xbf16> to vector<8x16x4xbf16>
    %39 = vector.shape_cast %38 : vector<8x16x4xbf16> to vector<128x4xbf16>
    %40 = vector.extract_strided_slice %3 {offsets = [30, 30, 0], sizes = [8, 16, 4], strides = [1, 1, 1]} : vector<44x52x4xbf16> to vector<8x16x4xbf16>
    %41 = vector.shape_cast %40 : vector<8x16x4xbf16> to vector<128x4xbf16>
    %42 = vector.extract_strided_slice %3 {offsets = [0, 0, 0], sizes = [8, 16, 4], strides = [1, 1, 1]} : vector<44x52x4xbf16> to vector<8x16x4xbf16>
    %43 = vector.shape_cast %42 : vector<8x16x4xbf16> to vector<128x4xbf16>
    %44 = vector.extract_strided_slice %3 {offsets = [0, 18, 0], sizes = [8, 16, 4], strides = [1, 1, 1]} : vector<44x52x4xbf16> to vector<8x16x4xbf16>
    %45 = vector.shape_cast %44 : vector<8x16x4xbf16> to vector<128x4xbf16>
    %46 = vector.extract_strided_slice %3 {offsets = [0, 36, 0], sizes = [8, 16, 4], strides = [1, 1, 1]} : vector<44x52x4xbf16> to vector<8x16x4xbf16>
    %47 = vector.shape_cast %46 : vector<8x16x4xbf16> to vector<128x4xbf16>
    %48 = vector.extract_strided_slice %3 {offsets = [18, 0, 0], sizes = [8, 16, 4], strides = [1, 1, 1]} : vector<44x52x4xbf16> to vector<8x16x4xbf16>
    %49 = vector.shape_cast %48 : vector<8x16x4xbf16> to vector<128x4xbf16>
    %50 = vector.extract_strided_slice %3 {offsets = [18, 18, 0], sizes = [8, 16, 4], strides = [1, 1, 1]} : vector<44x52x4xbf16> to vector<8x16x4xbf16>
    %51 = vector.shape_cast %50 : vector<8x16x4xbf16> to vector<128x4xbf16>
    %52 = vector.extract_strided_slice %3 {offsets = [18, 36, 0], sizes = [8, 16, 4], strides = [1, 1, 1]} : vector<44x52x4xbf16> to vector<8x16x4xbf16>
    %53 = vector.shape_cast %52 : vector<8x16x4xbf16> to vector<128x4xbf16>
    %54 = vector.extract_strided_slice %3 {offsets = [36, 0, 0], sizes = [8, 16, 4], strides = [1, 1, 1]} : vector<44x52x4xbf16> to vector<8x16x4xbf16>
    %55 = vector.shape_cast %54 : vector<8x16x4xbf16> to vector<128x4xbf16>
    %56 = vector.extract_strided_slice %3 {offsets = [36, 18, 0], sizes = [8, 16, 4], strides = [1, 1, 1]} : vector<44x52x4xbf16> to vector<8x16x4xbf16>
    %57 = vector.shape_cast %56 : vector<8x16x4xbf16> to vector<128x4xbf16>
    %58 = vector.extract_strided_slice %3 {offsets = [36, 36, 0], sizes = [8, 16, 4], strides = [1, 1, 1]} : vector<44x52x4xbf16> to vector<8x16x4xbf16>
    %59 = vector.shape_cast %58 : vector<8x16x4xbf16> to vector<128x4xbf16>
    %60 = tpu.concatenate %5, %7, %9, %11, %13, %15, %17, %19, %21, %23, %25, %27, %29, %31, %33, %35 in 1 : vector<128x4xbf16>, vector<128x4xbf16>, vector<128x4xbf16>, vector<128x4xbf16>, vector<128x4xbf16>, vector<128x4xbf16>, vector<128x4xbf16>, vector<128x4xbf16>, vector<128x4xbf16>, vector<128x4xbf16>, vector<128x4xbf16>, vector<128x4xbf16>, vector<128x4xbf16>, vector<128x4xbf16>, vector<128x4xbf16>, vector<128x4xbf16> -> vector<128x64xbf16>
    %61 = tpu.concatenate %37, %39, %41, %43, %45, %47, %49, %51, %53, %55, %57, %59 in 1 : vector<128x4xbf16>, vector<128x4xbf16>, vector<128x4xbf16>, vector<128x4xbf16>, vector<128x4xbf16>, vector<128x4xbf16>, vector<128x4xbf16>, vector<128x4xbf16>, vector<128x4xbf16>, vector<128x4xbf16>, vector<128x4xbf16>, vector<128x4xbf16> -> vector<128x48xbf16>
    %62 = tpu.concatenate %60, %61 in 1 : vector<128x64xbf16>, vector<128x48xbf16> -> vector<128x112xbf16>
    %c0_2 = arith.constant 0 : index
    %c0_3 = arith.constant 0 : index
    %63 = vector.load %arg4[%c0_2, %c0_3] : memref<112x128xbf16, #tpu.memory_space<vmem>>, vector<112x128xbf16>
    %cst = arith.constant dense<0.000000e+00> : vector<128x128xf32>
    %64 = tpu.matmul %62, %63, %cst {dimension_numbers = #tpu.dot_dimension_numbers<[1], [0], [0], [1], [0, 0, 1, 1], [], []>} : vector<128x112xbf16>, vector<112x128xbf16>, vector<128x128xf32> -> vector<128x128xf32>
    %cst_4 = arith.constant 0.000000e+00 : f32
    %65 = vector.broadcast %cst_4 : f32 to vector<128x128xf32>
    %66 = arith.maximumf %64, %65 : vector<128x128xf32>
    %67 = arith.truncf %66 : vector<128x128xf32> to vector<128x128xbf16>
    %c0_5 = arith.constant 0 : index
    %c0_6 = arith.constant 0 : index
    %68 = vector.load %arg5[%c0_5, %c0_6] : memref<128x64xbf16, #tpu.memory_space<vmem>>, vector<128x64xbf16>
    %cst_7 = arith.constant dense<0.000000e+00> : vector<128x64xf32>
    %69 = tpu.matmul %67, %68, %cst_7 {dimension_numbers = #tpu.dot_dimension_numbers<[1], [0], [0], [1], [0, 0, 1, 1], [], []>} : vector<128x128xbf16>, vector<128x64xbf16>, vector<128x64xf32> -> vector<128x64xf32>
    %c0_8 = arith.constant 0 : index
    %c0_9 = arith.constant 0 : index
    %c0_10 = arith.constant 0 : index
    %70 = vector.load %arg7[%c0_8, %c0_9, %c0_10] : memref<1x1x64xf32, #tpu.memory_space<vmem>>, vector<1x1x64xf32>
    %71 = vector.shape_cast %70 : vector<1x1x64xf32> to vector<1x64xf32>
    %72 = vector.broadcast %71 : vector<1x64xf32> to vector<128x64xf32>
    %73 = arith.addf %69, %72 : vector<128x64xf32>
    %cst_11 = arith.constant 0.000000e+00 : f32
    %74 = vector.broadcast %cst_11 : f32 to vector<128x64xf32>
    %75 = arith.maximumf %73, %74 : vector<128x64xf32>
    %76 = arith.truncf %75 : vector<128x64xf32> to vector<128x64xbf16>
    %c0_12 = arith.constant 0 : index
    %c0_13 = arith.constant 0 : index
    %c0_14 = arith.constant 0 : index
    %77 = vector.load %arg8[%c0_12, %c0_13, %c0_14] : memref<1x128x64xbf16, #tpu.memory_space<vmem>>, vector<1x128x64xbf16>
    %78 = vector.shape_cast %77 : vector<1x128x64xbf16> to vector<128x64xbf16>
    %79 = vector.shape_cast %76 : vector<128x64xbf16> to vector<1x128x64xbf16>
    tpu.vector_store %arg8[%c0_12, %c0_13, %c0_14], %79 {strides = array<i32>} : memref<1x128x64xbf16, #tpu.memory_space<vmem>>, vector<1x128x64xbf16>,
    %80 = arith.truncf %75 : vector<128x64xf32> to vector<128x64xbf16>
    %c0_15 = arith.constant 0 : index
    %c0_16 = arith.constant 0 : index
    %81 = vector.load %arg6[%c0_15, %c0_16] : memref<64x2xbf16, #tpu.memory_space<vmem>>, vector<64x2xbf16>
    %cst_17 = arith.constant dense<0.000000e+00> : vector<128x2xf32>
    %82 = tpu.matmul %80, %81, %cst_17 {dimension_numbers = #tpu.dot_dimension_numbers<[1], [0], [0], [1], [0, 0, 1, 1], [], []>} : vector<128x64xbf16>, vector<64x2xbf16>, vector<128x2xf32> -> vector<128x2xf32>
    %c0_18 = arith.constant 0 : index
    %c0_19 = arith.constant 0 : index
    %c0_20 = arith.constant 0 : index
    %83 = vector.load %arg9[%c0_18, %c0_19, %c0_20] : memref<1x128x2xf32, #tpu.memory_space<vmem>>, vector<1x128x2xf32>
    %84 = vector.shape_cast %83 : vector<1x128x2xf32> to vector<128x2xf32>
    %85 = vector.shape_cast %82 : vector<128x2xf32> to vector<1x128x2xf32>
    tpu.vector_store %arg9[%c0_18, %c0_19, %c0_20], %85 {strides = array<i32>} : memref<1x128x2xf32, #tpu.memory_space<vmem>>, vector<1x128x2xf32>,
    %c0_21 = arith.constant 0 : index
    %c0_22 = arith.constant 0 : index
    %c0_23 = arith.constant 0 : index
    %86 = vector.load %arg3[%c0_21, %c0_22, %c0_23] : memref<1x128x2xf32, #tpu.memory_space<vmem>>, vector<1x128x2xf32>
    %87 = vector.shape_cast %86 : vector<1x128x2xf32> to vector<128x2xf32>
    %88 = arith.addf %82, %87 : vector<128x2xf32>
    %cst_24 = arith.constant 1.250000e+00 : f32
    %89 = vector.broadcast %cst_24 : f32 to vector<128x2xf32>
    %90 = arith.mulf %88, %89 : vector<128x2xf32>
    %91 = vector.extract_strided_slice %90 {offsets = [0, 1], sizes = [128, 1], strides = [1, 1]} : vector<128x2xf32> to vector<128x1xf32>
    %92 = vector.extract_strided_slice %90 {offsets = [0, 0], sizes = [128, 1], strides = [1, 1]} : vector<128x2xf32> to vector<128x1xf32>
    %93 = arith.subf %91, %92 : vector<128x1xf32>
    %cst_25 = arith.constant 0.000000e+00 : f32
    %94 = vector.broadcast %cst_25 : f32 to vector<128x1xf32>
    %95 = arith.subf %94, %93 : vector<128x1xf32>
    %96 = math.exp %95 : vector<128x1xf32>
    %cst_26 = arith.constant 1.000000e+00 : f32
    %97 = vector.broadcast %cst_26 : f32 to vector<128x1xf32>
    %98 = arith.addf %97, %96 : vector<128x1xf32>
    %cst_27 = arith.constant 1.000000e+00 : f32
    %99 = vector.broadcast %cst_27 : f32 to vector<128x1xf32>
    %100 = arith.divf %99, %98 : vector<128x1xf32>
    %c0_28 = arith.constant 0 : index
    %c0_29 = arith.constant 0 : index
    %c0_30 = arith.constant 0 : index
    %101 = vector.load %arg10[%c0_28, %c0_29, %c0_30] : memref<1x128x1xf32, #tpu.memory_space<vmem>>, vector<1x128x1xf32>
    %102 = vector.shape_cast %101 : vector<1x128x1xf32> to vector<128x1xf32>
    %103 = vector.shape_cast %100 : vector<128x1xf32> to vector<1x128x1xf32>
    tpu.vector_store %arg10[%c0_28, %c0_29, %c0_30], %103 {strides = array<i32>} : memref<1x128x1xf32, #tpu.memory_space<vmem>>, vector<1x128x1xf32>,
    return
  }
  func.func @transform_0(%arg0: i32, %arg1: i32) -> (i32, i32, i32, i32) {
    %c0_i32 = arith.constant 0 : i32
    %c0_i32_0 = arith.constant 0 : i32
    %c0_i32_1 = arith.constant 0 : i32
    %c0_i32_2 = arith.constant 0 : i32
    return %arg0, %c0_i32, %c0_i32_0, %c0_i32_1 : i32, i32, i32, i32
  }
  func.func @transform_1(%arg0: i32, %arg1: i32) -> (i32, i32, i32) {
    %c0_i32 = arith.constant 0 : i32
    %c0_i32_0 = arith.constant 0 : i32
    return %arg0, %arg1, %c0_i32 : i32, i32, i32
  }
  func.func @transform_2(%arg0: i32, %arg1: i32) -> (i32, i32) {
    %c0_i32 = arith.constant 0 : i32
    %c0_i32_0 = arith.constant 0 : i32
    %c0_i32_1 = arith.constant 0 : i32
    return %c0_i32, %c0_i32_0 : i32, i32
  }
  func.func @transform_3(%arg0: i32, %arg1: i32) -> (i32, i32) {
    %c0_i32 = arith.constant 0 : i32
    %c0_i32_0 = arith.constant 0 : i32
    %c0_i32_1 = arith.constant 0 : i32
    return %c0_i32, %c0_i32_0 : i32, i32
  }
  func.func @transform_4(%arg0: i32, %arg1: i32) -> (i32, i32) {
    %c0_i32 = arith.constant 0 : i32
    %c0_i32_0 = arith.constant 0 : i32
    %c0_i32_1 = arith.constant 0 : i32
    return %c0_i32, %c0_i32_0 : i32, i32
  }
  func.func @transform_5(%arg0: i32, %arg1: i32) -> (i32, i32, i32) {
    %c0_i32 = arith.constant 0 : i32
    %c0_i32_0 = arith.constant 0 : i32
    %c0_i32_1 = arith.constant 0 : i32
    return %arg0, %c0_i32, %c0_i32_0 : i32, i32, i32
  }
  func.func @transform_6(%arg0: i32, %arg1: i32) -> (i32, i32, i32) {
    %c0_i32 = arith.constant 0 : i32
    %c0_i32_0 = arith.constant 0 : i32
    return %arg0, %arg1, %c0_i32 : i32, i32, i32
  }
  func.func @transform_7(%arg0: i32, %arg1: i32) -> (i32, i32, i32) {
    %c0_i32 = arith.constant 0 : i32
    %c0_i32_0 = arith.constant 0 : i32
    return %arg0, %arg1, %c0_i32 : i32, i32, i32
  }
  func.func @transform_8(%arg0: i32, %arg1: i32) -> (i32, i32, i32) {
    %c0_i32 = arith.constant 0 : i32
    %c0_i32_0 = arith.constant 0 : i32
    return %arg0, %arg1, %c0_i32 : i32, i32, i32
  }
}

</mosaic_0001>

<bundles_post_ra>
// kernel: aspp_forward.1
= control target key start
LH: loop header
LB: loop body
LE: loop exit
PB: predicated region body
PF: predicated region fallthrough
CT: control target
= control target key end

     0   :  { %s5431_s27 = smov 0   ;;  %s5433_s28 = smov 0   ;;  %s8364_s0 = inlined_call_operand.vmem [shape: bf16[2,52,52,4], index: 0, kind: input, shape index: {}]   ;;  %s8365_s1 = inlined_call_operand.vmem [shape: f32[2,256,2], index: 1, kind: input, shape index: {}]   ;;  %s8366_s2 = inlined_call_operand.vmem [shape: bf16[112,128], index: 2, kind: input, shape index: {}]   ;;  %s8367_s3 = inlined_call_operand.vmem [shape: bf16[128,64], index: 3, kind: input, shape index: {}]   ;;  %s8368_s4 = inlined_call_operand.vmem [shape: bf16[64,2], index: 4, kind: input, shape index: {}]   ;;  %s8369_s5 = inlined_call_operand.vmem [shape: f32[2,1,64], index: 5, kind: input, shape index: {}]   ;;  %s8370_s6 = inlined_call_operand.vmem [shape: bf16[2,256,64], index: 6, kind: output, shape index: {0}]   ;;  %s8371_s7 = inlined_call_operand.vmem [shape: f32[2,256,2], index: 7, kind: output, shape index: {1}]   ;;  %s8372_s8 = inlined_call_operand.vmem [shape: f32[2,256,1], index: 8, kind: output, shape index: {2}]  }
   0x1   :  { %s5435_s29 = smov 0   ;;  %s5437_s30 = smov 0  }
   0x2   :  { %s5439_s9 = smov 0  }
   0x3 LB: > { %s28_s10 = sadd.s32 1, %s5358_s29  ;;  %s31_s11 = sadd.s32 1, %s5362_s30  ;;  %s5366_s9 = sphi %s5439_s9, %s19_s9   ;;  %s5362_s30 = sphi %s5437_s30, %s8802_s30   ;;  %s5358_s29 = sphi %s5435_s29, %s8801_s29   ;;  %s5354_s28 = sphi %s5433_s28, %s8800_s28   ;;  %s5350_s27 = sphi %s5431_s27, %s8799_s27  }
   0x4   : > { %p29_p0 = scmp.ge.s32.totalorder %s28_s10, 2  ;;  %p4531_p1 = scmp.ge.s32.totalorder %s5366_s9, 1 }
   0x5   : > { %p310_p2 = scmp.lt.s32.totalorder %s5366_s9, 5 }
   0x6   : > { %s8804_s10 = smov (%p29_p0, %s28_s10), 0  ;;  %s8806_s11 = smov (!%p29_p0, %s31_s11), %s5362_s30 }
   0x7   : > { %p311_p3 = pnand %p4531_p1, %p310_p2  ;;  %p33_p4 = scmp.ge.s32.totalorder %s8806_s11, 2 }
   0x9   : > { %s8808_s11 = smov (%p33_p4, %s8806_s11), 0  ;;  %314 = sbr.rel (%p311_p3) target bundleno = 1456 (0x5b0), region = 44 }
   0xe   : > { %p378_p5 = scmp.lt.s32.totalorder %s5354_s28, 1  ;;  %s4918_s12 = smul.u32 224, %s5350_s27  ;;  %vm1089_vm0 = vcmask 1040384   ;;  %vm1090_vm1 = vcmask 1044484   ;;  %vm727_vm3 = vcmask 1042432   ;;  %vm728_vm4 = vcmask 1046532  }
   0xf   : > { %vm5472_vm2 = vmor %vm1089_vm0, %vm1090_vm1  ;;  %vm806_vm5 = vcmask 1041408   ;;  %vm807_vm6 = vcmask 1045508   ;;  %s5368_s18 = smov 12   ;;  %s5369_s19 = smov 8   ;;  %vm2446_vm9 = vcmask 31744   ;;  %vm2471_vm10 = vcmask 64512  }
  0x10   : > { %s8810_s28 = smov (!%p378_p5, %s5354_s28), 1  ;;  %vm5485_vm7 = vmor %vm727_vm3, %vm728_vm4  ;;  %s5370_s20 = smov 4   ;;  %vm2488_vm11 = vcmask 97280   ;;  %vm2505_vm12 = vcmask 130048   ;;  %vm8444_vm13 = vcmask 162816   ;;  %vm8439_vm14 = vcmask 195584  }
  0x11   : > { %s5072_s13 = smul.u32 1456, %s8810_s28  ;;  %vm5530_vm8 = vmor %vm806_vm5, %vm807_vm6  ;;  %s8413_s21 = smov 16   ;;  %vm8441_vm15 = vcmask 228352   ;;  %vm8437_vm0 = vcmask 261120   ;;  %vm8438_vm1 = vcmask 293888   ;;  %vm2607_vm3 = vcmask 326656  }
  0x12   : > { %s8418_s22 = smov 20   ;;  %s8423_s23 = smov 24   ;;  %vm2624_vm4 = vcmask 359424   ;;  %vm2641_vm5 = vcmask 392192   ;;  %vm2658_vm6 = vcmask 424960   ;;  %v5183_v0 = vld [vmem:[%s8367_s3 + $0x30] sm:$0xff]  }
  0x13   : > { %s382_s16 = scalar_lea.vmem %s8364_s0, %s5072_s13  ;;  %s5374_s24 = smov 28  }
  0x14   : > { %s5470_s17 = scalar_lea.vmem %s382_s16, %s4918_s12  ;;  %s5375_s25 = smov 32  }
  0x15   : > { %v5131_v1 = vld [vmem:[%s5470_s17 + $0x1c] sm:$0xff]   ;;  %v614_v3 = vld [vmem:[%s5470_s17 + $0x354] sm:$0xf]  ;;  %v615_v4 = vld [vmem:[%s5470_s17 + $0x358] sm:$0xf]  ;;  %s5376_s26 = smov 36  }
  0x16   : > { %v5132_v2 = vld [vmem:[%s5470_s17] sm:$0xff]   ;;  %2845 = vrot.lane.b32.xlu1 %v5131_v1, %s5368_s18  ;;  %v616_v5 = vld [vmem:[%s5470_s17 + $0x35c] sm:$0xf]  ;;  %v4640_v6 = vrot.slane %v614_v3, 11  ;;  %v1534_v7 = vrot.slane %v615_v4, 7  ;;  %v1057_v11 = vrot.slane %v614_v3, 5 }
  0x17   : > { %2843 = vrot.lane.b32.xlu0 %v5132_v2, %s5368_s18  ;;  %v1537_v8 = vrot.slane %v616_v5, 7  ;;  %v613_v9 = vld [vmem:[%s5470_s17 + $0x350] sm:$0xf]  ;;  %v1060_v13 = vrot.slane %v615_v4, 5  ;;  %v621_v15 = vld [vmem:[%s5470_s17 + $0x374] sm:$0xf] }
  0x18   : > { %v4586_v12 = vrot.slane %v613_v9, 9  ;;  %v620_v14 = vld [vmem:[%s5470_s17 + $0x370] sm:$0xf]  ;;  %v1535_v16 = vsel %vm5472_vm2, %v4640_v6, %v1534_v7  ;;  %v1536_v17 = vrot.slane %v1534_v7, 4  ;;  %v1059_v18 = vrot.slane %v1057_v11, 4  ;;  %s5377_s12 = smov 40  }
  0x19   : > { %v622_v19 = vld [vmem:[%s5470_s17 + $0x378] sm:$0xf]  ;;  %v4641_v20 = vrot.slane %v620_v14, 11  ;;  %v1541_v22 = vrot.slane %v621_v15, 7  ;;  %v619_v24 = vld [vmem:[%s5470_s17 + $0x36c] sm:$0xf] }
  0x1a   : > { %v1058_v21 = vsel %vm5485_vm7, %v4586_v12, %v1057_v11  ;;  %v1544_v23 = vrot.slane %v622_v19, 7  ;;  %v1064_v25 = vrot.slane %v620_v14, 5  ;;  %v1538_v26 = vsel %vm5472_vm2, %v1536_v17, %v1537_v8  ;;  %v440_v30 = vld [vmem:[%s5470_s17 + $0x24] sm:$0xf]  ;;  %v441_v31 = vld [vmem:[%s5470_s17 + $0x28] sm:$0xf] }
  0x1b   : > { %v1061_v27 = vsel %vm5485_vm7, %v1059_v18, %v1060_v13  ;;  %v4587_v28 = vrot.slane %v619_v24, 9  ;;  %v1067_v29 = vrot.slane %v621_v15, 5  ;;  %v4796_v32 = vcombine.low %v1535_v16, %v1538_v26  ;;  %v442_v36 = vld [vmem:[%s5470_s17 + $0x2c] sm:$0xf]  ;;  %v433_v37 = vld [vmem:[%s5470_s17 + $0x8] sm:$0xf] }
  0x1c   : > { %v5503_v33 = vcombine.low %v1058_v21, %v1061_v27  ;;  %v1542_v34 = vsel %vm5472_vm2, %v4641_v20, %v1541_v22  ;;  %v1543_v35 = vrot.slane %v1541_v22, 4  ;;  %v1066_v39 = vrot.slane %v1064_v25, 4  ;;  %v434_v42 = vld [vmem:[%s5470_s17 + $0xc] sm:$0xf]  ;;  %v435_v45 = vld [vmem:[%s5470_s17 + $0x10] sm:$0xf] }
  0x1d   : > { %v1065_v38 = vsel %vm5485_vm7, %v4587_v28, %v1064_v25  ;;  %v4649_v40 = vrot.slane %v440_v30, 9  ;;  %v1615_v41 = vrot.slane %v441_v31, 5  ;;  %2791 = vrot.lane.b32.xlu1 %v4796_v32, %s5369_s19  ;;  %v1618_v44 = vrot.slane %v442_v36, 5  ;;  %v443_v52 = vld [vmem:[%s5470_s17 + $0x30] sm:$0xf]  ;;  %s8426_s13 = smov 44  }
  0x1e   : > { %8449 = vst [vmem:[#allocation2_spill] sm:$0xff] %v5503_v33  ;;  %2751 = vrot.lane.b32.xlu0 %v5503_v33, %s5370_s20  ;;  %v1545_v43 = vsel %vm5472_vm2, %v1543_v35, %v1544_v23  ;;  %v4648_v46 = vrot.slane %v433_v37, 9  ;;  %v1608_v47 = vrot.slane %v434_v42, 5  ;;  %v1068_v49 = vsel %vm5485_vm7, %v1066_v39, %v1067_v29  ;;  %v444_v53 = vld [vmem:[%s5470_s17 + $0x34] sm:$0x3]  ;;  %s8428_s16 = smov 48  }
  0x1f   : > { %v4797_v48 = vcombine.low %v1542_v34, %v1545_v43  ;;  %v1616_v50 = vsel %vm5485_vm7, %v4649_v40, %v1615_v41  ;;  %v1617_v51 = vrot.slane %v1615_v41, 4  ;;  %v5524_v54 = vcombine.low %v1065_v38, %v1068_v49  ;;  %v436_v59 = vld [vmem:[%s5470_s17 + $0x14] sm:$0xf]  ;;  %v437_v60 = vld [vmem:[%s5470_s17 + $0x18] sm:$0x3]  ;;  %s5383_s14 = smov 64  }
  0x20   : > { %v1609_v55 = vsel %vm5485_vm7, %v4648_v46, %v1608_v47  ;;  %v1610_v56 = vrot.slane %v1608_v47, 4  ;;  %v1611_v57 = vrot.slane %v435_v45, 5  ;;  %v4655_v62 = vrot.slane %v442_v36, 10  ;;  %v546_v13 = vld [vmem:[%s5470_s17 + $0x214] sm:$0xf]  ;;  %s8626_s15 = smov 16  }
  0x21   : > { %8450 = vst [vmem:[#allocation3_spill] sm:$0xff] %v5524_v54  ;;  %v1619_v61 = vsel %vm5485_vm7, %v1617_v51, %v1618_v44  ;;  %v1671_v63 = vrot.slane %v443_v52, 6  ;;  %v1674_v1 = vrot.slane %v444_v53, 6  ;;  %2793 = vrot.lane.b32.xlu1 %v4797_v48, %s5369_s19  ;;  %v4654_v4 = vrot.slane %v435_v45, 10  ;;  %v547_v14 = vld [vmem:[%s5470_s17 + $0x218] sm:$0xf] }
  0x22   : > { %2753 = vrot.lane.b32.xlu0 %v5524_v54, %s5370_s20  ;;  %v4813_v2 = vcombine.low %v1616_v50, %v1619_v61  ;;  %v1612_v3 = vsel %vm5485_vm7, %v1610_v56, %v1611_v57  ;;  %v1664_v5 = vrot.slane %v436_v59, 6  ;;  %v1667_v9 = vrot.slane %v437_v60, 6  ;;  %v548_v15 = vld [vmem:[%s5470_s17 + $0x21c] sm:$0xf]  ;;  %v539_v17 = vld [vmem:[%s5470_s17 + $0x1f8] sm:$0xf] }
  0x23   : > { %v4812_v6 = vcombine.low %v1609_v55, %v1612_v3  ;;  %v1672_v7 = vsel %vm5530_vm8, %v4655_v62, %v1671_v63  ;;  %v1673_v8 = vrot.slane %v1671_v63, 4  ;;  %v540_v18 = vld [vmem:[%s5470_s17 + $0x1fc] sm:$0xf]  ;;  %v549_v19 = vld [vmem:[%s5470_s17 + $0x220] sm:$0xf]  ;;  %v4549_v27 = vrot.slane %v548_v15, 9 }
  0x24   : > { %v1665_v11 = vsel %vm5530_vm8, %v4654_v4, %v1664_v5  ;;  %v1666_v12 = vrot.slane %v1664_v5, 4  ;;  %v5556_v20 = vld [vmem:[%s5470_s17 + $0x224] sm:$0xf]  ;;  %v541_v21 = vld [vmem:[%s5470_s17 + $0x200] sm:$0xf]  ;;  %v739_v30 = vrot.slane %v549_v19, 5  ;;  %v4827_v35 = vcombine.low %v546_v13, %v547_v14 }
  0x25   : > { %v1675_v16 = vsel %vm5530_vm8, %v1673_v8, %v1674_v1  ;;  %2879 = vrot.lane.b32.xlu1 %v4813_v2, %s8413_s21  ;;  %v542_v24 = vld [vmem:[%s5470_s17 + $0x204] sm:$0xf]  ;;  %v543_v25 = vld [vmem:[%s5470_s17 + $0x208] sm:$0xf]  ;;  %v5567_v29 = vld [vmem:[%s5470_s17 + $0x38c] sm:$0xf]  ;;  %v4826_v40 = vcombine.low %v539_v17, %v540_v18 }
  0x26   : > { %2877 = vrot.lane.b32.xlu0 %v4812_v6, %s8413_s21  ;;  %v4819_v22 = vcombine.low %v1672_v7, %v1675_v16  ;;  %v1668_v23 = vsel %vm5530_vm8, %v1666_v12, %v1667_v9  ;;  %v625_v28 = vld [vmem:[%s5470_s17 + $0x388] sm:$0xf]  ;;  %v742_v31 = vrot.slane %v5556_v20, 5  ;;  %v4548_v32 = vrot.slane %v541_v21, 9  ;;  %v5571_v34 = vld [vmem:[%s5470_s17 + $0x390] sm:$0xf] }
  0x27   : > { %v4818_v26 = vcombine.low %v1665_v11, %v1668_v23  ;;  %v732_v36 = vrot.slane %v542_v24, 5  ;;  %v735_v37 = vrot.slane %v543_v25, 5  ;;  %v4634_v38 = vrot.slane %v625_v28, 9  ;;  %v544_v39 = vld [vmem:[%s5470_s17 + $0x20c] sm:$0xf] }
  0x28   : > { %v741_v41 = vrot.slane %v739_v30, 4  ;;  %v1484_v42 = vrot.slane %v5567_v29, 5  ;;  %v1487_v43 = vrot.slane %v5571_v34, 5  ;;  %v545_v44 = vld [vmem:[%s5470_s17 + $0x210] sm:$0x3]  ;;  %v740_v45 = vsel %vm5485_vm7, %v4549_v27, %v739_v30 }
  0x29   : > { %2919 = vrot.lane.b32.xlu1 %v4819_v22, %s8418_s22  ;;  %v733_v46 = vsel %vm5485_vm7, %v4548_v32, %v732_v36  ;;  %v734_v47 = vrot.slane %v732_v36, 4  ;;  %v4662_v48 = vrot.slane %v543_v25, 10  ;;  %v1728_v51 = vrot.slane %v544_v39, 6  ;;  %v551_v56 = vld [vmem:[%s5470_s17 + $0x228] sm:$0xf] }
  0x2a   : > { %2917 = vrot.lane.b32.xlu0 %v4818_v26, %s8418_s22  ;;  %v743_v49 = vsel %vm5485_vm7, %v741_v41, %v742_v31  ;;  %v1486_v50 = vrot.slane %v1484_v42, 4  ;;  %v1485_v53 = vsel %vm5485_vm7, %v4634_v38, %v1484_v42  ;;  %v1731_v55 = vrot.slane %v545_v44, 6  ;;  %v552_v57 = vld [vmem:[%s5470_s17 + $0x22c] sm:$0x3]  ;;  %v628_v1 = vld [vmem:[%s5470_s17 + $0x394] sm:$0xf] }
  0x2b   : > { %v736_v52 = vsel %vm5485_vm7, %v734_v47, %v735_v37  ;;  %v5593_v59 = vcombine.low %v740_v45, %v743_v49  ;;  %v1730_v62 = vrot.slane %v1728_v51, 4  ;;  %v1729_v63 = vsel %vm5530_vm8, %v4662_v48, %v1728_v51  ;;  %v631_v2 = vld [vmem:[%s5470_s17 + $0x3a4] sm:$0xf]  ;;  %v5607_v7 = vld [vmem:[%s5470_s17 + $0x3a8] sm:$0xf] }
  0x2c   : > { %v5595_v60 = vcombine.low %v733_v46, %v736_v52  ;;  %v1488_v61 = vsel %vm5485_vm7, %v1486_v50, %v1487_v43  ;;  %v4663_v4 = vrot.slane %v5556_v20, 10  ;;  %v1735_v5 = vrot.slane %v551_v56, 6  ;;  %v5610_v9 = vld [vmem:[%s5470_s17 + $0x3f0] sm:$0xf]  ;;  %v5614_v12 = vld [vmem:[%s5470_s17 + $0x3ac] sm:$0xf] }
  0x2d   : > { %2959 = vrot.lane.b32.xlu1 %v4827_v35, %s8423_s23  ;;  %8453 = vst [vmem:[#allocation4_spill] sm:$0xff] %v5593_v59  ;;  %v1732_v3 = vsel %vm5530_vm8, %v1730_v62, %v1731_v55  ;;  %v1738_v6 = vrot.slane %v552_v57, 6  ;;  %v4790_v8 = vcombine.low %v1485_v53, %v1488_v61  ;;  %v1548_v11 = vrot.slane %v5571_v34, 7  ;;  %v5621_v14 = vld [vmem:[%s5470_s17 + $0x3f4] sm:$0xf] }
  0x2e   : > { %2957 = vrot.lane.b32.xlu0 %v4826_v40, %s8423_s23  ;;  %8454 = vst [vmem:[#allocation5_spill] sm:$0xff] %v5595_v60  ;;  %v4834_v13 = vcombine.low %v1729_v63, %v1732_v3  ;;  %v1736_v15 = vsel %vm5530_vm8, %v4663_v4, %v1735_v5  ;;  %v1737_v16 = vrot.slane %v1735_v5, 4  ;;  %v4642_v17 = vrot.slane %v5567_v29, 11  ;;  %v5627_v18 = vld [vmem:[%s5470_s17 + $0x3f8] sm:$0xf] }
  0x2f   : > { %v1550_v19 = vrot.slane %v1548_v11, 4  ;;  %v1551_v20 = vrot.slane %v628_v1, 7  ;;  %v4635_v21 = vrot.slane %v631_v2, 9  ;;  %v1491_v22 = vrot.slane %v5607_v7, 5  ;;  %v5631_v23 = vld [vmem:[%s5470_s17 + $0x3fc] sm:$0xf] }
  0x30   : > { %v1739_v24 = vsel %vm5530_vm8, %v1737_v16, %v1738_v6  ;;  %v1494_v25 = vrot.slane %v5614_v12, 5  ;;  %v5637_v26 = vld [vmem:[%s5470_s17 + $0x400] sm:$0xf]  ;;  %v4842_v27 = vcombine.low %v5610_v9, %v5621_v14  ;;  %v1549_v30 = vsel %vm5472_vm2, %v4642_v17, %v1548_v11  ;;  %v5655_v38 = vld [vmem:[%s5470_s17 + $0x404] sm:$0xf] }
  0x31   : > { %2975 = vrot.lane.b32.xlu1 %v5593_v59, %s5374_s24  ;;  %v1493_v28 = vrot.slane %v1491_v22, 4  ;;  %v4835_v29 = vcombine.low %v1736_v15, %v1739_v24  ;;  %v4638_v31 = vrot.slane %v5627_v18, 9  ;;  %v1512_v32 = vrot.slane %v5631_v23, 5  ;;  %v634_v40 = vld [vmem:[%s5470_s17 + $0x3b0] sm:$0xf] }
  0x32   : > { %2973 = vrot.lane.b32.xlu0 %v5595_v60, %s5374_s24  ;;  %v1552_v34 = vsel %vm5472_vm2, %v1550_v19, %v1551_v20  ;;  %v1492_v35 = vsel %vm5485_vm7, %v4635_v21, %v1491_v22  ;;  %v1515_v37 = vrot.slane %v5637_v26, 5  ;;  %v1555_v41 = vrot.slane %v5614_v12, 7  ;;  %v5660_v42 = vld [vmem:[%s5470_s17 + $0x40c] sm:$0xf]  ;;  %v5663_v43 = vld [vmem:[%s5470_s17 + $0x410] sm:$0xf] }
  0x33   : > { %v1495_v36 = vsel %vm5485_vm7, %v1493_v28, %v1494_v25  ;;  %v1514_v39 = vrot.slane %v1512_v32, 4  ;;  %v5666_v44 = vld [vmem:[%s5470_s17 + $0x418] sm:$0xf]  ;;  %v4798_v45 = vcombine.low %v1549_v30, %v1552_v34  ;;  %v4643_v47 = vrot.slane %v5607_v7, 11  ;;  %v653_v48 = vld [vmem:[%s5470_s17 + $0x408] sm:$0x3] }
  0x34   : > { %v4791_v46 = vcombine.low %v1492_v35, %v1495_v36  ;;  %v1858_v49 = vrot.slane %v5655_v38, 6  ;;  %v448_v50 = vld [vmem:[%s5470_s17 + $0x44] sm:$0xf]  ;;  %v1513_v51 = vsel %vm5485_vm7, %v4638_v31, %v1512_v32  ;;  %v1557_v53 = vrot.slane %v1555_v41, 4  ;;  %v5679_v56 = vld [vmem:[%s5470_s17 + $0x414] sm:$0xf] }
  0x35   : > { %2755 = vrot.lane.b32.xlu1 %v4790_v8, %s5370_s20  ;;  %v1516_v52 = vsel %vm5485_vm7, %v1514_v39, %v1515_v37  ;;  %v1558_v55 = vrot.slane %v634_v40, 7  ;;  %v5682_v57 = vld [vmem:[%s5470_s17 + $0x41c] sm:$0xf]  ;;  %v1519_v61 = vrot.slane %v5666_v44, 5  ;;  %v4843_v62 = vcombine.low %v5660_v42, %v5663_v43  ;;  %v447_v1 = vld [vmem:[%s5470_s17 + $0x40] sm:$0xf] }
  0x36   : > { %3013 = vrot.lane.b32.xlu0 %v4834_v13, %s5375_s25  ;;  %v4676_v63 = vrot.slane %v5637_v26, 10  ;;  %v5690_v2 = vld [vmem:[%s5470_s17 + $0x48] sm:$0xf]  ;;  %v1622_v3 = vrot.slane %v448_v50, 5  ;;  %v5694_v4 = vcombine.low %v1513_v51, %v1516_v52  ;;  %v1556_v5 = vsel %vm5472_vm2, %v4643_v47, %v1555_v41  ;;  %v455_v8 = vld [vmem:[%s5470_s17 + $0x60] sm:$0xf] }
  0x37   : > { %v1860_v6 = vrot.slane %v1858_v49, 4  ;;  %v1861_v7 = vrot.slane %v653_v48, 6  ;;  %v5700_v11 = vld [vmem:[%s5470_s17 + $0x420] sm:$0xf]  ;;  %v1559_v12 = vsel %vm5472_vm2, %v1557_v53, %v1558_v55  ;;  %v4639_v13 = vrot.slane %v5679_v56, 9 }
  0x38   : > { %v1521_v15 = vrot.slane %v1519_v61, 4  ;;  %v1522_v16 = vrot.slane %v5682_v57, 5  ;;  %v4650_v17 = vrot.slane %v447_v1, 9  ;;  %v454_v19 = vld [vmem:[%s5470_s17 + $0x5c] sm:$0xf]  ;;  %v1624_v20 = vrot.slane %v1622_v3, 4 }
  0x39   : > { %3065 = vrot.lane.b32.xlu1 %v4842_v27, %s5376_s26  ;;  %v1625_v21 = vrot.slane %v5690_v2, 5  ;;  %v456_v22 = vld [vmem:[%s5470_s17 + $0x64] sm:$0xf]  ;;  %v1629_v24 = vrot.slane %v455_v8, 5  ;;  %v1865_v25 = vrot.slane %v5700_v11, 6  ;;  %v5137_v27 = vld [vmem:[%s5470_s17 + $0x38] sm:$0xff]   ;;  %v4799_v28 = vcombine.low %v1556_v5, %v1559_v12 }
  0x3a   : > { %3015 = vrot.lane.b32.xlu0 %v4835_v29, %s5375_s25  ;;  %v660_v29 = vld [vmem:[%s5470_s17 + $0x424] sm:$0x3]  ;;  %v1859_v30 = vsel %vm5530_vm8, %v4676_v63, %v1858_v49  ;;  %v1862_v31 = vsel %vm5530_vm8, %v1860_v6, %v1861_v7  ;;  %v1520_v32 = vsel %vm5485_vm7, %v4639_v13, %v1519_v61  ;;  %v1523_v34 = vsel %vm5485_vm7, %v1521_v15, %v1522_v16  ;;  %v457_v35 = vld [vmem:[%s5470_s17 + $0x68] sm:$0xf]  ;;  %v450_v36 = vld [vmem:[%s5470_s17 + $0x4c] sm:$0xf] }
  0x3b   : > { %v1623_v37 = vsel %vm5485_vm7, %v4650_v17, %v1622_v3  ;;  %v4651_v39 = vrot.slane %v454_v19, 9  ;;  %v1632_v40 = vrot.slane %v456_v22, 5  ;;  %v4677_v41 = vrot.slane %v5682_v57, 10  ;;  %v458_v51 = vld [vmem:[%s5470_s17 + $0x6c] sm:$0x3]  ;;  %v5138_v7 = vld [vmem:[%s5470_s17 + $0x54] sm:$0xff]  }
  0x3c   : > { %v1867_v47 = vrot.slane %v1865_v25, 4  ;;  %v1868_v48 = vrot.slane %v660_v29, 6  ;;  %v4856_v49 = vcombine.low %v1859_v30, %v1862_v31  ;;  %v5732_v50 = vcombine.low %v1520_v32, %v1523_v34  ;;  %v451_v55 = vld [vmem:[%s5470_s17 + $0x50] sm:$0x3]  ;;  %v563_v16 = vld [vmem:[%s5470_s17 + $0x258] sm:$0xf] }
  0x3d   : > { %2795 = vrot.lane.b32.xlu1 %v4798_v45, %s5369_s19  ;;  %v1626_v45 = vsel %vm5485_vm7, %v1624_v20, %v1625_v21  ;;  %v1685_v52 = vrot.slane %v457_v35, 6  ;;  %v1678_v53 = vrot.slane %v450_v36, 6  ;;  %v1866_v63 = vsel %vm5530_vm8, %v4677_v41, %v1865_v25  ;;  %v556_v17 = vld [vmem:[%s5470_s17 + $0x23c] sm:$0xf]  ;;  %v555_v29 = vld [vmem:[%s5470_s17 + $0x238] sm:$0xf] }
  0x3e   : > { %2757 = vrot.lane.b32.xlu0 %v4791_v46, %s5370_s20  ;;  %v1631_v46 = vrot.slane %v1629_v24, 4  ;;  %v4814_v61 = vcombine.low %v1623_v37, %v1626_v45  ;;  %v1869_v3 = vsel %vm5530_vm8, %v1867_v47, %v1868_v48  ;;  %v4657_v5 = vrot.slane %v456_v22, 10  ;;  %v562_v22 = vld [vmem:[%s5470_s17 + $0x254] sm:$0xf]  ;;  %v560_v30 = vld [vmem:[%s5470_s17 + $0x24c] sm:$0xf] }
  0x3f   : > { %v1688_v6 = vrot.slane %v458_v51, 6  ;;  %v1687_v8 = vrot.slane %v1685_v52, 4  ;;  %v4656_v12 = vrot.slane %v5690_v2, 10  ;;  %v1680_v13 = vrot.slane %v1678_v53, 4  ;;  %v557_v31 = vld [vmem:[%s5470_s17 + $0x240] sm:$0xf] }
  0x40   : > { %v1633_v1 = vsel %vm5485_vm7, %v1631_v46, %v1632_v40  ;;  %v1681_v15 = vrot.slane %v451_v55, 6  ;;  %v4857_v20 = vcombine.low %v1866_v63, %v1869_v3  ;;  %v1686_v21 = vsel %vm5530_vm8, %v4657_v5, %v1685_v52  ;;  %v5769_v34 = vld [vmem:[%s5470_s17 + $0x3c4] sm:$0xf]  ;;  %v561_v35 = vld [vmem:[%s5470_s17 + $0x250] sm:$0xf] }
  0x41   : > { %3099 = vrot.lane.b32.xlu1 %v5694_v4, %s5377_s12  ;;  %v1689_v2 = vsel %vm5530_vm8, %v1687_v8, %v1688_v6  ;;  %v746_v32 = vrot.slane %v556_v17, 5  ;;  %v553_v36 = vld [vmem:[%s5470_s17 + $0x230] sm:$0xf]  ;;  %v558_v37 = vld [vmem:[%s5470_s17 + $0x244] sm:$0xf]  ;;  %v4551_v45 = vrot.slane %v562_v22, 9 }
  0x42   : > { %3067 = vrot.lane.b32.xlu0 %v4843_v62, %s5376_s26  ;;  %v1630_v62 = vsel %vm5485_vm7, %v4651_v39, %v1629_v24  ;;  %v1679_v24 = vsel %vm5530_vm8, %v4656_v12, %v1678_v53  ;;  %v1682_v25 = vsel %vm5530_vm8, %v1680_v13, %v1681_v15  ;;  %v4821_v39 = vcombine.low %v1686_v21, %v1689_v2  ;;  %v554_v41 = vld [vmem:[%s5470_s17 + $0x234] sm:$0xf]  ;;  %v637_v47 = vld [vmem:[%s5470_s17 + $0x3c0] sm:$0xf]  ;;  %v639_v52 = vld [vmem:[%s5470_s17 + $0x3c8] sm:$0xf] }
  0x43   : > { %v4815_v19 = vcombine.low %v1630_v62, %v1633_v1  ;;  %v4820_v40 = vcombine.low %v1679_v24, %v1682_v25  ;;  %v749_v51 = vrot.slane %v557_v31, 5  ;;  %v1498_v53 = vrot.slane %v5769_v34, 5  ;;  %v559_v63 = vld [vmem:[%s5470_s17 + $0x248] sm:$0x3]  ;;  %v565_v1 = vld [vmem:[%s5470_s17 + $0x260] sm:$0xf] }
  0x44   : > { %v748_v55 = vrot.slane %v746_v32, 4  ;;  %v4829_v62 = vcombine.low %v560_v30, %v561_v35  ;;  %v4828_v3 = vcombine.low %v553_v36, %v554_v41  ;;  %v4636_v6 = vrot.slane %v637_v47, 9  ;;  %v5795_v22 = vld [vmem:[%s5470_s17 + $0x3e0] sm:$0xf]  ;;  %v643_v41 = vld [vmem:[%s5470_s17 + $0x3dc] sm:$0xf] }
  0x45   : > { %2847 = vrot.lane.b32.xlu1 %v5137_v27, %s5368_s18  ;;  %v5763_v27 = vld [vmem:[%s5470_s17 + $0x25c] sm:$0xf]  ;;  %v1500_v13 = vrot.slane %v1498_v53, 4  ;;  %v4664_v15 = vrot.slane %v557_v31, 10  ;;  %v1749_v21 = vrot.slane %v565_v1, 6  ;;  %v1562_v25 = vrot.slane %v639_v52, 7 }
  0x46   : > { %2797 = vrot.lane.b32.xlu0 %v4799_v28, %s5369_s19  ;;  %v753_v28 = vrot.slane %v563_v16, 5  ;;  %v756_v46 = vrot.slane %v5763_v27, 5  ;;  %v750_v16 = vsel %vm5485_vm7, %v748_v55, %v749_v51  ;;  %v1499_v24 = vsel %vm5485_vm7, %v4636_v6, %v1498_v53  ;;  %v646_v6 = vld [vmem:[%s5470_s17 + $0x3e8] sm:$0xf]  ;;  %v479_v33 = vld [vmem:[%s5470_s17 + $0xc0] sm:$0x3] }
  0x47   : > { %v4665_v30 = vrot.slane %v5763_v27, 10  ;;  %v1564_v47 = vrot.slane %v1562_v25, 4  ;;  %v4637_v55 = vrot.slane %v643_v41, 9  ;;  %v672_v41 = vld [vmem:[%s5470_s17 + $0x454] sm:$0xf] }
  0x48   : > { %v755_v48 = vrot.slane %v753_v28, 4  ;;  %v754_v5 = vsel %vm5485_vm7, %v4551_v45, %v753_v28  ;;  %v645_v45 = vld [vmem:[%s5470_s17 + $0x3e4] sm:$0xf] }
  0x49   : > { %3139 = vrot.lane.b32.xlu1 %v4856_v49, %s8426_s13  ;;  %v4550_v49 = vrot.slane %v555_v29, 9  ;;  %v1750_v51 = vsel %vm5530_vm8, %v4665_v30, %v1749_v21 }
  0x4a   : > { %3101 = vrot.lane.b32.xlu0 %v5732_v50, %s5377_s12  ;;  %v757_v8 = vsel %vm5485_vm7, %v755_v48, %v756_v46  ;;  %v4644_v46 = vrot.slane %v5769_v34, 11 }
  0x4b   : > { %v747_v12 = vsel %vm5485_vm7, %v4550_v49, %v746_v32  ;;  %v5797_v2 = vcombine.low %v754_v5, %v757_v8  ;;  %v640_v32 = vld [vmem:[%s5470_s17 + $0x3cc] sm:$0xf] }
  0x4c   : > { %v5803_v28 = vcombine.low %v747_v12, %v750_v16  ;;  %v1565_v27 = vrot.slane %v640_v32, 7  ;;  %v1563_v1 = vsel %vm5472_vm2, %v4644_v46, %v1562_v25  ;;  %v666_v16 = vld [vmem:[%s5470_s17 + $0x43c] sm:$0xf]  ;;  %v4645_v25 = vrot.slane %v5795_v22, 11 }
  0x4d   : > { %2881 = vrot.lane.b32.xlu1 %v4814_v61, %s8413_s21  ;;  %v1742_v61 = vrot.slane %v558_v37, 6  ;;  %8455 = vst [vmem:[#allocation6_spill] sm:$0xff] %v5797_v2  ;;  %v1751_v37 = vrot.slane %v1749_v21, 4  ;;  %v1872_v30 = vrot.slane %v666_v16, 6  ;;  %v5143_v16 = vld [vmem:[%s5470_s17 + $0x70] sm:$0xff]  }
  0x4e   : > { %2849 = vrot.lane.b32.xlu0 %v5138_v7, %s5368_s18  ;;  %v1501_v7 = vrot.slane %v639_v52, 5  ;;  %8456 = vst [vmem:[#allocation7_spill] sm:$0xff] %v5803_v28  ;;  %v663_v52 = vld [vmem:[%s5470_s17 + $0x430] sm:$0xf] }
  0x4f   : > { %v1744_v17 = vrot.slane %v1742_v61, 4  ;;  %v1743_v35 = vsel %vm5530_vm8, %v4664_v15, %v1742_v61  ;;  %v4670_v5 = vrot.slane %v663_v52, 9  ;;  %v1569_v15 = vrot.slane %v645_v45, 7  ;;  %v469_v52 = vld [vmem:[%s5470_s17 + $0x98] sm:$0xf] }
  0x50   : > { %v1502_v29 = vsel %vm5485_vm7, %v1500_v13, %v1501_v7  ;;  %v5141_v7 = vld [vmem:[%s5470_s17 + $0x428] sm:$0xff]  }
  0x51   : > { %2883 = vrot.lane.b32.xlu1 %v4815_v19, %s8413_s21  ;;  %v1745_v19 = vrot.slane %v559_v63, 6  ;;  %v4792_v48 = vcombine.low %v1499_v24, %v1502_v29  ;;  %v665_v63 = vld [vmem:[%s5470_s17 + $0x438] sm:$0xf]  ;;  %v1572_v29 = vrot.slane %v646_v6, 7 }
  0x52   : > { %3141 = vrot.lane.b32.xlu0 %v4857_v20, %s8426_s13  ;;  %v566_v20 = vld [vmem:[%s5470_s17 + $0x264] sm:$0x3]  ;;  %v1805_v13 = vrot.slane %v665_v63, 5 }
  0x53   : > { %v1752_v31 = vrot.slane %v566_v20, 6  ;;  %v1746_v36 = vsel %vm5530_vm8, %v1744_v17, %v1745_v19  ;;  %v671_v20 = vld [vmem:[%s5470_s17 + $0x450] sm:$0xf] }
  0x54   : > { %v4836_v49 = vcombine.low %v1743_v35, %v1746_v36  ;;  %v1571_v36 = vrot.slane %v1569_v15, 4 }
  0x55   : > { %2923 = vrot.lane.b32.xlu1 %v4821_v39, %s8418_s22  ;;  %v1505_v39 = vrot.slane %v5795_v22, 5  ;;  %v1753_v34 = vsel %vm5530_vm8, %v1751_v37, %v1752_v31  ;;  %v462_v31 = vld [vmem:[%s5470_s17 + $0x7c] sm:$0xf]  ;;  %v667_v37 = vld [vmem:[%s5470_s17 + $0x440] sm:$0x3]  ;;  %v4678_v22 = vrot.slane %v665_v63, 10 }
  0x56   : > { %2921 = vrot.lane.b32.xlu0 %v4820_v40, %s8418_s22  ;;  %v664_v40 = vld [vmem:[%s5470_s17 + $0x434] sm:$0xf]  ;;  %v4837_v8 = vcombine.low %v1750_v51, %v1753_v34  ;;  %v1636_v46 = vrot.slane %v462_v31, 5  ;;  %v5857_v51 = vld [vmem:[%s5470_s17 + $0x80] sm:$0xf]  ;;  %v1573_v34 = vsel %vm5472_vm2, %v1571_v36, %v1572_v29  ;;  %v4679_v36 = vrot.slane %v672_v41, 10 }
  0x57   : > { %v1802_v53 = vrot.slane %v664_v40, 5  ;;  %v1507_v61 = vrot.slane %v1505_v39, 4  ;;  %v1506_v17 = vsel %vm5485_vm7, %v4637_v55, %v1505_v39  ;;  %v1809_v39 = vrot.slane %v671_v20, 5  ;;  %v670_v40 = vld [vmem:[%s5470_s17 + $0x44c] sm:$0xf] }
  0x58   : > { %v4671_v55 = vrot.slane %v670_v40, 9  ;;  %v1639_v6 = vrot.slane %v5857_v51, 5  ;;  %v471_v29 = vld [vmem:[%s5470_s17 + $0xa0] sm:$0xf]  ;;  %v472_v40 = vld [vmem:[%s5470_s17 + $0xa4] sm:$0x3] }
  0x59   : > { %2963 = vrot.lane.b32.xlu1 %v4829_v62, %s8423_s23  ;;  %v1508_v62 = vrot.slane %v645_v45, 5  ;;  %v1804_v12 = vrot.slane %v1802_v53, 4  ;;  %v1803_v24 = vsel %vm5485_vm7, %v4670_v5, %v1802_v53  ;;  %v461_v45 = vld [vmem:[%s5470_s17 + $0x78] sm:$0xf]  ;;  %v5142_v53 = vld [vmem:[%s5470_s17 + $0x444] sm:$0xff]   ;;  %v1638_v5 = vrot.slane %v1636_v46, 4 }
  0x5a   : > { %2961 = vrot.lane.b32.xlu0 %v4828_v3, %s8423_s23  ;;  %v1566_v3 = vsel %vm5472_vm2, %v1564_v47, %v1565_v27  ;;  %v1570_v27 = vsel %vm5472_vm2, %v4645_v25, %v1569_v15  ;;  %v4652_v63 = vrot.slane %v461_v45, 9  ;;  %v470_v15 = vld [vmem:[%s5470_s17 + $0x9c] sm:$0xf] }
  0x5b   : > { %v1509_v19 = vsel %vm5485_vm7, %v1507_v61, %v1508_v62  ;;  %v4800_v21 = vcombine.low %v1563_v1, %v1566_v3  ;;  %v1806_v35 = vsel %vm5485_vm7, %v1804_v12, %v1805_v13  ;;  %v1811_v61 = vrot.slane %v1809_v39, 4  ;;  %v468_v1 = vld [vmem:[%s5470_s17 + $0x94] sm:$0xf]  ;;  %v673_v3 = vld [vmem:[%s5470_s17 + $0x458] sm:$0xf] }
  0x5c   : > { %v4793_v32 = vcombine.low %v1506_v17, %v1509_v19  ;;  %v4850_v47 = vcombine.low %v1803_v24, %v1806_v35  ;;  %v1812_v62 = vrot.slane %v672_v41, 5  ;;  %v1873_v12 = vsel %vm5530_vm8, %v4678_v22, %v1872_v30  ;;  %v674_v25 = vld [vmem:[%s5470_s17 + $0x45c] sm:$0x3] }
  0x5d   : > { %2979 = vrot.lane.b32.xlu1 %v5797_v2, %s5374_s24  ;;  %v1810_v17 = vsel %vm5485_vm7, %v4671_v55, %v1809_v39  ;;  %v4653_v20 = vrot.slane %v468_v1, 9  ;;  %v1637_v24 = vsel %vm5485_vm7, %v4652_v63, %v1636_v46  ;;  %v1640_v31 = vsel %vm5485_vm7, %v1638_v5, %v1639_v6 }
  0x5e   : > { %2977 = vrot.lane.b32.xlu0 %v5803_v28, %s5374_s24  ;;  %v1813_v19 = vsel %vm5485_vm7, %v1811_v61, %v1812_v62  ;;  %v1646_v35 = vrot.slane %v470_v15, 5  ;;  %v1882_v45 = vrot.slane %v674_v25, 6  ;;  %v1699_v46 = vrot.slane %v471_v29, 6  ;;  %v576_v25 = vld [vmem:[%s5470_s17 + $0x28c] sm:$0xf] }
  0x5f   : > { %v4851_v39 = vcombine.low %v1810_v17, %v1813_v19  ;;  %v1576_v41 = vrot.slane %v5637_v26, 7  ;;  %v4659_v55 = vrot.slane %v470_v15, 10  ;;  %v1579_v61 = vrot.slane %v5655_v38, 7  ;;  %v5144_v26 = vld [vmem:[%s5470_s17 + $0x8c] sm:$0xff]   ;;  %v6241_v28 = vld [vmem:[%s5470_s17 + $0x4c4] sm:$0xf] }
  0x60   : > { %v1702_v62 = vrot.slane %v472_v40, 6  ;;  %v4658_v63 = vrot.slane %v5857_v51, 10  ;;  %v1701_v5 = vrot.slane %v1699_v46, 4  ;;  %v4647_v15 = vrot.slane %v5666_v44, 11  ;;  %v569_v29 = vld [vmem:[%s5470_s17 + $0x270] sm:$0xf] }
  0x61   : > { %2759 = vrot.lane.b32.xlu1 %v4792_v48, %s5370_s20  ;;  %v1874_v48 = vrot.slane %v1872_v30, 4  ;;  %v464_v30 = vld [vmem:[%s5470_s17 + $0x84] sm:$0xf]  ;;  %v1700_v17 = vsel %vm5530_vm8, %v4659_v55, %v1699_v46  ;;  %v1583_v19 = vrot.slane %v5682_v57, 7  ;;  %v578_v57 = vld [vmem:[%s5470_s17 + $0x294] sm:$0xf] }
  0x62   : > { %3017 = vrot.lane.b32.xlu0 %v4836_v49, %s5375_s25  ;;  %v1875_v49 = vrot.slane %v667_v37, 6  ;;  %v574_v40 = vld [vmem:[%s5470_s17 + $0x284] sm:$0xf]  ;;  %v573_v55 = vld [vmem:[%s5470_s17 + $0x280] sm:$0x3] }
  0x64   : > { %v1876_v13 = vsel %vm5530_vm8, %v1874_v48, %v1875_v49  ;;  %v465_v49 = vld [vmem:[%s5470_s17 + $0x88] sm:$0x3] }
  0x65   : > { %3069 = vrot.lane.b32.xlu1 %v5141_v7, %s5376_s26  ;;  %v1643_v7 = vrot.slane %v469_v52, 5  ;;  %v4858_v37 = vcombine.low %v1873_v12, %v1876_v13  ;;  %v4646_v52 = vrot.slane %v5631_v23, 11  ;;  %v1578_v23 = vrot.slane %v1576_v41, 4  ;;  %v570_v12 = vld [vmem:[%s5470_s17 + $0x274] sm:$0xf] }
  0x66   : > { %3019 = vrot.lane.b32.xlu0 %v4837_v8, %s5375_s25  ;;  %v4801_v8 = vcombine.low %v1570_v27, %v1573_v34  ;;  %v4816_v27 = vcombine.low %v1637_v24, %v1640_v31  ;;  %v5936_v31 = vsel %vm5472_vm2, %v4647_v15, %v1583_v19  ;;  %v580_v15 = vld [vmem:[%s5470_s17 + $0x29c] sm:$0x3] }
  0x67   : > { %v1644_v48 = vsel %vm5485_vm7, %v4653_v20, %v1643_v7  ;;  %v5903_v1 = vsel %vm5472_vm2, %v4646_v52, %v1576_v41  ;;  %v5912_v38 = vsel %vm5472_vm2, %v1578_v23, %v1579_v61  ;;  %v1586_v20 = vrot.slane %v5700_v11, 7 }
  0x68   : > { %v4802_v13 = vcombine.low %v5903_v1, %v5912_v38 }
  0x69   : > { %2799 = vrot.lane.b32.xlu1 %v4800_v21, %s5369_s19  ;;  %v1879_v21 = vrot.slane %v673_v3, 6 }
  0x6a   : > { %2761 = vrot.lane.b32.xlu0 %v4793_v32, %s5370_s20  ;;  %v1645_v32 = vrot.slane %v1643_v7, 4  ;;  %v1695_v7 = vrot.slane %v465_v49, 6  ;;  %v4552_v49 = vrot.slane %v569_v29, 9 }
  0x6b   : > { %v1881_v22 = vrot.slane %v1879_v21, 4  ;;  %v1880_v34 = vsel %vm5530_vm8, %v4679_v36, %v1879_v21  ;;  %v1703_v21 = vsel %vm5530_vm8, %v1701_v5, %v1702_v62  ;;  %v572_v36 = vld [vmem:[%s5470_s17 + $0x27c] sm:$0xf]  ;;  %v579_v62 = vld [vmem:[%s5470_s17 + $0x298] sm:$0xf] }
  0x6c   : > { %v1756_v61 = vrot.slane %v572_v36, 6 }
  0x6d   : > { %3103 = vrot.lane.b32.xlu1 %v4850_v47, %s5377_s12  ;;  %v1692_v47 = vrot.slane %v464_v30, 6  ;;  %v1883_v3 = vsel %vm5530_vm8, %v1881_v22, %v1882_v45  ;;  %v760_v30 = vrot.slane %v570_v12, 5  ;;  %v575_v22 = vld [vmem:[%s5470_s17 + $0x288] sm:$0xf]  ;;  %v1763_v12 = vrot.slane %v579_v62, 6 }
  0x6e   : > { %3071 = vrot.lane.b32.xlu0 %v5142_v53, %s5376_s26  ;;  %v1647_v53 = vsel %vm5485_vm7, %v1645_v32, %v1646_v35  ;;  %v1585_v32 = vrot.slane %v1583_v19, 4  ;;  %v571_v35 = vld [vmem:[%s5470_s17 + $0x278] sm:$0xf]  ;;  %v567_v45 = vld [vmem:[%s5470_s17 + $0x268] sm:$0xf] }
  0x6f   : > { %v1694_v6 = vrot.slane %v1692_v47, 4  ;;  %v4817_v51 = vcombine.low %v1644_v48, %v1647_v53  ;;  %v1693_v44 = vsel %vm5530_vm8, %v4658_v63, %v1692_v47  ;;  %v568_v47 = vld [vmem:[%s5470_s17 + $0x26c] sm:$0xf]  ;;  %v770_v48 = vrot.slane %v578_v57, 5 }
  0x70   : > { %v5945_v46 = vsel %vm5472_vm2, %v1585_v32, %v1586_v20  ;;  %v762_v53 = vrot.slane %v760_v30, 4  ;;  %v4831_v63 = vcombine.low %v574_v40, %v575_v22  ;;  %v4830_v23 = vcombine.low %v567_v45, %v568_v47  ;;  %v680_v45 = vld [vmem:[%s5470_s17 + $0x474] sm:$0xf]  ;;  %v685_v47 = vld [vmem:[%s5470_s17 + $0x488] sm:$0xf] }
  0x71   : > { %2851 = vrot.lane.b32.xlu1 %v5143_v16, %s5368_s18  ;;  %v4859_v16 = vcombine.low %v1880_v34, %v1883_v3  ;;  %v1696_v24 = vsel %vm5530_vm8, %v1694_v6, %v1695_v7  ;;  %v4803_v52 = vcombine.low %v5936_v31, %v5945_v46  ;;  %v763_v34 = vrot.slane %v571_v35, 5  ;;  %v486_v31 = vld [vmem:[%s5470_s17 + $0xdc] sm:$0x3] }
  0x72   : > { %2801 = vrot.lane.b32.xlu0 %v4801_v8, %s5369_s19  ;;  %v577_v8 = vld [vmem:[%s5470_s17 + $0x290] sm:$0xf]  ;;  %v761_v3 = vsel %vm5485_vm7, %v4552_v49, %v760_v30  ;;  %v4666_v5 = vrot.slane %v571_v35, 10  ;;  %v1759_v6 = vrot.slane %v573_v55, 6  ;;  %v677_v35 = vld [vmem:[%s5470_s17 + $0x468] sm:$0xf] }
  0x73   : > { %v767_v11 = vrot.slane %v577_v8, 5  ;;  %v1758_v8 = vrot.slane %v1756_v61, 4  ;;  %v4672_v22 = vrot.slane %v677_v35, 9  ;;  %v1823_v55 = vrot.slane %v685_v47, 5  ;;  %v6068_v47 = vld [vmem:[%s5470_s17 + $0xd4] sm:$0xf] }
  0x74   : > { %v1757_v19 = vsel %vm5530_vm8, %v4666_v5, %v1756_v61  ;;  %v6005_v61 = vld [vmem:[%s5470_s17 + $0x48c] sm:$0xf]  ;;  %v5148_v5 = vld [vmem:[%s5470_s17 + $0x47c] sm:$0xff]  }
  0x75   : > { %3143 = vrot.lane.b32.xlu1 %v4858_v37, %s8426_s13  ;;  %v4823_v37 = vcombine.low %v1700_v17, %v1703_v21  ;;  %v769_v41 = vrot.slane %v767_v11, 4  ;;  %v1760_v20 = vsel %vm5530_vm8, %v1758_v8, %v1759_v6  ;;  %v4667_v21 = vrot.slane %v578_v57, 10 }
  0x76   : > { %3105 = vrot.lane.b32.xlu0 %v4851_v39, %s5377_s12  ;;  %v4822_v39 = vcombine.low %v1693_v44, %v1696_v24  ;;  %v1765_v44 = vrot.slane %v1763_v12, 4  ;;  %v1766_v24 = vrot.slane %v580_v15, 6  ;;  %v4838_v30 = vcombine.low %v1757_v19, %v1760_v20  ;;  %v6021_v19 = vld [vmem:[%s5470_s17 + $0xb0] sm:$0xf] }
  0x77   : > { %v771_v7 = vsel %vm5485_vm7, %v769_v41, %v770_v48  ;;  %v1764_v32 = vsel %vm5530_vm8, %v4667_v21, %v1763_v12  ;;  %v1825_v12 = vrot.slane %v1823_v55, 4  ;;  %v1826_v15 = vrot.slane %v6005_v61, 5  ;;  %v6030_v21 = vld [vmem:[%s5470_s17 + $0xa8] sm:$0xf] }
  0x78   : > { %v1767_v57 = vsel %vm5530_vm8, %v1765_v44, %v1766_v24  ;;  %v6034_v24 = vld [vmem:[%s5470_s17 + $0xd0] sm:$0xf] }
  0x79   : > { %2885 = vrot.lane.b32.xlu1 %v4816_v27, %s8413_s21  ;;  %v4553_v27 = vrot.slane %v576_v25, 9  ;;  %v678_v25 = vld [vmem:[%s5470_s17 + $0x46c] sm:$0xf]  ;;  %v4839_v40 = vcombine.low %v1764_v32, %v1767_v57  ;;  %v6043_v32 = vld [vmem:[%s5470_s17 + $0x490] sm:$0xf] }
  0x7a   : > { %2853 = vrot.lane.b32.xlu0 %v5144_v26, %s5368_s18  ;;  %v1816_v36 = vrot.slane %v678_v25, 5  ;;  %v6037_v25 = vld [vmem:[%s5470_s17 + $0xac] sm:$0xf] }
  0x7b   : > { %v768_v26 = vsel %vm5485_vm7, %v4553_v27, %v767_v11 }
  0x7c   : > { %v1818_v27 = vrot.slane %v1816_v36, 4  ;;  %v1817_v62 = vsel %vm5485_vm7, %v4672_v22, %v1816_v36  ;;  %v1827_v36 = vsel %vm5485_vm7, %v1825_v12, %v1826_v15  ;;  %v6094_v15 = vld [vmem:[%s5470_s17 + $0xc4] sm:$0xf] }
  0x7d   : > { %2887 = vrot.lane.b32.xlu1 %v4817_v51, %s8413_s21  ;;  %v764_v51 = vsel %vm5485_vm7, %v762_v53, %v763_v34  ;;  %v681_v53 = vld [vmem:[%s5470_s17 + $0x478] sm:$0x3]  ;;  %v1886_v34 = vrot.slane %v680_v45, 6 }
  0x7e   : > { %3145 = vrot.lane.b32.xlu0 %v4859_v16, %s8426_s13  ;;  %v5967_v16 = vcombine.low %v768_v26, %v771_v7  ;;  %v5969_v17 = vcombine.low %v761_v3, %v764_v51  ;;  %v1889_v7 = vrot.slane %v681_v53, 6  ;;  %v1172_v53 = vrot.slane %v6068_v47, 5 }
  0x7f   : > { %v1888_v51 = vrot.slane %v1886_v34, 4 }
  0x80   : > { %8457 = vst [vmem:[#allocation8_spill] sm:$0xff] %v5967_v16  ;;  %8458 = vst [vmem:[#allocation9_spill] sm:$0xff] %v5969_v17 }
  0x81   : > { %2927 = vrot.lane.b32.xlu1 %v4823_v37, %s8418_s22  ;;  %v679_v37 = vld [vmem:[%s5470_s17 + $0x470] sm:$0xf]  ;;  %v1890_v57 = vsel %vm5530_vm8, %v1888_v51, %v1889_v7  ;;  %v6086_v51 = vld [vmem:[%s5470_s17 + $0xd8] sm:$0xf] }
  0x82   : > { %2925 = vrot.lane.b32.xlu0 %v4822_v39, %s8418_s22  ;;  %v5147_v39 = vld [vmem:[%s5470_s17 + $0x460] sm:$0xff]   ;;  %v1819_v48 = vrot.slane %v679_v37, 5  ;;  %v4680_v6 = vrot.slane %v679_v37, 10  ;;  %v6059_v37 = vld [vmem:[%s5470_s17 + $0xcc] sm:$0xf]  ;;  %v1713_v46 = vrot.slane %v6086_v51, 6 }
  0x85   : > { %2967 = vrot.lane.b32.xlu1 %v4831_v63, %s8423_s23  ;;  %v1820_v63 = vsel %vm5485_vm7, %v1818_v27, %v1819_v48  ;;  %v1893_v27 = vrot.slane %v6043_v32, 6  ;;  %v6072_v48 = vld [vmem:[%s5470_s17 + $0x218] sm:$0xf] }
  0x86   : > { %2965 = vrot.lane.b32.xlu0 %v4830_v23, %s8423_s23  ;;  %v6012_v23 = vld [vmem:[%s5470_s17 + $0xb4] sm:$0xf]  ;;  %v4852_v20 = vcombine.low %v1817_v62, %v1820_v63 }
  0x87   : > { %v1162_v44 = vrot.slane %v6012_v23, 5 }
  0x88   : > { %v5980_v11 = vpop.permute.xlu1 %2845 }
  0x89   : > { %2983 = vrot.lane.b32.xlu1 %v5967_v16, %s5374_s24  ;;  %8459 = vst [vmem:[#allocation10_spill] sm:$0xff] %v5980_v11  ;;  %v5982_v29 = vpop.permute.xlu0 %2843  ;;  %v1164_v22 = vrot.slane %v1162_v44, 4  ;;  %v594_v11 = vld [vmem:[%s5470_s17 + $0x2d4] sm:$0x3] }
  0x8a   : > { %2981 = vrot.lane.b32.xlu0 %v5969_v17, %s5374_s24  ;;  %8460 = vst [vmem:[#allocation11_spill] sm:$0xff] %v5982_v29  ;;  %v1715_v17 = vrot.slane %v1713_v46, 4  ;;  %v587_v29 = vld [vmem:[%s5470_s17 + $0x2b8] sm:$0x3]  ;;  %v1780_v59 = vrot.slane %v594_v11, 6 }
  0x8d   : > { %2763 = vrot.lane.b32.xlu1 %v5694_v4, %s5370_s20  ;;  %v684_v4 = vld [vmem:[%s5470_s17 + $0x484] sm:$0xf] }
  0x8e   : > { %3021 = vrot.lane.b32.xlu0 %v4838_v30, %s5375_s25  ;;  %v4673_v8 = vrot.slane %v684_v4, 9  ;;  %v6040_v30 = vld [vmem:[%s5470_s17 + $0xb8] sm:$0xf] }
  0x8f   : > { %v5996_v49 = vpop.permute.xlu1 %2791  ;;  %v1165_v45 = vrot.slane %v6040_v30, 5 }
  0x90   : > { %8461 = vst [vmem:[#allocation12_spill] sm:$0xff] %v5996_v49  ;;  %v5998_v41 = vpop.permute.xlu0 %2751  ;;  %v1824_v35 = vsel %vm5485_vm7, %v4673_v8, %v1823_v55  ;;  %v6077_v55 = vld [vmem:[%s5470_s17 + $0x214] sm:$0xf]  ;;  %v6089_v8 = vld [vmem:[%s5470_s17 + $0xbc] sm:$0xf] }
  0x91   : > { %8462 = vst [vmem:[#allocation13_spill] sm:$0xff] %v5998_v41  ;;  %3073 = vrot.lane.b32.xlu1 %v5147_v39, %s5376_s26  ;;  %v1169_v39 = vrot.slane %v6034_v24, 5  ;;  %v4853_v7 = vcombine.low %v1824_v35, %v1827_v36  ;;  %v6110_v36 = vld [vmem:[%s5470_s17 + $0x1f8] sm:$0xf] }
  0x92   : > { %3023 = vrot.lane.b32.xlu0 %v4839_v40, %s5375_s25  ;;  %v4810_v40 = vcombine.low %v6030_v21, %v6037_v25 }
  0x93   : > { %v6014_v26 = vpop.permute.xlu1 %2793  ;;  %v1171_v32 = vrot.slane %v1169_v39, 4 }
  0x94   : > { %8463 = vst [vmem:[#allocation14_spill] sm:$0xff] %v6014_v26  ;;  %v6016_v3 = vpop.permute.xlu0 %2753 }
  0x95   : > { %8464 = vst [vmem:[#allocation15_spill] sm:$0xff] %v6016_v3  ;;  %2803 = vrot.lane.b32.xlu1 %v4802_v13, %s5369_s19  ;;  %v4596_v13 = vrot.slane %v6021_v19, 9  ;;  %v6221_v3 = vld [vmem:[%s5470_s17 + $0x4c0] sm:$0xf] }
  0x96   : > { %2765 = vrot.lane.b32.xlu0 %v5732_v50, %s5370_s20  ;;  %v1887_v50 = vsel %vm5530_vm8, %v4680_v6, %v1886_v34  ;;  %v688_v34 = vld [vmem:[%s5470_s17 + $0x494] sm:$0x3] }
  0x97   : > { %v6045_v1 = vpop.permute.xlu1 %2879  ;;  %v4860_v6 = vcombine.low %v1887_v50, %v1890_v57  ;;  %v1163_v12 = vsel %vm5485_vm7, %v4596_v13, %v1162_v44  ;;  %v1166_v50 = vsel %vm5485_vm7, %v1164_v22, %v1165_v45  ;;  %v6106_v57 = vld [vmem:[%s5470_s17 + $0xc8] sm:$0xf]  ;;  %v4681_v44 = vrot.slane %v6005_v61, 10 }
  0x98   : > { %8465 = vst [vmem:[#allocation16_spill] sm:$0xff] %v6045_v1  ;;  %v6047_v38 = vpop.permute.xlu0 %2877  ;;  %v1895_v13 = vrot.slane %v1893_v27, 4  ;;  %v1896_v35 = vrot.slane %v688_v34, 6  ;;  %v6129_v62 = vcombine.low %v1163_v12, %v1166_v50  ;;  %v4811_v16 = vcombine.low %v6094_v15, %v6106_v57 }
  0x99   : > { %8466 = vst [vmem:[#allocation17_spill] sm:$0xff] %v6047_v38  ;;  %3107 = vrot.lane.b32.xlu1 %v4852_v20, %s5377_s12  ;;  %v4597_v20 = vrot.slane %v6059_v37, 9  ;;  %v1173_v61 = vsel %vm5485_vm7, %v1171_v32, %v1172_v53  ;;  %v1894_v34 = vsel %vm5530_vm8, %v4681_v44, %v1893_v27  ;;  %v4661_v50 = vrot.slane %v6068_v47, 10  ;;  %v6146_v53 = vld [vmem:[%s5470_s17 + $0x2c8] sm:$0xf] }
  0x9a   : > { %3075 = vrot.lane.b32.xlu0 %v5148_v5, %s5376_s26  ;;  %8471 = vst [vmem:[#allocation22_spill] sm:$0xff] %v6129_v62  ;;  %v1897_v12 = vsel %vm5530_vm8, %v1895_v13, %v1896_v35  ;;  %v1716_v45 = vrot.slane %v486_v31, 6  ;;  %8472 = vst [vmem:[#allocation23_spill] sm:$0xff] %v6146_v53  ;;  %v8474_v44 = vrot.slane %v5663_v43, 7  ;;  %v8478_v27 = vrot.slane %v6037_v25, 7 }
  0x9b   : > { %v6081_v63 = vpop.permute.xlu1 %2919  ;;  %v1170_v22 = vsel %vm5485_vm7, %v4597_v20, %v1169_v39  ;;  %v4660_v39 = vrot.slane %v6040_v30, 10  ;;  %v781_v32 = vrot.slane %v6146_v53, 5 }
  0x9c   : > { %8467 = vst [vmem:[#allocation18_spill] sm:$0xff] %v6081_v63  ;;  %v6083_v5 = vpop.permute.xlu0 %2917  ;;  %v6156_v13 = vrot.slane %v8474_v44, 4  ;;  %v6169_v1 = vrot.slane %v8478_v27, 4  ;;  %v6175_v44 = vcombine.low %v1170_v22, %v1173_v61  ;;  %v1714_v63 = vsel %vm5530_vm8, %v4661_v50, %v1713_v46  ;;  %v6180_v27 = vld [vmem:[%s5470_s17 + $0x2c4] sm:$0xf] }
  0x9d   : > { %8468 = vst [vmem:[#allocation19_spill] sm:$0xff] %v6083_v5  ;;  %2855 = vrot.lane.b32.xlu1 %v4810_v40, %s5368_s18  ;;  %v6114_v40 = vld [vmem:[%s5470_s17 + $0x1fc] sm:$0xf]  ;;  %v783_v38 = vrot.slane %v781_v32, 4 }
  0x9e   : > { %2805 = vrot.lane.b32.xlu0 %v4803_v52, %s5369_s19  ;;  %v1706_v52 = vrot.slane %v6089_v8, 6  ;;  %8479 = vst [vmem:[#allocation27_spill] sm:$0xff] %v6175_v44 }
  0x9f   : > { %v6124_v54 = vpop.permute.xlu1 %2959 }
  0xa0   : > { %8469 = vst [vmem:[#allocation20_spill] sm:$0xff] %v6124_v54  ;;  %v6126_v4 = vpop.permute.xlu0 %2957  ;;  %v1708_v20 = vrot.slane %v1706_v52, 4  ;;  %v1709_v54 = vrot.slane %v479_v33, 6  ;;  %v6163_v33 = vld [vmem:[%s5470_s17 + $0x2ac] sm:$0xf]  ;;  %v1707_v22 = vsel %vm5530_vm8, %v4660_v39, %v1706_v52 }
  0xa1   : > { %8470 = vst [vmem:[#allocation21_spill] sm:$0xff] %v6126_v4  ;;  %3147 = vrot.lane.b32.xlu1 %v4860_v6, %s8426_s13  ;;  %v8473_v6 = vrot.slane %v5621_v14, 7  ;;  %8477 = vst [vmem:[#allocation26_spill] sm:$0xff] %v6163_v33  ;;  %v774_v46 = vrot.slane %v6163_v33, 5  ;;  %v6200_v4 = vld [vmem:[%s5470_s17 + $0x2c0] sm:$0xf] }
  0xa2   : > { %3109 = vrot.lane.b32.xlu0 %v4853_v7, %s5377_s12  ;;  %v1710_v61 = vsel %vm5530_vm8, %v1708_v20, %v1709_v54  ;;  %v6207_v52 = vld [vmem:[%s5470_s17 + $0x2b0] sm:$0xf]  ;;  %v586_v39 = vld [vmem:[%s5470_s17 + $0x2b4] sm:$0xf]  ;;  %v6211_v54 = vld [vmem:[%s5470_s17 + $0x2a4] sm:$0xf] }
  0xa3   : > { %v6150_v7 = vrot.slane %v8473_v6, 4  ;;  %v6158_v35 = vpop.permute.xlu1 %2975  ;;  %v4861_v6 = vcombine.low %v1894_v34, %v1897_v12  ;;  %v6191_v34 = vld [vmem:[%s5470_s17 + $0x2cc] sm:$0xf]  ;;  %8483 = vst [vmem:[#allocation31_spill] sm:$0xff] %v6207_v52  ;;  %8484 = vst [vmem:[#allocation32_spill] sm:$0xff] %v6211_v54  ;;  %v4555_v20 = vrot.slane %v6180_v27, 9 }
  0xa4   : > { %8475 = vst [vmem:[#allocation24_spill] sm:$0xff] %v6158_v35  ;;  %v6160_v31 = vpop.permute.xlu0 %2973  ;;  %v593_v35 = vld [vmem:[%s5470_s17 + $0x2d0] sm:$0xf]  ;;  %8480 = vst [vmem:[#allocation28_spill] sm:$0xff] %v6191_v34  ;;  %v784_v26 = vrot.slane %v6191_v34, 5  ;;  %v777_v2 = vrot.slane %v6207_v52, 5 }
  0xa5   : > { %8476 = vst [vmem:[#allocation25_spill] sm:$0xff] %v6160_v31  ;;  %2889 = vrot.lane.b32.xlu1 %v6129_v62, %s8413_s21  ;;  %v588_v31 = vld [vmem:[%s5470_s17 + $0x2bc] sm:$0xf]  ;;  %v1777_v5 = vrot.slane %v593_v35, 6  ;;  %v776_v35 = vrot.slane %v774_v46, 4  ;;  %v1770_v41 = vrot.slane %v586_v39, 6 }
  0xa6   : > { %2857 = vrot.lane.b32.xlu0 %v4811_v16, %s5368_s18  ;;  %v1717_v16 = vsel %vm5530_vm8, %v1715_v17, %v1716_v45  ;;  %v581_v17 = vld [vmem:[%s5470_s17 + $0x2a0] sm:$0xf]  ;;  %v6204_v45 = vld [vmem:[%s5470_s17 + $0x2a8] sm:$0xf]  ;;  %v698_v39 = vld [vmem:[%s5470_s17 + $0x4bc] sm:$0xf] }
  0xa7   : > { %v6194_v12 = vpop.permute.xlu1 %2755  ;;  %v4554_v49 = vrot.slane %v6204_v45, 9  ;;  %v4832_v62 = vcombine.low %v581_v17, %v6211_v54  ;;  %v1779_v60 = vrot.slane %v1777_v5, 4  ;;  %v1837_v17 = vrot.slane %v6221_v3, 5 }
  0xa8   : > { %8481 = vst [vmem:[#allocation29_spill] sm:$0xff] %v6194_v12  ;;  %v6196_v50 = vpop.permute.xlu0 %3013  ;;  %v4825_v12 = vcombine.low %v1714_v63, %v1717_v16  ;;  %v4669_v16 = vrot.slane %v6191_v34, 10  ;;  %v778_v34 = vsel %vm5485_vm7, %v776_v35, %v777_v2  ;;  %v1772_v33 = vrot.slane %v1770_v41, 4 }
  0xa9   : > { %8482 = vst [vmem:[#allocation30_spill] sm:$0xff] %v6196_v50  ;;  %2891 = vrot.lane.b32.xlu1 %v6175_v44, %s8413_s21  ;;  %v4824_v50 = vcombine.low %v1707_v22, %v1710_v61  ;;  %v6232_v22 = vld [vmem:[%s5470_s17 + $0x4a4] sm:$0xf]  ;;  %v6235_v61 = vld [vmem:[%s5470_s17 + $0x4c8] sm:$0xf]  ;;  %v4833_v44 = vcombine.low %v588_v31, %v6200_v4  ;;  %v4668_v31 = vrot.slane %v6207_v52, 10  ;;  %v775_v11 = vsel %vm5485_vm7, %v4554_v49, %v774_v46 }
  0xaa   : > { %3149 = vrot.lane.b32.xlu0 %v4861_v6, %s8426_s13  ;;  %v1907_v3 = vrot.slane %v6235_v61, 6  ;;  %v1778_v2 = vsel %vm5530_vm8, %v4669_v16, %v1777_v5  ;;  %v6273_v49 = vcombine.low %v775_v11, %v778_v34  ;;  %v4675_v46 = vrot.slane %v698_v39, 9  ;;  %v6290_v11 = vld [vmem:[%s5470_s17 + $0x174] sm:$0xf] }
  0xab   : > { %v6226_v6 = vpop.permute.xlu1 %3065  ;;  %v1839_v35 = vrot.slane %v1837_v17, 4  ;;  %v1104_v52 = vrot.slane %v6059_v37, 7 }
  0xac   : > { %8485 = vst [vmem:[#allocation33_spill] sm:$0xff] %v6226_v6  ;;  %v6228_v63 = vpop.permute.xlu0 %3015  ;;  %v785_v6 = vsel %vm5485_vm7, %v783_v38, %v784_v26  ;;  %v1830_v26 = vrot.slane %v6232_v22, 5  ;;  %8490 = vst [vmem:[#allocation38_spill] sm:$0xff] %v6273_v49  ;;  %v1840_v22 = vrot.slane %v6241_v28, 5 }
  0xad   : > { %8486 = vst [vmem:[#allocation34_spill] sm:$0xff] %v6228_v63  ;;  %2931 = vrot.lane.b32.xlu1 %v4825_v12, %s8418_s22  ;;  %v782_v63 = vsel %vm5485_vm7, %v4555_v20, %v781_v32  ;;  %v1773_v12 = vrot.slane %v587_v29, 6  ;;  %v6261_v20 = vld [vmem:[%s5470_s17 + $0x4a8] sm:$0xf]  ;;  %v1781_v29 = vsel %vm5530_vm8, %v1779_v60, %v1780_v59  ;;  %v1771_v59 = vsel %vm5530_vm8, %v4668_v31, %v1770_v41 }
  0xae   : > { %2929 = vrot.lane.b32.xlu0 %v4824_v50, %s8418_s22  ;;  %v691_v50 = vld [vmem:[%s5470_s17 + $0x4a0] sm:$0xf]  ;;  %v6265_v38 = vcombine.low %v782_v63, %v785_v6  ;;  %v702_v6 = vld [vmem:[%s5470_s17 + $0x4cc] sm:$0x3]  ;;  %v4841_v16 = vcombine.low %v1778_v2, %v1781_v29  ;;  %v1833_v39 = vrot.slane %v6261_v20, 5  ;;  %v1832_v5 = vrot.slane %v1830_v26, 4 }
  0xaf   : > { %v6256_v53 = vpop.permute.xlu1 %2795  ;;  %v1774_v60 = vsel %vm5530_vm8, %v1772_v33, %v1773_v12  ;;  %v4674_v61 = vrot.slane %v691_v50, 9  ;;  %v6293_v63 = vld [vmem:[%s5470_s17 + $0x158] sm:$0xf]  ;;  %v4683_v41 = vrot.slane %v6241_v28, 10  ;;  %v1909_v31 = vrot.slane %v1907_v3, 4 }
  0xb0   : > { %8487 = vst [vmem:[#allocation35_spill] sm:$0xff] %v6256_v53  ;;  %v6258_v32 = vpop.permute.xlu0 %2757  ;;  %8489 = vst [vmem:[#allocation37_spill] sm:$0xff] %v6265_v38  ;;  %v1910_v33 = vrot.slane %v702_v6, 6  ;;  %v695_v12 = vld [vmem:[%s5470_s17 + $0x4b0] sm:$0x3]  ;;  %v4840_v50 = vcombine.low %v1771_v59, %v1774_v60  ;;  %v1838_v2 = vsel %vm5485_vm7, %v4675_v46, %v1837_v17  ;;  %v1841_v28 = vsel %vm5485_vm7, %v1839_v35, %v1840_v22  ;;  %v5153_v60 = vld [vmem:[%s5470_s17 + $0x4b4] sm:$0xff]  }
  0xb1   : > { %8488 = vst [vmem:[#allocation36_spill] sm:$0xff] %v6258_v32  ;;  %2971 = vrot.lane.b32.xlu1 %v4833_v44, %s8423_s23  ;;  %v518_v32 = vld [vmem:[%s5470_s17 + $0x170] sm:$0xf]  ;;  %v6307_v6 = vld [vmem:[%s5470_s17 + $0x178] sm:$0xf]  ;;  %v8493_v53 = vrot.slane %v6106_v57, 7  ;;  %v1831_v46 = vsel %vm5485_vm7, %v4674_v61, %v1830_v26  ;;  %v6330_v37 = vsel %vm5530_vm8, %v4683_v41, %v1907_v3 }
  0xb2   : > { %2969 = vrot.lane.b32.xlu0 %v4832_v62, %s8423_s23  ;;  %v694_v62 = vld [vmem:[%s5470_s17 + $0x4ac] sm:$0xf]  ;;  %v5154_v17 = vld [vmem:[%s5470_s17 + $0x498] sm:$0xff]   ;;  %v811_v22 = vrot.slane %v6293_v63, 6  ;;  %v4682_v26 = vrot.slane %v6261_v20, 10  ;;  %v8496_v3 = vrot.slane %v6037_v25, 7 }
  0xb3   : > { %v6284_v44 = vpop.permute.xlu1 %3099  ;;  %v1900_v29 = vrot.slane %v694_v62, 6  ;;  %v6323_v35 = vld [vmem:[%s5470_s17 + $0x15c] sm:$0xf]  ;;  %v4855_v62 = vcombine.low %v1838_v2, %v1841_v28  ;;  %v1903_v2 = vrot.slane %v695_v12, 6  ;;  %v4557_v28 = vrot.slane %v518_v32, 10 }
  0xb4   : > { %8491 = vst [vmem:[#allocation39_spill] sm:$0xff] %v6284_v44  ;;  %v6286_v34 = vpop.permute.xlu0 %3067  ;;  %v818_v44 = vrot.slane %v6290_v11, 6  ;;  %v6362_v12 = vld [vmem:[%s5470_s17 + $0x17c] sm:$0xf] }
  0xb5   : > { %8492 = vst [vmem:[#allocation40_spill] sm:$0xff] %v6286_v34  ;;  %2987 = vrot.lane.b32.xlu1 %v6265_v38, %s5374_s24  ;;  %v1103_v34 = vrot.slane %v8493_v53, 4  ;;  %v512_v38 = vld [vmem:[%s5470_s17 + $0x154] sm:$0xf]  ;;  %v1834_v53 = vsel %vm5485_vm7, %v1832_v5, %v1833_v39  ;;  %v1902_v61 = vrot.slane %v1900_v29, 4  ;;  %v821_v5 = vrot.slane %v6307_v6, 6 }
  0xb6   : > { %2985 = vrot.lane.b32.xlu0 %v6273_v49, %s5374_s24  ;;  %v8497_v39 = vrot.slane %v6030_v21, 11  ;;  %v4556_v25 = vrot.slane %v512_v38, 10  ;;  %v1901_v38 = vsel %vm5530_vm8, %v4682_v26, %v1900_v29 }
  0xb7   : > { %v6314_v54 = vpop.permute.xlu1 %2847  ;;  %v6394_v26 = vsel %vm5472_vm2, %v1103_v34, %v1104_v52 }
  0xb8   : > { %8494 = vst [vmem:[#allocation41_spill] sm:$0xff] %v6314_v54  ;;  %v6316_v59 = vpop.permute.xlu0 %2797  ;;  %v820_v54 = vrot.slane %v818_v44, 4  ;;  %v6346_v41 = vsel %vm5472_vm2, %v8497_v39, %v8496_v3  ;;  %v814_v3 = vrot.slane %v6323_v35, 6  ;;  %v873_v39 = vrot.slane %v6323_v35, 5 }
  0xb9   : > { %8495 = vst [vmem:[#allocation42_spill] sm:$0xff] %v6316_v59  ;;  %v6334_v59 = vsel %vm5530_vm8, %v1909_v31, %v1910_v33  ;;  %3027 = vrot.lane.b32.xlu1 %v4841_v16, %s5375_s25  ;;  %v8498_v16 = vrot.slane %v6021_v19, 7  ;;  %v4854_v33 = vcombine.low %v1831_v46, %v1834_v53  ;;  %v819_v46 = vsel %vm5530_vm8, %v4557_v28, %v818_v44  ;;  %v6379_v53 = vld [vmem:[%s5470_s17 + $0x160] sm:$0xf] }
  0xba   : > { %3025 = vrot.lane.b32.xlu0 %v4840_v50, %s5375_s25  ;;  %v4863_v21 = vcombine.low %v6330_v37, %v6334_v59  ;;  %v813_v50 = vrot.slane %v811_v22, 4  ;;  %v1904_v59 = vsel %vm5530_vm8, %v1902_v61, %v1903_v2  ;;  %v822_v37 = vsel %vm5530_vm8, %v820_v54, %v821_v5 }
  0xbb   : > { %v6353_v20 = vsel %vm5472_vm2, %v6169_v1, %v8498_v16  ;;  %v6355_v31 = vpop.permute.xlu1 %3139  ;;  %v880_v1 = vrot.slane %v6307_v6, 5  ;;  %v1215_v16 = vrot.slane %v6089_v8, 7  ;;  %v4565_v8 = vrot.slane %v6290_v11, 9 }
  0xbc   : > { %v6357_v32 = vpop.permute.xlu0 %3101  ;;  %v812_v54 = vsel %vm5530_vm8, %v4556_v25, %v811_v22  ;;  %v883_v11 = vrot.slane %v6362_v12, 5  ;;  %v815_v2 = vsel %vm5530_vm8, %v813_v50, %v814_v3  ;;  %v875_v52 = vrot.slane %v873_v39, 4 }
  0xbd   : > { %3079 = vrot.lane.b32.xlu1 %v5153_v60, %s5376_s26  ;;  %v8499_v60 = vrot.slane %v6106_v57, 7  ;;  %v4564_v57 = vrot.slane %v6293_v63, 9  ;;  %v882_v28 = vrot.slane %v880_v1, 4  ;;  %v876_v34 = vrot.slane %v6379_v53, 5 }
  0xbe   : > { %3077 = vrot.lane.b32.xlu0 %v5154_v17, %s5376_s26  ;;  %v8500_v17 = vrot.slane %v6094_v15, 11  ;;  %v4862_v5 = vcombine.low %v1901_v38, %v1904_v59  ;;  %v8501_v22 = vrot.slane %v5621_v14, 7  ;;  %v8502_v25 = vrot.slane %v5610_v9, 11 }
  0xbf   : > { %v6396_v44 = vpop.permute.xlu1 %2881  ;;  %v4603_v14 = vrot.slane %v6034_v24, 11  ;;  %v4693_v9 = vcombine.low %v819_v46, %v822_v37  ;;  %v884_v46 = vsel %vm5485_vm7, %v882_v28, %v883_v11  ;;  %v874_v37 = vsel %vm5485_vm7, %v4564_v57, %v873_v39  ;;  %v5263_v57 = vld [vmem:[%s5470_s17 + $0x200] sm:$0xf] }
  0xc0   : > { %v6390_v29 = vsel %vm5472_vm2, %v8500_v17, %v8499_v60  ;;  %v6398_v61 = vpop.permute.xlu0 %2849  ;;  %v6417_v63 = vsel %vm5472_vm2, %v8502_v25, %v8501_v22  ;;  %v8504_v60 = vrot.slane %v5627_v18, 7  ;;  %v4692_v17 = vcombine.low %v812_v54, %v815_v2  ;;  %v5262_v54 = vld [vmem:[%s5470_s17 + $0x21c] sm:$0xf] }
  0xc1   : > { %3113 = vrot.lane.b32.xlu1 %v4855_v62, %s5377_s12  ;;  %8503 = vst [vmem:[#allocation43_spill] sm:$0xff] %v6417_v63  ;;  %v1212_v62 = vrot.slane %v6040_v30, 7  ;;  %v8507_v30 = vrot.slane %v6012_v23, 11  ;;  %v877_v25 = vsel %vm5485_vm7, %v875_v52, %v876_v34  ;;  %v860_v2 = vrot.slane %v5262_v54, 6 }
  0xc2   : > { %3111 = vrot.lane.b32.xlu0 %v4854_v33, %s5377_s12  ;;  %v6424_v50 = vsel %vm5472_vm2, %v6150_v7, %v8504_v60  ;;  %v8506_v33 = vrot.slane %v6114_v40, 7  ;;  %v881_v7 = vsel %vm5485_vm7, %v4565_v8, %v880_v1  ;;  %v8508_v1 = vrot.slane %v5663_v43, 7 }
  0xc3   : > { %8505 = vst [vmem:[#allocation44_spill] sm:$0xff] %v6424_v50  ;;  %v6432_v59 = vpop.permute.xlu1 %2883  ;;  %v6442_v22 = vsel %vm5472_vm2, %v8507_v30, %v1212_v62  ;;  %v1214_v24 = vrot.slane %v1212_v62, 4  ;;  %v8509_v8 = vrot.slane %v5660_v42, 11  ;;  %v8511_v11 = vrot.slane %v5679_v56, 7 }
  0xc4   : > { %v1278_v3 = vrot.slane %v8506_v33, 4  ;;  %v6434_v18 = vpop.permute.xlu0 %3141  ;;  %v1279_v28 = vrot.slane %v5263_v57, 7  ;;  %v853_v52 = vrot.slane %v5263_v57, 6  ;;  %v8513_v43 = vmov %v8506_v33 }
  0xc5   : > { %3153 = vrot.lane.b32.xlu1 %v4863_v21, %s8426_s13  ;;  %v6455_v23 = vsel %vm5472_vm2, %v1214_v24, %v1215_v16  ;;  %v6463_v39 = vsel %vm5472_vm2, %v8509_v8, %v8508_v1  ;;  %v6470_v21 = vsel %vm5472_vm2, %v6156_v13, %v8511_v11  ;;  %v8514_v34 = vrot.slane %v6110_v36, 11  ;;  %v6608_v8 = vld [vmem:[%s5470_s17 + $0x208] sm:$0xf] }
  0xc6   : > { %3151 = vrot.lane.b32.xlu0 %v4862_v5, %s8426_s13  ;;  %8510 = vst [vmem:[#allocation45_spill] sm:$0xff] %v6463_v39  ;;  %8512 = vst [vmem:[#allocation46_spill] sm:$0xff] %v6470_v21  ;;  %v8515_v13 = vrot.slane %v6072_v48, 7  ;;  %v1222_v60 = vrot.slane %v6086_v51, 7  ;;  %v6494_v30 = vsel %vm5472_vm2, %v1278_v3, %v1279_v28  ;;  %v1219_v36 = vrot.slane %v6068_v47, 7 }
  0xc7   : > { %v6483_v56 = vsel %vm5472_vm2, %v8514_v34, %v8513_v43  ;;  %v6488_v62 = vpop.permute.xlu1 %2923  ;;  %v4562_v24 = vrot.slane %v6114_v40, 10  ;;  %v6498_v1 = vcombine.low %v881_v7, %v884_v46  ;;  %v8519_v11 = vrot.slane %v6077_v55, 11  ;;  %v6519_v28 = vld [vmem:[%s5470_s17 + $0x220] sm:$0xf]  ;;  %v6523_v34 = vld [vmem:[%s5470_s17 + $0x204] sm:$0xf] }
  0xc8   : > { %v1285_v5 = vrot.slane %v8515_v13, 4  ;;  %8516 = vst [vmem:[#allocation47_spill] sm:$0xff] %v6488_v62  ;;  %v6490_v33 = vpop.permute.xlu0 %2921  ;;  %v8518_v51 = vmov %v8515_v13  ;;  %v6512_v47 = vcombine.low %v874_v37, %v877_v25  ;;  %v6516_v40 = vsel %vm5472_vm2, %v4603_v14, %v1219_v36  ;;  %v8533_v25 = vld [vmem:[#allocation5_spill] sm:$0xff]  ;;  %v8585_v62 = vld [vmem:[#allocation11_spill] sm:$0xff] }
  0xc9   : > { %8517 = vst [vmem:[#allocation48_spill] sm:$0xff] %v6498_v1  ;;  %v6508_v57 = vsel %vm5472_vm2, %v8519_v11, %v8518_v51  ;;  %1962 = vrot.lane.b32.xlu1 %v4693_v9, %s5370_s20  ;;  %v1221_v3 = vrot.slane %v1219_v36, 4  ;;  %v1286_v7 = vrot.slane %v5262_v54, 7  ;;  %v862_v46 = vrot.slane %v860_v2, 4  ;;  %v8532_v54 = vld [vmem:[#allocation4_spill] sm:$0xff] }
  0xca   : > { %1960 = vrot.lane.b32.xlu0 %v4692_v17, %s5370_s20  ;;  %8520 = vst [vmem:[#allocation49_spill] sm:$0xff] %v6512_v47  ;;  %v863_v55 = vrot.slane %v6519_v28, 6  ;;  %v855_v43 = vrot.slane %v853_v52, 4  ;;  %v856_v9 = vrot.slane %v6523_v34, 6  ;;  %v8522_v36 = vrot.slane %v6072_v48, 10 }
  0xcb   : > { %v6526_v13 = vpop.permute.xlu1 %2963  ;;  %v6532_v14 = vsel %vm5472_vm2, %v1221_v3, %v1222_v60  ;;  %v6536_v37 = vsel %vm5472_vm2, %v1285_v5, %v1286_v7  ;;  %v4707_v60 = vcombine.low %v6307_v6, %v6362_v12  ;;  %v4706_v5 = vcombine.low %v6323_v35, %v6379_v53 }
  0xcc   : > { %8521 = vst [vmem:[#allocation50_spill] sm:$0xff] %v6526_v13  ;;  %v6528_v17 = vpop.permute.xlu0 %2961  ;;  %v861_v51 = vsel %vm5530_vm8, %v8522_v36, %v860_v2  ;;  %v864_v11 = vsel %vm5530_vm8, %v862_v46, %v863_v55  ;;  %v854_v3 = vsel %vm5530_vm8, %v4562_v24, %v853_v52  ;;  %v857_v7 = vsel %vm5530_vm8, %v855_v43, %v856_v9  ;;  %v6577_v24 = vld [vmem:[%s5470_s17 + $0x190] sm:$0xf]  ;;  %v523_v9 = vld [vmem:[%s5470_s17 + $0x18c] sm:$0xf]  ;;  %v8529_v36 = vld [vmem:[#allocation26_spill] sm:$0xff] }
  0xcd   : > { %1996 = vrot.lane.b32.xlu1 %v6498_v1, %s5369_s19  ;;  %v6566_v48 = vcombine.low %v861_v51, %v864_v11  ;;  %v6568_v35 = vcombine.low %v854_v3, %v857_v7  ;;  %v956_v12 = vrot.slane %v6180_v27, 6  ;;  %v949_v53 = vrot.slane %v6204_v45, 6  ;;  %v8527_v55 = vld [vmem:[#allocation32_spill] sm:$0xff]  ;;  %v8528_v27 = vld [vmem:[#allocation23_spill] sm:$0xff]  ;;  %v5272_v13 = vld [vmem:[%s5470_s17 + $0x238] sm:$0xf] }
  0xce   : > { %1994 = vrot.lane.b32.xlu0 %v6512_v47, %s5369_s19  ;;  %v4575_v46 = vrot.slane %v6200_v4, 10  ;;  %v4574_v43 = vrot.slane %v8527_v55, 10  ;;  %v959_v45 = vrot.slane %v8528_v27, 6  ;;  %v952_v51 = vrot.slane %v8529_v36, 6  ;;  %v6589_v11 = vld [vmem:[%s5470_s17 + $0x194] sm:$0xf] }
  0xcf   : > { %v6560_v42 = vpop.permute.xlu1 %2979  ;;  %8524 = vst [vmem:[#allocation52_spill] sm:$0xff] %v6566_v48  ;;  %8525 = vst [vmem:[#allocation53_spill] sm:$0xff] %v6568_v35  ;;  %v825_v4 = vrot.slane %v6577_v24, 6  ;;  %v6597_v55 = vld [vmem:[%s5470_s17 + $0x224] sm:$0xf]  ;;  %v6612_v16 = vcombine.low %v6523_v34, %v6608_v8  ;;  %v4558_v19 = vrot.slane %v523_v9, 10 }
  0xd0   : > { %8523 = vst [vmem:[#allocation51_spill] sm:$0xff] %v6560_v42  ;;  %v6562_v6 = vpop.permute.xlu0 %2977  ;;  %v6601_v38 = vcombine.low %v6519_v28, %v6597_v55  ;;  %v957_v15 = vsel %vm5530_vm8, %v4575_v46, %v956_v12  ;;  %v828_v21 = vrot.slane %v6589_v11, 6  ;;  %v950_v50 = vsel %vm5530_vm8, %v4574_v43, %v949_v53  ;;  %v6643_v9 = vld [vmem:[%s5470_s17 + $0x198] sm:$0xf] }
  0xd1   : > { %2036 = vrot.lane.b32.xlu1 %v4707_v60, %s5368_s18  ;;  %v958_v60 = vrot.slane %v956_v12, 4  ;;  %8534 = vst [vmem:[#allocation26_spill] sm:$0xff] %v6612_v16  ;;  %v827_v47 = vrot.slane %v825_v4, 4  ;;  %v6628_v12 = vld [vmem:[%s5470_s17 + $0x1ac] sm:$0xf]  ;;  %v826_v43 = vsel %vm5530_vm8, %v4558_v19, %v825_v4 }
  0xd2   : > { %2034 = vrot.lane.b32.xlu0 %v4706_v5, %s5368_s18  ;;  %v951_v5 = vrot.slane %v949_v53, 4  ;;  %8531 = vst [vmem:[#allocation23_spill] sm:$0xff] %v6601_v38 }
  0xd3   : > { %v6572_v2 = vpop.permute.xlu1 %2759  ;;  %v960_v39 = vsel %vm5530_vm8, %v958_v60, %v959_v45  ;;  %v829_v45 = vsel %vm5530_vm8, %v827_v47, %v828_v21  ;;  %v887_v60 = vrot.slane %v6589_v11, 5 }
  0xd4   : > { %8526 = vst [vmem:[#allocation54_spill] sm:$0xff] %v6572_v2  ;;  %v6574_v52 = vpop.permute.xlu0 %3017  ;;  %v953_v63 = vsel %vm5530_vm8, %v951_v5, %v952_v51  ;;  %v6634_v46 = vcombine.low %v957_v15, %v960_v39  ;;  %v832_v5 = vrot.slane %v6628_v12, 6  ;;  %v527_v15 = vld [vmem:[%s5470_s17 + $0x1a8] sm:$0xf]  ;;  %v4694_v19 = vcombine.low %v826_v43, %v829_v45 }
  0xd5   : > { %2070 = vrot.lane.b32.xlu1 %v6566_v48, %s8413_s21  ;;  %v6636_v53 = vcombine.low %v950_v50, %v953_v63  ;;  %v6653_v63 = vld [vmem:[%s5470_s17 + $0x1b0] sm:$0xf]  ;;  %v4566_v50 = vrot.slane %v6577_v24, 9  ;;  %v890_v39 = vrot.slane %v6643_v9, 5  ;;  %v889_v21 = vrot.slane %v887_v60, 4  ;;  %v8542_v24 = vld [vmem:[#allocation31_spill] sm:$0xff] }
  0xd6   : > { %2068 = vrot.lane.b32.xlu0 %v6568_v35, %s8413_s21  ;;  %8537 = vst [vmem:[#allocation57_spill] sm:$0xff] %v6634_v46  ;;  %v4559_v47 = vrot.slane %v527_v15, 10  ;;  %v834_v4 = vrot.slane %v832_v5, 4  ;;  %v6673_v43 = vcombine.low %v8529_v36, %v8542_v24  ;;  %v6689_v36 = vld [vmem:[%s5470_s17 + $0x1b4] sm:$0xf] }
  0xd7   : > { %v6592_v3 = vpop.permute.xlu1 %3069  ;;  %8538 = vst [vmem:[#allocation58_spill] sm:$0xff] %v6636_v53  ;;  %v888_v45 = vsel %vm5485_vm7, %v4566_v50, %v887_v60  ;;  %v891_v15 = vsel %vm5485_vm7, %v889_v21, %v890_v39  ;;  %v6692_v60 = vld [vmem:[%s5470_s17 + $0x250] sm:$0xf]  ;;  %v897_v24 = vrot.slane %v6689_v36, 5  ;;  %v5271_v35 = vld [vmem:[%s5470_s17 + $0x24c] sm:$0xf] }
  0xd8   : > { %v6594_v7 = vpop.permute.xlu0 %3019  ;;  %8543 = vst [vmem:[#allocation31_spill] sm:$0xff] %v6673_v43  ;;  %v1297_v50 = vrot.slane %v6692_v60, 7 }
  0xd9   : > { %8530 = vst [vmem:[#allocation32_spill] sm:$0xff] %v6594_v7  ;;  %2086 = vrot.lane.b32.xlu1 %v8532_v54, %s8418_s22  ;;  %v4613_v7 = vrot.slane %v5271_v35, 11 }
  0xda   : > { %2084 = vrot.lane.b32.xlu0 %v8533_v25, %s8418_s22 }
  0xdb   : > { %v6623_v1 = vpop.permute.xlu1 %2799 }
  0xdc   : > { %8535 = vst [vmem:[#allocation55_spill] sm:$0xff] %v6623_v1  ;;  %v6625_v2 = vpop.permute.xlu0 %2761  ;;  %v835_v1 = vrot.slane %v6653_v63, 6 }
  0xdd   : > { %8536 = vst [vmem:[#allocation56_spill] sm:$0xff] %v6625_v2  ;;  %2120 = vrot.lane.b32.xlu1 %v6601_v38, %s8423_s23 }
  0xde   : > { %2118 = vrot.lane.b32.xlu0 %v6612_v16, %s8423_s23 }
  0xdf   : > { %v6647_v51 = vpop.permute.xlu1 %3103 }
  0xe0   : > { %v6649_v2 = vpop.permute.xlu0 %3071 }
  0xe1   : > { %8539 = vst [vmem:[#allocation59_spill] sm:$0xff] %v6649_v2  ;;  %2154 = vrot.lane.b32.xlu1 %v6634_v46, %s5374_s24  ;;  %v5268_v46 = vld [vmem:[%s5470_s17 + $0x230] sm:$0xf]  ;;  %v5269_v2 = vld [vmem:[%s5470_s17 + $0x234] sm:$0xf] }
  0xe2   : > { %2152 = vrot.lane.b32.xlu0 %v6636_v53, %s5374_s24  ;;  %v4612_v48 = vrot.slane %v5268_v46, 11  ;;  %v1290_v53 = vrot.slane %v5269_v2, 7  ;;  %v833_v46 = vsel %vm5530_vm8, %v4559_v47, %v832_v5  ;;  %v4702_v5 = vcombine.low %v888_v45, %v891_v15 }
  0xe3   : > { %v6662_v38 = vpop.permute.xlu1 %2851  ;;  %v4567_v47 = vrot.slane %v6628_v12, 9  ;;  %v1299_v45 = vrot.slane %v1297_v50, 4  ;;  %v921_v15 = vrot.slane %v5272_v13, 6 }
  0xe4   : > { %8540 = vst [vmem:[#allocation60_spill] sm:$0xff] %v6662_v38  ;;  %v6664_v16 = vpop.permute.xlu0 %2801  ;;  %v1292_v39 = vrot.slane %v1290_v53, 4 }
  0xe5   : > { %8541 = vst [vmem:[#allocation61_spill] sm:$0xff] %v6664_v16  ;;  %1964 = vrot.lane.b32.xlu1 %v4694_v19, %s5370_s20  ;;  %v836_v16 = vsel %vm5530_vm8, %v834_v4, %v835_v1  ;;  %v894_v19 = vrot.slane %v6653_v63, 5  ;;  %v8545_v1 = vld [vmem:[#allocation37_spill] sm:$0xff] }
  0xe6   : > { %2186 = vrot.lane.b32.xlu0 %v6273_v49, %s5375_s25  ;;  %v4695_v21 = vcombine.low %v833_v46, %v836_v16  ;;  %v8548_v16 = vld [vmem:[#allocation28_spill] sm:$0xff] }
  0xe7   : > { %v6684_v38 = vpop.permute.xlu1 %3143  ;;  %v896_v4 = vrot.slane %v894_v19, 4  ;;  %v6715_v12 = vcombine.low %v8528_v27, %v8548_v16  ;;  %v895_v35 = vsel %vm5485_vm7, %v4567_v47, %v894_v19  ;;  %v6733_v27 = vsel %vm5472_vm2, %v4613_v7, %v1297_v50 }
  0xe8   : > { %v6686_v49 = vpop.permute.xlu0 %3105  ;;  %v8552_v19 = vcombine.low %v6346_v41, %v6353_v20  ;;  %v4570_v7 = vrot.slane %v5269_v2, 10  ;;  %v923_v50 = vrot.slane %v921_v15, 4 }
  0xe9   : > { %8544 = vst [vmem:[#allocation62_spill] sm:$0xff] %v6686_v49  ;;  %2220 = vrot.lane.b32.xlu1 %v6673_v43, %s5376_s26  ;;  %v6703_v49 = vsel %vm5472_vm2, %v4612_v48, %v1290_v53  ;;  %8549 = vst [vmem:[#allocation28_spill] sm:$0xff] %v6715_v12  ;;  %v898_v53 = vsel %vm5485_vm7, %v896_v4, %v897_v24  ;;  %v6749_v24 = vld [vmem:[%s5470_s17 + $0x23c] sm:$0xf] }
  0xea   : > { %2188 = vrot.lane.b32.xlu0 %v8545_v1, %s5375_s25  ;;  %v1293_v1 = vrot.slane %v5272_v13, 7  ;;  %v4708_v13 = vcombine.low %v6589_v11, %v6643_v9  ;;  %v4703_v47 = vcombine.low %v895_v35, %v898_v53  ;;  %v924_v16 = vrot.slane %v6749_v24, 6  ;;  %v8557_v53 = vld [vmem:[#allocation22_spill] sm:$0xff] }
  0xeb   : > { %v6706_v42 = vpop.permute.xlu1 %2885  ;;  %v922_v2 = vsel %vm5530_vm8, %v4570_v7, %v921_v15  ;;  %v4709_v15 = vcombine.low %v6653_v63, %v6689_v36  ;;  %v611_v63 = vld [vmem:[%s5470_s17 + $0x348] sm:$0xf] }
  0xec   : > { %8546 = vst [vmem:[#allocation63_spill] sm:$0xff] %v6706_v42  ;;  %v6708_v43 = vpop.permute.xlu0 %2853  ;;  %v6719_v48 = vsel %vm5472_vm2, %v1292_v39, %v1293_v1  ;;  %v5273_v39 = vld [vmem:[%s5470_s17 + $0x254] sm:$0xf]  ;;  %v925_v11 = vsel %vm5530_vm8, %v923_v50, %v924_v16  ;;  %v6779_v50 = vld [vmem:[%s5470_s17 + $0x258] sm:$0xf]  ;;  %v4626_v46 = vrot.slane %v611_v63, 11 }
  0xed   : > { %8547 = vst [vmem:[#allocation64_spill] sm:$0xff] %v6708_v43  ;;  %1998 = vrot.lane.b32.xlu1 %v4702_v5, %s5369_s19  ;;  %v1300_v1 = vrot.slane %v5273_v39, 7  ;;  %v928_v9 = vrot.slane %v5273_v39, 6  ;;  %v612_v39 = vld [vmem:[%s5470_s17 + $0x34c] sm:$0xf]  ;;  %v931_v16 = vrot.slane %v6779_v50, 6 }
  0xee   : > { %1966 = vrot.lane.b32.xlu0 %v4695_v21, %s5370_s20  ;;  %v595_v43 = vld [vmem:[%s5470_s17 + $0x2dc] sm:$0xf] }
  0xef   : > { %v6727_v5 = vpop.permute.xlu1 %2887  ;;  %v6746_v4 = vsel %vm5472_vm2, %v1299_v45, %v1300_v1  ;;  %v8558_v1 = vcombine.low %v6390_v29, %v6394_v26  ;;  %v930_v7 = vrot.slane %v928_v9, 4  ;;  %v1416_v29 = vrot.slane %v612_v39, 7  ;;  %v618_v26 = vld [vmem:[%s5470_s17 + $0x368] sm:$0xf]  ;;  %v6802_v39 = vld [vmem:[%s5470_s17 + $0x26c] sm:$0xf] }
  0xf0   : > { %8550 = vst [vmem:[#allocation65_spill] sm:$0xff] %v6727_v5  ;;  %v6729_v21 = vpop.permute.xlu0 %3145 }
  0xf1   : > { %8551 = vst [vmem:[#allocation66_spill] sm:$0xff] %v6729_v21  ;;  %2260 = vrot.lane.b32.xlu1 %v8552_v19, %s5377_s12 }
  0xf2   : > { %2222 = vrot.lane.b32.xlu0 %v6715_v12, %s5376_s26 }
  0xf3   : > { %v6754_v20 = vpop.permute.xlu1 %2927 }
  0xf4   : > { %8553 = vst [vmem:[#allocation67_spill] sm:$0xff] %v6754_v20  ;;  %v6756_v19 = vpop.permute.xlu0 %2925  ;;  %v5278_v20 = vld [vmem:[%s5470_s17 + $0x268] sm:$0xf] }
  0xf5   : > { %8554 = vst [vmem:[#allocation68_spill] sm:$0xff] %v6756_v19  ;;  %2038 = vrot.lane.b32.xlu1 %v4708_v13, %s5368_s18  ;;  %v4714_v13 = vcombine.low %v922_v2, %v925_v11  ;;  %v4614_v5 = vrot.slane %v5278_v20, 11 }
  0xf6   : > { %2000 = vrot.lane.b32.xlu0 %v4703_v47, %s5369_s19  ;;  %v4571_v47 = vrot.slane %v6692_v60, 10  ;;  %v932_v60 = vsel %vm5530_vm8, %v930_v7, %v931_v16  ;;  %v617_v7 = vld [vmem:[%s5470_s17 + $0x364] sm:$0xf]  ;;  %v8563_v16 = vcombine.low %v6442_v22, %v6455_v23  ;;  %v5174_v22 = vld [vmem:[%s8366_s2 + $0x28] sm:$0xff]  }
  0xf7   : > { %v6764_v45 = vpop.permute.xlu1 %2967  ;;  %v4627_v23 = vrot.slane %v617_v7, 11 }
  0xf8   : > { %8555 = vst [vmem:[#allocation69_spill] sm:$0xff] %v6764_v45  ;;  %v6766_v35 = vpop.permute.xlu0 %2965  ;;  %v929_v36 = vsel %vm5530_vm8, %v4571_v47, %v928_v9  ;;  %v1418_v9 = vrot.slane %v1416_v29, 4  ;;  %v5277_v47 = vld [vmem:[%s5470_s17 + $0x350] sm:$0xf] }
  0xf9   : > { %8556 = vst [vmem:[#allocation70_spill] sm:$0xff] %v6766_v35  ;;  %2294 = vrot.lane.b32.xlu1 %v8557_v53, %s8426_s13  ;;  %v4715_v45 = vcombine.low %v929_v36, %v932_v60  ;;  %v5279_v36 = vld [vmem:[%s5470_s17 + $0x36c] sm:$0xf]  ;;  %v5282_v35 = vld [vmem:[%s5470_s17 + $0x284] sm:$0xf] }
  0xfa   : > { %2262 = vrot.lane.b32.xlu0 %v8558_v1, %s5377_s12  ;;  %v5173_v1 = vld [vmem:[%s8366_s2 + $0x30] sm:$0xff]   ;;  %v1426_v60 = vrot.slane %v5279_v36, 7 }
  0xfb   : > { %v6782_v41 = vpop.permute.xlu1 %2983  ;;  %4978 = vmatprep.subr.bf16.mxu0 %v5173_v1 }
  0xfc   : > { %8559 = vst [vmem:[#allocation22_spill] sm:$0xff] %v6782_v41  ;;  %v6784_v53 = vpop.permute.xlu0 %2981  ;;  %v1419_v41 = vrot.slane %v5277_v47, 7  ;;  %v6819_v47 = vld [vmem:[%s5470_s17 + $0x2e0] sm:$0xf]  ;;  %4979 = vmatpush3.bf16.msra.mxu0 %v5173_v1  ;;  %v6833_v1 = vld [vmem:[%s5470_s17 + $0x288] sm:$0xf] }
  0xfd   : > { %8560 = vst [vmem:[#allocation71_spill] sm:$0xff] %v6784_v53  ;;  %2072 = vrot.lane.b32.xlu1 %v4714_v13, %s8413_s21  ;;  %v1304_v13 = vrot.slane %v6802_v39, 7  ;;  %v1311_v7 = vrot.slane %v6833_v1, 7  ;;  %v981_v36 = vrot.slane %v6819_v47, 6  ;;  %4980 = vmatprep.subr.bf16.mxu0 %v5174_v22  ;;  %v5175_v53 = vld [vmem:[%s8366_s2 + $0x20] sm:$0xff]  }
  0xfe   : > { %2040 = vrot.lane.b32.xlu0 %v4709_v15, %s5368_s18  ;;  %v1423_v15 = vrot.slane %v618_v26, 7 }
  0xff   : > { %v6794_v2 = vpop.permute.xlu1 %2763  ;;  %v1306_v20 = vrot.slane %v1304_v13, 4 }
 0x100   : > { %8561 = vst [vmem:[#allocation72_spill] sm:$0xff] %v6794_v2  ;;  %v6796_v11 = vpop.permute.xlu0 %3021  ;;  %v8564_v2 = vld [vmem:[#allocation27_spill] sm:$0xff]  ;;  %4981 = vmatpush3.bf16.msra.mxu0 %v5174_v22  ;;  %v1424_v19 = vsel %vm5472_vm2, %v4627_v23, %v1423_v15  ;;  %v8572_v22 = vcombine.low %v6516_v40, %v6532_v14  ;;  %v1340_v23 = vrot.slane %v6608_v8, 7  ;;  %v6887_v8 = vld [vmem:[%s5470_s17 + $0x2fc] sm:$0xf] }
 0x101   : > { %8562 = vst [vmem:[#allocation73_spill] sm:$0xff] %v6796_v11  ;;  %2334 = vrot.lane.b32.xlu1 %v8563_v16, %s8428_s16  ;;  %v1417_v16 = vsel %vm5472_vm2, %v4626_v46, %v1416_v29  ;;  %v6840_v46 = vsel %vm5472_vm2, %v4614_v5, %v1304_v13  ;;  %v6843_v29 = vld [vmem:[%s5470_s17 + $0x270] sm:$0xf]  ;;  %v6851_v11 = vld [vmem:[%s5470_s17 + $0x2e4] sm:$0xf]  ;;  %v4615_v5 = vrot.slane %v5282_v35, 11  ;;  %4982 = vmatprep.subr.bf16.mxu0 %v5175_v53 }
 0x102   : > { %2296 = vrot.lane.b32.xlu0 %v8564_v2, %s8426_s13  ;;  %v1425_v2 = vrot.slane %v1423_v15, 4  ;;  %8568 = vst [vmem:[#allocation75_spill] sm:$0xff] %v6840_v46  ;;  %v6870_v35 = vld [vmem:[%s5470_s17 + $0x240] sm:$0xf]  ;;  %v6896_v40 = vld [vmem:[%s5470_s17 + $0x28c] sm:$0xf] }
 0x103   : > { %v6814_v26 = vpop.permute.xlu1 %3073  ;;  %v4720_v15 = vcombine.low %v6749_v24, %v6870_v35  ;;  %v6928_v46 = vld [vmem:[%s5470_s17 + $0x300] sm:$0xf] }
 0x104   : > { %8565 = vst [vmem:[#allocation27_spill] sm:$0xff] %v6814_v26  ;;  %v6816_v63 = vpop.permute.xlu0 %3023  ;;  %v8567_v26 = vld [vmem:[#allocation7_spill] sm:$0xff]  ;;  %v1427_v42 = vsel %vm5472_vm2, %v1425_v2, %v1426_v60  ;;  %v984_v60 = vrot.slane %v6851_v11, 6  ;;  %4983 = vmatpush3.bf16.msra.mxu0 %v5175_v53  ;;  %v8577_v53 = vld [vmem:[#allocation6_spill] sm:$0xff] }
 0x105   : > { %8566 = vst [vmem:[#allocation74_spill] sm:$0xff] %v6816_v63  ;;  %v1420_v63 = vsel %vm5472_vm2, %v1418_v9, %v1419_v41  ;;  %2088 = vrot.lane.b32.xlu1 %v8567_v26, %s8418_s22  ;;  %v1307_v41 = vrot.slane %v6843_v29, 7 }
 0x106   : > { %2074 = vrot.lane.b32.xlu0 %v4715_v45, %s8413_s21  ;;  %v4782_v13 = vcombine.low %v1417_v16, %v1420_v63  ;;  %s5380_s21 = smov 52   ;;  %v4576_v63 = vrot.slane %v595_v43, 10  ;;  %v8576_v16 = vld [vmem:[#allocation13_spill] sm:$0xff] }
 0x107   : > { %v6846_v9 = vpop.permute.xlu1 %2803  ;;  %v6877_v2 = vsel %vm5472_vm2, %v1306_v20, %v1307_v41  ;;  %v5176_v20 = vld [vmem:[%s8366_s2 + $0x18] sm:$0xff]  }
 0x108   : > { %8569 = vst [vmem:[#allocation76_spill] sm:$0xff] %v6846_v9  ;;  %v6848_v45 = vpop.permute.xlu0 %2765  ;;  %8573 = vst [vmem:[#allocation78_spill] sm:$0xff] %v6877_v2  ;;  %v3157_v41 = vsel %vm2446_vm9, %v4782_v13, %v8576_v16  ;;  %v1314_v9 = vrot.slane %v6896_v40, 7  ;;  %v982_v12 = vsel %vm5530_vm8, %v4576_v63, %v981_v36  ;;  %v1342_v2 = vrot.slane %v1340_v23, 4  ;;  %v599_v13 = vld [vmem:[%s5470_s17 + $0x2f8] sm:$0xf]  ;;  %4984 = vmatprep.subr.bf16.mxu0 %v5176_v20 }
 0x109   : > { %8570 = vst [vmem:[#allocation77_spill] sm:$0xff] %v6848_v45  ;;  %v8571_v45 = vcombine.low %v6483_v56, %v6494_v30  ;;  %v1313_v56 = vrot.slane %v1311_v7, 4  ;;  %v983_v30 = vrot.slane %v981_v36, 4  ;;  %v8580_v63 = vld [vmem:[#allocation12_spill] sm:$0xff]  ;;  %4985 = vmatpush3.bf16.msra.mxu0 %v5176_v20  ;;  %v4582_v20 = vrot.slane %v6819_v47, 9 }
 0x10a   : > { %2336 = vrot.lane.b32.xlu0 %v8572_v22, %s8428_s16  ;;  %v4618_v22 = vrot.slane %v6523_v34, 11  ;;  %v3180_v16 = vsel %vm2471_vm10, %v3157_v41, %v8580_v63  ;;  %v6938_v41 = vld [vmem:[%s5470_s17 + $0x25c] sm:$0xf]  ;;  %v991_v47 = vrot.slane %v6928_v46, 6 }
 0x10b   : > { %2374 = vrot.lane.b32.xlu1 %v8571_v45, %s5380_s21  ;;  %v6882_v14 = vpop.permute.xlu1 %3107  ;;  %v4783_v45 = vcombine.low %v1424_v19, %v1427_v42  ;;  %v1029_v42 = vrot.slane %v6851_v11, 5  ;;  %v985_v34 = vsel %vm5530_vm8, %v983_v30, %v984_v60  ;;  %v6909_v19 = vld [vmem:[%s5470_s17 + $0x2e8] sm:$0xf]  ;;  %v6919_v36 = vsel %vm5472_vm2, %v1313_v56, %v1314_v9 }
 0x10c   : > { %8574 = vst [vmem:[#allocation79_spill] sm:$0xff] %v6882_v14  ;;  %v6884_v43 = vpop.permute.xlu0 %3075  ;;  %8579 = vst [vmem:[#allocation6_spill] sm:$0xff] %v6919_v36  ;;  %v4721_v63 = vcombine.low %v6779_v50, %v6938_v41  ;;  %v8584_v9 = vcombine.low %v6508_v57, %v6536_v37  ;;  %v4577_v36 = vrot.slane %v599_v13, 10  ;;  %v3196_v57 = vsel %vm2488_vm11, %v3180_v16, %v8585_v62 }
 0x10d   : > { %8575 = vst [vmem:[#allocation80_spill] sm:$0xff] %v6884_v43  ;;  %v5285_v43 = vld [vmem:[%s5470_s17 + $0x20c] sm:$0xf]  ;;  %v4619_v13 = vrot.slane %v6519_v28, 11 }
 0x10e   : > { %v1343_v14 = vrot.slane %v5285_v43, 7  ;;  %2090 = vrot.lane.b32.xlu0 %v8577_v53, %s8418_s22  ;;  %v988_v43 = vrot.slane %v6887_v8, 6  ;;  %s5381_s22 = smov 56  }
 0x10f   : > { %2122 = vrot.lane.b32.xlu1 %v4720_v15, %s8423_s23  ;;  %v6915_v15 = vsel %vm5472_vm2, %v4615_v5, %v1311_v7  ;;  %v6923_v30 = vpop.permute.xlu1 %2855  ;;  %v5177_v7 = vld [vmem:[%s8366_s2 + $0x10] sm:$0xff]   ;;  %v8583_v5 = vld [vmem:[#allocation15_spill] sm:$0xff] }
 0x110   : > { %8578 = vst [vmem:[#allocation13_spill] sm:$0xff] %v6915_v15  ;;  %8581 = vst [vmem:[#allocation12_spill] sm:$0xff] %v6923_v30  ;;  %v6925_v60 = vpop.permute.xlu0 %2805  ;;  %v3160_v56 = vsel %vm2446_vm9, %v4783_v45, %v8583_v5  ;;  %v4726_v45 = vcombine.low %v982_v12, %v985_v34  ;;  %v1344_v5 = vsel %vm5472_vm2, %v1342_v2, %v1343_v14  ;;  %v1032_v30 = vrot.slane %v6909_v19, 5  ;;  %v6964_v2 = vld [vmem:[%s5470_s17 + $0x1c8] sm:$0xf]  ;;  %v8588_v14 = vld [vmem:[#allocation14_spill] sm:$0xff] }
 0x111   : > { %8582 = vst [vmem:[#allocation81_spill] sm:$0xff] %v6925_v60  ;;  %v1341_v60 = vsel %vm5472_vm2, %v4618_v22, %v1340_v23  ;;  %v1031_v23 = vrot.slane %v1029_v42, 4  ;;  %v990_v22 = vrot.slane %v988_v43, 4  ;;  %v1347_v15 = vrot.slane %v6597_v55, 7  ;;  %4986 = vmatprep.subr.bf16.mxu0 %v5177_v7  ;;  %v5178_v55 = vld [vmem:[%s8366_s2 + $0x8] sm:$0xff]   ;;  %v8589_v34 = vld [vmem:[#allocation17_spill] sm:$0xff] }
 0x112   : > { %2376 = vrot.lane.b32.xlu0 %v8584_v9, %s5380_s21  ;;  %4987 = vmatpush3.bf16.msra.mxu0 %v5177_v7  ;;  %v3212_v62 = vsel %vm2505_vm12, %v3196_v57, %v8589_v34  ;;  %v4774_v16 = vcombine.low %v1341_v60, %v1344_v5  ;;  %v1030_v7 = vsel %vm5485_vm7, %v4582_v20, %v1029_v42  ;;  %v839_v60 = vrot.slane %v6964_v2, 6  ;;  %v8590_v42 = vld [vmem:[#allocation19_spill] sm:$0xff] }
 0x113   : > { %2390 = vrot.lane.b32.xlu1 %v8533_v25, %s5381_s22  ;;  %v5287_v25 = vld [vmem:[%s5470_s17 + $0x228] sm:$0xf]  ;;  %v6959_v37 = vpop.permute.xlu1 %3147  ;;  %v989_v9 = vsel %vm5530_vm8, %v4577_v36, %v988_v43  ;;  %v1033_v57 = vsel %vm5485_vm7, %v1031_v23, %v1032_v30  ;;  %v992_v28 = vsel %vm5530_vm8, %v990_v22, %v991_v47  ;;  %4988 = vmatprep.subr.bf16.mxu0 %v5178_v55  ;;  %v6997_v5 = vld [vmem:[%s5470_s17 + $0x1cc] sm:$0xf]  ;;  %v8593_v30 = vld [vmem:[#allocation10_spill] sm:$0xff] }
 0x114   : > { %v1350_v21 = vrot.slane %v5287_v25, 7  ;;  %8586 = vst [vmem:[#allocation15_spill] sm:$0xff] %v6959_v37  ;;  %v6961_v12 = vpop.permute.xlu0 %3109  ;;  %v3182_v25 = vsel %vm2471_vm10, %v3160_v56, %v8588_v14  ;;  %v1036_v56 = vrot.slane %v6928_v46, 5  ;;  %v3228_v20 = vsel %vm8444_vm13, %v3212_v62, %v8590_v42  ;;  %v8594_v22 = vld [vmem:[#allocation21_spill] sm:$0xff]  ;;  %v5179_v62 = vld [vmem:[%s8366_s2] sm:$0xff]  }
 0x115   : > { %8587 = vst [vmem:[#allocation11_spill] sm:$0xff] %v6961_v12  ;;  %v6981_v12 = vld [vmem:[%s5470_s17 + $0x304] sm:$0xf]  ;;  %v3198_v23 = vsel %vm2488_vm11, %v3182_v25, %v8593_v30  ;;  %v3244_v47 = vsel %vm8439_vm14, %v3228_v20, %v8594_v22  ;;  %v4583_v14 = vrot.slane %v6887_v8, 9  ;;  %v4727_v25 = vcombine.low %v989_v9, %v992_v28  ;;  %v8596_v37 = vld [vmem:[#allocation25_spill] sm:$0xff] }
 0x116   : > { %2124 = vrot.lane.b32.xlu0 %v4721_v63, %s8423_s23  ;;  %v531_v63 = vld [vmem:[%s5470_s17 + $0x1c4] sm:$0xf]  ;;  %4989 = vmatpush3.bf16.msra.mxu0 %v5178_v55  ;;  %v1039_v34 = vrot.slane %v6981_v12, 5  ;;  %s5382_s23 = smov 60   ;;  %v4732_v55 = vcombine.low %v1030_v7, %v1033_v57  ;;  %v1348_v42 = vsel %vm5472_vm2, %v4619_v13, %v1347_v15  ;;  %v1038_v30 = vrot.slane %v1036_v56, 4 }
 0x117   : > { %2156 = vrot.lane.b32.xlu1 %v4726_v45, %s5374_s24  ;;  %v1349_v45 = vrot.slane %v1347_v15, 4  ;;  %v6992_v43 = vpop.permute.xlu1 %2889  ;;  %v4560_v20 = vrot.slane %v531_v63, 10  ;;  %v841_v22 = vrot.slane %v839_v60, 4  ;;  %4990 = vmatprep.subr.bf16.mxu0 %v5179_v62  ;;  %v7025_v15 = vld [vmem:[%s5470_s17 + $0x1e4] sm:$0xf] }
 0x118   : > { %8591 = vst [vmem:[#allocation14_spill] sm:$0xff] %v6992_v43  ;;  %v6994_v36 = vpop.permute.xlu0 %2857  ;;  %v8595_v43 = vld [vmem:[#allocation16_spill] sm:$0xff]  ;;  %v8600_v57 = vld [vmem:[#allocation30_spill] sm:$0xff] }
 0x119   : > { %8592 = vst [vmem:[#allocation17_spill] sm:$0xff] %v6994_v36  ;;  %v1351_v8 = vsel %vm5472_vm2, %v1349_v45, %v1350_v21  ;;  %v842_v36 = vrot.slane %v6997_v5, 6  ;;  %v8599_v21 = vld [vmem:[#allocation18_spill] sm:$0xff]  ;;  %v8601_v45 = vld [vmem:[#allocation33_spill] sm:$0xff] }
 0x11a   : > { %2392 = vrot.lane.b32.xlu0 %v8532_v54, %s5381_s22  ;;  %v3260_v54 = vsel %vm8441_vm15, %v3244_v47, %v8596_v37  ;;  %4991 = vmatpush3.bf16.msra.mxu0 %v5179_v62  ;;  %v4775_v63 = vcombine.low %v1348_v42, %v1351_v8  ;;  %v840_v47 = vsel %vm5530_vm8, %v4560_v20, %v839_v60  ;;  %v8603_v8 = vld [vmem:[#allocation39_spill] sm:$0xff]  ;;  %v8606_v20 = vld [vmem:[#allocation24_spill] sm:$0xff] }
 0x11b   : > { %2430 = vrot.lane.b32.xlu1 %v4774_v16, %s5382_s23  ;;  %v3214_v16 = vsel %vm2505_vm12, %v3198_v23, %v8595_v43  ;;  %v7020_v7 = vpop.permute.xlu1 %2891  ;;  %v3276_v28 = vsel %vm8437_vm0, %v3260_v54, %v8600_v57  ;;  %v1037_v43 = vsel %vm5485_vm7, %v4583_v14, %v1036_v56  ;;  %v901_v23 = vrot.slane %v6997_v5, 5  ;;  %v7058_v60 = vld [vmem:[%s5470_s17 + $0x1e8] sm:$0xf] }
 0x11c   : > { %8597 = vst [vmem:[#allocation19_spill] sm:$0xff] %v7020_v7  ;;  %v7022_v9 = vpop.permute.xlu0 %3149  ;;  %v3230_v13 = vsel %vm8444_vm13, %v3214_v16, %v8599_v21  ;;  %v3292_v37 = vsel %vm8438_vm1, %v3276_v28, %v8601_v45  ;;  %v1040_v54 = vsel %vm5485_vm7, %v1038_v30, %v1039_v34  ;;  %v843_v62 = vsel %vm5530_vm8, %v841_v22, %v842_v36  ;;  %v7045_v16 = vld [vmem:[%s5470_s17 + $0x1d0] sm:$0xf]  ;;  %v535_v30 = vld [vmem:[%s5470_s17 + $0x1e0] sm:$0xf] }
 0x11d   : > { %8598 = vst [vmem:[#allocation10_spill] sm:$0xff] %v7022_v9  ;;  %v3308_v56 = vsel %vm2607_vm3, %v3292_v37, %v8603_v8  ;;  %v488_v36 = vld [vmem:[%s5470_s17 + $0xe4] sm:$0xf]  ;;  %v4733_v57 = vcombine.low %v1037_v43, %v1040_v54  ;;  %v4696_v28 = vcombine.low %v840_v47, %v843_v62  ;;  %v903_v45 = vrot.slane %v901_v23, 4  ;;  %v8610_v43 = vld [vmem:[#allocation40_spill] sm:$0xff] }
 0x11e   : > { %2158 = vrot.lane.b32.xlu0 %v4727_v25, %s5374_s24  ;;  %v8602_v25 = vld [vmem:[#allocation20_spill] sm:$0xff]  ;;  %v3324_v21 = vsel %vm2624_vm4, %v3308_v56, %v6355_v31  ;;  %v904_v37 = vrot.slane %v7045_v16, 5  ;;  %v4561_v8 = vrot.slane %v535_v30, 10  ;;  %v1108_v31 = vrot.slane %v488_v36, 7 }
 0x11f   : > { %2190 = vrot.lane.b32.xlu1 %v4732_v55, %s5375_s25  ;;  %v846_v55 = vrot.slane %v7025_v15, 6  ;;  %v3246_v42 = vsel %vm8439_vm14, %v3230_v13, %v8602_v25  ;;  %v7052_v14 = vpop.permute.xlu1 %2931  ;;  %v4568_v13 = vrot.slane %v6964_v2, 9  ;;  %v487_v25 = vld [vmem:[%s5470_s17 + $0xe0] sm:$0xf]  ;;  %v4738_v47 = vcombine.low %v6851_v11, %v6909_v19 }
 0x120   : > { %8604 = vst [vmem:[#allocation21_spill] sm:$0xff] %v7052_v14  ;;  %v7054_v34 = vpop.permute.xlu0 %2929  ;;  %v3262_v22 = vsel %vm8441_vm15, %v3246_v42, %v8606_v20  ;;  %v849_v42 = vrot.slane %v7058_v60, 6  ;;  %v7072_v20 = vld [vmem:[%s5470_s17 + $0xe8] sm:$0xf]  ;;  %v8607_v2 = vld [vmem:[#allocation34_spill] sm:$0xff]  ;;  %v905_v30 = vsel %vm5485_vm7, %v903_v45, %v904_v37  ;;  %v4590_v36 = vrot.slane %v487_v25, 11 }
 0x121   : > { %8605 = vst [vmem:[#allocation16_spill] sm:$0xff] %v7054_v34  ;;  %v848_v34 = vrot.slane %v846_v55, 4  ;;  %v3278_v56 = vsel %vm8437_vm0, %v3262_v22, %v8607_v2  ;;  %v902_v62 = vsel %vm5485_vm7, %v4568_v13, %v901_v23  ;;  %v1111_v22 = vrot.slane %v7072_v20, 7  ;;  %v7092_v2 = vld [vmem:[%s5470_s17 + $0xec] sm:$0xf] }
 0x122   : > { %2432 = vrot.lane.b32.xlu0 %v4775_v63, %s5382_s23  ;;  %v3294_v54 = vsel %vm8438_vm1, %v3278_v56, %v8610_v43  ;;  %v847_v56 = vsel %vm5530_vm8, %v4561_v8, %v846_v55  ;;  %v1110_v19 = vrot.slane %v1108_v31, 4  ;;  %v7106_v45 = vld [vmem:[%s5470_s17 + $0x1ec] sm:$0xf]  ;;  %v494_v37 = vld [vmem:[%s5470_s17 + $0x100] sm:$0xf]  ;;  %v4704_v25 = vcombine.low %v902_v62, %v905_v30 }
 0x123   : > { %3347 = vrot.lane.b32.xlu1 %v3324_v21, %s5383_s14  ;;  %v7076_v21 = vpop.permute.xlu1 %2971  ;;  %v850_v11 = vsel %vm5530_vm8, %v848_v34, %v849_v42  ;;  %v3310_v23 = vsel %vm2607_vm3, %v3294_v54, %v6357_v32  ;;  %v1176_v34 = vrot.slane %v7092_v2, 5  ;;  %v1109_v8 = vsel %vm5472_vm2, %v4590_v36, %v1108_v31  ;;  %v7118_v43 = vld [vmem:[%s5470_s17 + $0xf0] sm:$0xf]  ;;  %v7129_v62 = vld [vmem:[%s5470_s17 + $0x104] sm:$0xf] }
 0x124   : > { %8608 = vst [vmem:[#allocation25_spill] sm:$0xff] %v7076_v21  ;;  %v7078_v63 = vpop.permute.xlu0 %2969  ;;  %v3326_v55 = vsel %vm2624_vm4, %v3310_v23, %v6434_v18  ;;  %v4697_v32 = vcombine.low %v847_v56, %v850_v11  ;;  %v4569_v42 = vrot.slane %v7025_v15, 9  ;;  %v1112_v54 = vsel %vm5472_vm2, %v1110_v19, %v1111_v22  ;;  %v5293_v21 = vld [vmem:[%s5470_s17 + $0x2c4] sm:$0xf]  ;;  %v5294_v14 = vld [vmem:[%s5470_s17 + $0x2a8] sm:$0xf] }
 0x125   : > { %8609 = vst [vmem:[#allocation18_spill] sm:$0xff] %v7078_v63  ;;  %v911_v23 = vrot.slane %v7106_v45, 5  ;;  %v4598_v15 = vrot.slane %v7072_v20, 9  ;;  %v1178_v31 = vrot.slane %v1176_v34, 4  ;;  %v1179_v30 = vrot.slane %v7118_v43, 5 }
 0x126   : > { %1968 = vrot.lane.b32.xlu0 %v4696_v28, %s5370_s20  ;;  %v4746_v36 = vcombine.low %v1109_v8, %v1112_v54  ;;  %v4739_v22 = vcombine.low %v6928_v46, %v6981_v12  ;;  %v7150_v12 = vld [vmem:[%s5470_s17 + $0x108] sm:$0xf] }
 0x127   : > { %2192 = vrot.lane.b32.xlu1 %v4733_v57, %s5375_s25  ;;  %v908_v57 = vrot.slane %v7058_v60, 5  ;;  %v7101_v13 = vpop.permute.xlu1 %2987 }
 0x128   : > { %8611 = vst [vmem:[#allocation30_spill] sm:$0xff] %v7101_v13  ;;  %v7103_v28 = vpop.permute.xlu0 %2985  ;;  %v1115_v13 = vrot.slane %v494_v37, 7  ;;  %v1118_v37 = vrot.slane %v7129_v62, 7 }
 0x129   : > { %8612 = vst [vmem:[#allocation33_spill] sm:$0xff] %v7103_v28  ;;  %v910_v18 = vrot.slane %v908_v57, 4  ;;  %v493_v28 = vld [vmem:[%s5470_s17 + $0xfc] sm:$0xf]  ;;  %v909_v56 = vsel %vm5485_vm7, %v4569_v42, %v908_v57  ;;  %v4572_v57 = vrot.slane %v6802_v39, 10 }
 0x12a   : > { %2224 = vrot.lane.b32.xlu0 %v4738_v47, %s5376_s26  ;;  %v4591_v11 = vrot.slane %v493_v28, 11  ;;  %v1117_v19 = vrot.slane %v1115_v13, 4  ;;  %v5290_v28 = vld [vmem:[%s5470_s17 + $0x2bc] sm:$0xf] }
 0x12b   : > { %3349 = vrot.lane.b32.xlu1 %v3326_v55, %s5383_s14  ;;  %v7124_v55 = vpop.permute.xlu1 %3027  ;;  %v912_v20 = vsel %vm5485_vm7, %v910_v18, %v911_v23  ;;  %v4617_v42 = vrot.slane %v5290_v28, 11  ;;  %v1180_v18 = vsel %vm5485_vm7, %v1178_v31, %v1179_v30  ;;  %v4710_v23 = vcombine.low %v6997_v5, %v7045_v16  ;;  %v5292_v16 = vld [vmem:[%s5470_s17 + $0x2a0] sm:$0xf] }
 0x12c   : > { %8613 = vst [vmem:[#allocation20_spill] sm:$0xff] %v7124_v55  ;;  %v7126_v47 = vpop.permute.xlu0 %3025  ;;  %v1116_v39 = vsel %vm5472_vm2, %v4591_v11, %v1115_v13  ;;  %v1226_v30 = vrot.slane %v7118_v43, 7  ;;  %v4616_v13 = vrot.slane %v5292_v16, 11  ;;  %v4604_v43 = vrot.slane %v7092_v2, 11 }
 0x12d   : > { %8614 = vst [vmem:[#allocation39_spill] sm:$0xff] %v7126_v47  ;;  %v5288_v47 = vld [vmem:[%s5470_s17 + $0x2c0] sm:$0xf]  ;;  %v942_v2 = vrot.slane %v6896_v40, 6 }
 0x12e   : > { %1970 = vrot.lane.b32.xlu0 %v4697_v32, %s5370_s20  ;;  %v1325_v55 = vrot.slane %v5288_v47, 7  ;;  %v5289_v32 = vld [vmem:[%s5470_s17 + $0x2a4] sm:$0xf]  ;;  %v4705_v47 = vcombine.low %v909_v56, %v912_v20 }
 0x12f   : > { %2002 = vrot.lane.b32.xlu1 %v4704_v25, %s5369_s19  ;;  %v935_v25 = vrot.slane %v6843_v29, 6  ;;  %v1318_v8 = vrot.slane %v5289_v32, 7  ;;  %v7145_v54 = vpop.permute.xlu1 %3079  ;;  %v1177_v29 = vsel %vm5485_vm7, %v4598_v15, %v1176_v34  ;;  %v7165_v32 = vld [vmem:[%s5470_s17 + $0x274] sm:$0xf]  ;;  %v1119_v15 = vsel %vm5472_vm2, %v1117_v19, %v1118_v37 }
 0x130   : > { %8615 = vst [vmem:[#allocation24_spill] sm:$0xff] %v7145_v54  ;;  %v7147_v46 = vpop.permute.xlu0 %3077  ;;  %v938_v28 = vrot.slane %v7165_v32, 6  ;;  %v492_v34 = vld [vmem:[%s5470_s17 + $0xf4] sm:$0xf]  ;;  %v1327_v5 = vrot.slane %v1325_v55, 4  ;;  %v4599_v54 = vrot.slane %v7129_v62, 9  ;;  %v4747_v63 = vcombine.low %v1116_v39, %v1119_v15 }
 0x131   : > { %8616 = vst [vmem:[#allocation34_spill] sm:$0xff] %v7147_v46  ;;  %v937_v31 = vrot.slane %v935_v25, 4  ;;  %v1320_v56 = vrot.slane %v1318_v8, 4  ;;  %v4754_v46 = vcombine.low %v1177_v29, %v1180_v18  ;;  %v936_v19 = vsel %vm5530_vm8, %v4572_v57, %v935_v25 }
 0x132   : > { %2226 = vrot.lane.b32.xlu0 %v4739_v22, %s5376_s26  ;;  %v1183_v22 = vrot.slane %v7150_v12, 5  ;;  %v1229_v37 = vrot.slane %v492_v34, 7  ;;  %v1228_v25 = vrot.slane %v1226_v30, 4  ;;  %v4711_v39 = vcombine.low %v7058_v60, %v7106_v45  ;;  %v7227_v60 = vld [vmem:[%s5470_s17 + $0x290] sm:$0xf] }
 0x133   : > { %2264 = vrot.lane.b32.xlu1 %v4746_v36, %s5377_s12  ;;  %v7173_v36 = vld [vmem:[%s5470_s17 + $0x10c] sm:$0xf]  ;;  %v7177_v11 = vpop.permute.xlu1 %3113  ;;  %v939_v29 = vsel %vm5530_vm8, %v937_v31, %v938_v28  ;;  %v1227_v28 = vsel %vm5472_vm2, %v4604_v43, %v1226_v30  ;;  %8625 = vst [vmem:[#allocation89_spill] sm:$0xff] %v7227_v60  ;;  %v945_v45 = vrot.slane %v7227_v60, 6  ;;  %v944_v15 = vrot.slane %v942_v2, 4 }
 0x134   : > { %8617 = vst [vmem:[#allocation40_spill] sm:$0xff] %v7177_v11  ;;  %v7179_v20 = vpop.permute.xlu0 %3111  ;;  %v1186_v16 = vrot.slane %v7173_v36, 5  ;;  %v1328_v11 = vrot.slane %v5293_v21, 7  ;;  %v1185_v57 = vrot.slane %v1183_v22, 4  ;;  %v1230_v34 = vsel %vm5472_vm2, %v1228_v25, %v1229_v37 }
 0x135   : > { %8618 = vst [vmem:[#allocation82_spill] sm:$0xff] %v7179_v20  ;;  %v1321_v20 = vrot.slane %v5294_v14, 7  ;;  %v7207_v14 = vsel %vm5472_vm2, %v4616_v13, %v1318_v8  ;;  %v4716_v8 = vcombine.low %v936_v19, %v939_v29  ;;  %v4605_v13 = vrot.slane %v7150_v12, 11  ;;  %v623_v29 = vld [vmem:[%s5470_s17 + $0x380] sm:$0xf] }
 0x136   : > { %2004 = vrot.lane.b32.xlu0 %v4705_v47, %s5369_s19  ;;  %v7203_v21 = vsel %vm5472_vm2, %v1327_v5, %v1328_v11  ;;  %8623 = vst [vmem:[#allocation87_spill] sm:$0xff] %v7207_v14  ;;  %v4573_v47 = vrot.slane %v6833_v1, 10  ;;  %v1184_v1 = vsel %vm5485_vm7, %v4599_v54, %v1183_v22  ;;  %v498_v5 = vld [vmem:[%s5470_s17 + $0x110] sm:$0xf]  ;;  %v4760_v54 = vcombine.low %v1227_v28, %v1230_v34  ;;  %v8628_v34 = vld [vmem:[#allocation9_spill] sm:$0xff] }
 0x137   : > { %2042 = vrot.lane.b32.xlu1 %v4710_v23, %s5368_s18  ;;  %v7193_v62 = vpop.permute.xlu1 %3153  ;;  %v7199_v23 = vsel %vm5472_vm2, %v4617_v42, %v1325_v55  ;;  %8622 = vst [vmem:[#allocation86_spill] sm:$0xff] %v7203_v21  ;;  %v7211_v40 = vsel %vm5472_vm2, %v1320_v56, %v1321_v20  ;;  %v624_v56 = vld [vmem:[%s5470_s17 + $0x384] sm:$0xf]  ;;  %v1236_v19 = vrot.slane %v498_v5, 7  ;;  %v7325_v14 = vld [vmem:[%s5470_s17 + $0x338] sm:$0xf] }
 0x138   : > { %8619 = vst [vmem:[#allocation83_spill] sm:$0xff] %v7193_v62  ;;  %v7195_v18 = vpop.permute.xlu0 %3151  ;;  %8621 = vst [vmem:[#allocation85_spill] sm:$0xff] %v7199_v23  ;;  %v943_v11 = vsel %vm5530_vm8, %v4573_v47, %v942_v2  ;;  %v5299_v55 = vld [vmem:[%s5470_s17 + $0x3a4] sm:$0xf]  ;;  %v8633_v21 = vld [vmem:[#allocation29_spill] sm:$0xff] }
 0x139   : > { %8620 = vst [vmem:[#allocation84_spill] sm:$0xff] %v7195_v18  ;;  %8624 = vst [vmem:[#allocation88_spill] sm:$0xff] %v7211_v40  ;;  %v1440_v18 = vrot.slane %v5299_v55, 7 }
 0x13a   : > { %2266 = vrot.lane.b32.xlu0 %v4747_v63, %s5377_s12  ;;  %v1233_v63 = vrot.slane %v7173_v36, 7  ;;  %v946_v36 = vsel %vm5530_vm8, %v944_v15, %v945_v45 }
 0x13b   : > { %2298 = vrot.lane.b32.xlu1 %v4754_v46, %s8426_s13  ;;  %v1187_v46 = vsel %vm5485_vm7, %v1185_v57, %v1186_v16  ;;  %v7235_v31 = vpop.permute.xlu1 %1962  ;;  %v1430_v16 = vrot.slane %v624_v56, 7  ;;  %v4717_v12 = vcombine.low %v943_v11, %v946_v36  ;;  %v8629_v36 = vcombine.low %v6703_v49, %v6719_v48  ;;  %v7301_v48 = vld [vmem:[%s5470_s17 + $0x334] sm:$0xf] }
 0x13c   : > { %v7237_v30 = vpop.permute.xlu0 %1960  ;;  %v4755_v22 = vcombine.low %v1184_v1, %v1187_v46  ;;  %v1235_v20 = vrot.slane %v1233_v63, 4  ;;  %v1234_v25 = vsel %vm5472_vm2, %v4605_v13, %v1233_v63  ;;  %v4628_v1 = vrot.slane %v623_v29, 11  ;;  %v630_v13 = vld [vmem:[%s5470_s17 + $0x3a0] sm:$0xf] }
 0x13d   : > { %v1432_v45 = vrot.slane %v1430_v16, 4 }
 0x13e   : > { %2044 = vrot.lane.b32.xlu0 %v4711_v39, %s5368_s18  ;;  %v1237_v57 = vsel %vm5472_vm2, %v1235_v20, %v1236_v19  ;;  %v7264_v39 = vld [vmem:[%s5470_s17 + $0x318] sm:$0xf]  ;;  %v1431_v56 = vsel %vm5472_vm2, %v4628_v1, %v1430_v16  ;;  %v629_v1 = vld [vmem:[%s5470_s17 + $0x39c] sm:$0xf] }
 0x13f   : > { %2076 = vrot.lane.b32.xlu1 %v4716_v8, %s8626_s15  ;;  %v7248_v43 = vpop.permute.xlu1 %1996  ;;  %v5296_v8 = vld [vmem:[%s5470_s17 + $0x388] sm:$0xf]  ;;  %v4761_v46 = vcombine.low %v1234_v25, %v1237_v57  ;;  %v995_v15 = vrot.slane %v7264_v39, 6  ;;  %v7290_v20 = vld [vmem:[%s5470_s17 + $0x278] sm:$0xf]  ;;  %v1354_v25 = vrot.slane %v6870_v35, 7 }
 0x140   : > { %v7250_v37 = vpop.permute.xlu0 %1994  ;;  %v1433_v28 = vrot.slane %v5296_v8, 7  ;;  %v4722_v19 = vcombine.low %v7165_v32, %v7290_v20  ;;  %v1437_v57 = vrot.slane %v630_v13, 7  ;;  %v4620_v35 = vrot.slane %v6749_v24, 11  ;;  %v7310_v13 = vld [vmem:[%s5470_s17 + $0x320] sm:$0xf] }
 0x141   : > { %v997_v29 = vrot.slane %v995_v15, 4  ;;  %v4629_v62 = vrot.slane %v629_v1, 11  ;;  %v1046_v55 = vrot.slane %v7310_v13, 5  ;;  %v8635_v1 = vcombine.low %v6733_v27, %v6746_v4  ;;  %v5301_v4 = vld [vmem:[%s5470_s17 + $0x260] sm:$0xf] }
 0x142   : > { %2300 = vrot.lane.b32.xlu0 %v4755_v22, %s8426_s13  ;;  %s8627_s13 = smov 20   ;;  %v7277_v22 = vld [vmem:[%s5470_s17 + $0x31c] sm:$0xf]  ;;  %v1434_v11 = vsel %vm5472_vm2, %v1432_v45, %v1433_v28  ;;  %v5298_v45 = vld [vmem:[%s5470_s17 + $0x244] sm:$0xf]  ;;  %v1439_v7 = vrot.slane %v1437_v57, 4 }
 0x143   : > { %2338 = vrot.lane.b32.xlu1 %v4760_v54, %s8428_s16  ;;  %v7259_v2 = vpop.permute.xlu1 %2036  ;;  %v603_v54 = vld [vmem:[%s5470_s17 + $0x314] sm:$0xf]  ;;  %v998_v16 = vrot.slane %v7277_v22, 6  ;;  %v4784_v28 = vcombine.low %v1431_v56, %v1434_v11  ;;  %v1356_v11 = vrot.slane %v1354_v25, 4 }
 0x144   : > { %v7261_v47 = vpop.permute.xlu0 %2034 }
 0x145   : > { %v999_v56 = vsel %vm5530_vm8, %v997_v29, %v998_v16  ;;  %v4584_v16 = vrot.slane %v7264_v39, 9 }
 0x146   : > { %2078 = vrot.lane.b32.xlu0 %v4717_v12, %s8626_s15  ;;  %v4578_v12 = vrot.slane %v603_v54, 10  ;;  %v8631_v54 = vld [vmem:[#allocation8_spill] sm:$0xff] }
 0x147   : > { %2092 = vrot.lane.b32.xlu1 %v8628_v34, %s8627_s13  ;;  %v7271_v63 = vpop.permute.xlu1 %2070 }
 0x148   : > { %v7273_v5 = vpop.permute.xlu0 %2068  ;;  %v996_v42 = vsel %vm5530_vm8, %v4578_v12, %v995_v15  ;;  %v3163_v15 = vsel %vm2446_vm9, %v4784_v28, %v8633_v21  ;;  %v7330_v12 = vld [vmem:[%s5470_s17 + $0x294] sm:$0xf]  ;;  %v1355_v21 = vsel %vm5472_vm2, %v4620_v35, %v1354_v25  ;;  %v1438_v25 = vsel %vm5472_vm2, %v4629_v62, %v1437_v57  ;;  %v8637_v35 = vld [vmem:[#allocation41_spill] sm:$0xff] }
 0x149   : > { %8634 = vst [vmem:[#allocation29_spill] sm:$0xff] %v7330_v12  ;;  %v4723_v29 = vcombine.low %v7227_v60, %v7330_v12  ;;  %v4728_v23 = vcombine.low %v996_v42, %v999_v56  ;;  %v1005_v60 = vrot.slane %v7325_v14, 6  ;;  %v1361_v12 = vrot.slane %v6938_v41, 7 }
 0x14a   : > { %2340 = vrot.lane.b32.xlu0 %v4761_v46, %s8428_s16  ;;  %v1357_v46 = vrot.slane %v5298_v45, 7  ;;  %s8630_s16 = smov 24   ;;  %v607_v45 = vld [vmem:[%s5470_s17 + $0x330] sm:$0xf]  ;;  %v1364_v42 = vrot.slane %v5301_v4, 7  ;;  %v4621_v62 = vrot.slane %v6779_v50, 11 }
 0x14b   : > { %2378 = vrot.lane.b32.xlu1 %v8629_v36, %s5380_s21  ;;  %v7296_v8 = vpop.permute.xlu1 %2086  ;;  %v1043_v36 = vrot.slane %v7277_v22, 5  ;;  %v4579_v9 = vrot.slane %v607_v45, 10 }
 0x14c   : > { %v7298_v49 = vpop.permute.xlu0 %2084 }
 0x14d   : > { %v1045_v28 = vrot.slane %v1043_v36, 4  ;;  %v1044_v41 = vsel %vm5485_vm7, %v4584_v16, %v1043_v36 }
 0x14e   : > { %2094 = vrot.lane.b32.xlu0 %v8631_v54, %s8627_s13  ;;  %v1358_v54 = vsel %vm5472_vm2, %v1356_v11, %v1357_v46  ;;  %v1441_v46 = vsel %vm5472_vm2, %v1439_v7, %v1440_v18  ;;  %v1363_v18 = vrot.slane %v1361_v12, 4 }
 0x14f   : > { %2126 = vrot.lane.b32.xlu1 %v4722_v19, %s8630_s16  ;;  %v1002_v19 = vrot.slane %v7301_v48, 6  ;;  %v7320_v24 = vpop.permute.xlu1 %2120  ;;  %v1047_v11 = vsel %vm5485_vm7, %v1045_v28, %v1046_v55 }
 0x150   : > { %8632 = vst [vmem:[#allocation90_spill] sm:$0xff] %v7320_v24  ;;  %v7322_v40 = vpop.permute.xlu0 %2118 }
 0x151   : > { %v1004_v39 = vrot.slane %v1002_v19, 4  ;;  %v1003_v57 = vsel %vm5530_vm8, %v4579_v9, %v1002_v19  ;;  %v4734_v9 = vcombine.low %v1044_v41, %v1047_v11  ;;  %v1365_v19 = vsel %vm5472_vm2, %v1363_v18, %v1364_v42  ;;  %v8641_v18 = vld [vmem:[#allocation50_spill] sm:$0xff] }
 0x152   : > { %2380 = vrot.lane.b32.xlu0 %v8635_v1, %s5380_s21 }
 0x153   : > { %2394 = vrot.lane.b32.xlu1 %v8567_v26, %s5381_s22  ;;  %v8636_v26 = vld [vmem:[#allocation35_spill] sm:$0xff]  ;;  %v7350_v34 = vpop.permute.xlu1 %2154  ;;  %v1006_v7 = vsel %vm5530_vm8, %v1004_v39, %v1005_v60  ;;  %v8638_v39 = vld [vmem:[#allocation36_spill] sm:$0xff] }
 0x154   : > { %v3184_v24 = vsel %vm2471_vm10, %v3163_v15, %v8636_v26  ;;  %v7352_v27 = vpop.permute.xlu0 %2152  ;;  %v4776_v26 = vcombine.low %v1355_v21, %v1358_v54  ;;  %v4785_v15 = vcombine.low %v1438_v25, %v1441_v46  ;;  %v4729_v60 = vcombine.low %v1003_v57, %v1006_v7  ;;  %v8639_v25 = vld [vmem:[#allocation42_spill] sm:$0xff] }
 0x155   : > { %v3200_v56 = vsel %vm2488_vm11, %v3184_v24, %v8637_v35  ;;  %v7380_v24 = vld [vmem:[%s5470_s17 + $0x33c] sm:$0xf] }
 0x156   : > { %2128 = vrot.lane.b32.xlu0 %v4723_v29, %s8630_s16  ;;  %v3216_v54 = vsel %vm2505_vm12, %v3200_v56, %v6396_v44  ;;  %v1362_v44 = vsel %vm5472_vm2, %v4621_v62, %v1361_v12  ;;  %v4585_v29 = vrot.slane %v7301_v48, 9  ;;  %v1053_v55 = vrot.slane %v7380_v24, 5  ;;  %v8640_v62 = vld [vmem:[#allocation47_spill] sm:$0xff] }
 0x157   : > { %2160 = vrot.lane.b32.xlu1 %v4728_v23, %s5374_s24  ;;  %v1050_v23 = vrot.slane %v7325_v14, 5  ;;  %v7375_v45 = vpop.permute.xlu1 %1964  ;;  %v3232_v50 = vsel %vm8444_vm13, %v3216_v54, %v6490_v33  ;;  %v4777_v48 = vcombine.low %v1362_v44, %v1365_v19  ;;  %v3166_v4 = vsel %vm2446_vm9, %v4785_v15, %v8638_v39  ;;  %v8642_v15 = vld [vmem:[#allocation51_spill] sm:$0xff]  ;;  %v8644_v44 = vld [vmem:[#allocation53_spill] sm:$0xff] }
 0x158   : > { %v7377_v36 = vpop.permute.xlu0 %2186  ;;  %v3248_v33 = vsel %vm8439_vm14, %v3232_v50, %v6528_v17  ;;  %v4740_v19 = vcombine.low %v7277_v22, %v7310_v13 }
 0x159   : > { %v1052_v16 = vrot.slane %v1050_v23, 4  ;;  %v3264_v28 = vsel %vm8441_vm15, %v3248_v33, %v6562_v6  ;;  %v1051_v42 = vsel %vm5485_vm7, %v4585_v29, %v1050_v23  ;;  %v8645_v29 = vld [vmem:[#allocation59_spill] sm:$0xff] }
 0x15a   : > { %2396 = vrot.lane.b32.xlu0 %v8577_v53, %s5381_s22  ;;  %v3280_v12 = vsel %vm8437_vm0, %v3264_v28, %v6574_v52  ;;  %v3186_v52 = vsel %vm2471_vm10, %v3166_v4, %v8639_v25 }
 0x15b   : > { %2434 = vrot.lane.b32.xlu1 %v4776_v26, %s5382_s23  ;;  %v7395_v1 = vpop.permute.xlu1 %2220  ;;  %v3296_v17 = vsel %vm8438_vm1, %v3280_v12, %v6592_v3  ;;  %v1054_v6 = vsel %vm5485_vm7, %v1052_v16, %v1053_v55  ;;  %v500_v26 = vld [vmem:[%s5470_s17 + $0x11c] sm:$0xf]  ;;  %v3202_v3 = vsel %vm2488_vm11, %v3186_v52, %v6398_v61  ;;  %v502_v12 = vld [vmem:[%s5470_s17 + $0x124] sm:$0xf] }
 0x15c   : > { %v7397_v21 = vpop.permute.xlu0 %2188  ;;  %v3312_v46 = vsel %vm2607_vm3, %v3296_v17, %v6647_v51  ;;  %v3218_v11 = vsel %vm2505_vm12, %v3202_v3, %v6432_v59  ;;  %v4735_v51 = vcombine.low %v1051_v42, %v1054_v6  ;;  %v1122_v7 = vrot.slane %v500_v26, 7  ;;  %v501_v59 = vld [vmem:[%s5470_s17 + $0x120] sm:$0xf]  ;;  %v506_v42 = vld [vmem:[%s5470_s17 + $0x138] sm:$0xf] }
 0x15d   : > { %v3328_v41 = vsel %vm2624_vm4, %v3312_v46, %v6684_v38  ;;  %v3234_v57 = vsel %vm8444_vm13, %v3218_v11, %v8640_v62  ;;  %v499_v38 = vld [vmem:[%s5470_s17 + $0x118] sm:$0xf]  ;;  %v1125_v28 = vrot.slane %v501_v59, 7  ;;  %v8647_v6 = vld [vmem:[#allocation66_spill] sm:$0xff]  ;;  %v1190_v13 = vrot.slane %v502_v12, 5 }
 0x15e   : > { %2162 = vrot.lane.b32.xlu0 %v4729_v60, %s5374_s24  ;;  %v3250_v23 = vsel %vm8439_vm14, %v3234_v57, %v8641_v18  ;;  %v4592_v55 = vrot.slane %v499_v38, 11  ;;  %v1124_v33 = vrot.slane %v1122_v7, 4  ;;  %v503_v46 = vld [vmem:[%s5470_s17 + $0x128] sm:$0xf]  ;;  %v1129_v26 = vrot.slane %v506_v42, 7  ;;  %v8648_v57 = vld [vmem:[#allocation5_spill] sm:$0xff] }
 0x15f   : > { %2194 = vrot.lane.b32.xlu1 %v4734_v9, %s5375_s25  ;;  %v7417_v35 = vpop.permute.xlu1 %1998  ;;  %v3266_v50 = vsel %vm8441_vm15, %v3250_v23, %v8642_v15  ;;  %v8643_v9 = vld [vmem:[#allocation32_spill] sm:$0xff]  ;;  %v4741_v62 = vcombine.low %v7325_v14, %v7380_v24  ;;  %v4600_v23 = vrot.slane %v501_v59, 9  ;;  %v1192_v38 = vrot.slane %v1190_v13, 4  ;;  %v508_v14 = vld [vmem:[%s5470_s17 + $0x140] sm:$0xf] }
 0x160   : > { %v7419_v56 = vpop.permute.xlu0 %1966  ;;  %v3282_v60 = vsel %vm8437_vm0, %v3266_v50, %v8643_v9  ;;  %v1123_v25 = vsel %vm5472_vm2, %v4592_v55, %v1122_v7  ;;  %v1126_v52 = vsel %vm5472_vm2, %v1124_v33, %v1125_v28  ;;  %v505_v11 = vld [vmem:[%s5470_s17 + $0x134] sm:$0xf]  ;;  %v1193_v15 = vrot.slane %v503_v46, 5  ;;  %v504_v55 = vld [vmem:[%s5470_s17 + $0x12c] sm:$0xf] }
 0x161   : > { %v3298_v16 = vsel %vm8438_vm1, %v3282_v60, %v8645_v29  ;;  %v8649_v7 = vld [vmem:[#allocation52_spill] sm:$0xff]  ;;  %v4748_v18 = vcombine.low %v1123_v25, %v1126_v52  ;;  %v4593_v50 = vrot.slane %v505_v11, 11  ;;  %v1131_v9 = vrot.slane %v1129_v26, 4  ;;  %v509_v42 = vld [vmem:[%s5470_s17 + $0x144] sm:$0xf] }
 0x162   : > { %2436 = vrot.lane.b32.xlu0 %v4777_v48, %s5382_s23  ;;  %v8646_v48 = vld [vmem:[#allocation62_spill] sm:$0xff]  ;;  %v1191_v24 = vsel %vm5485_vm7, %v4600_v23, %v1190_v13  ;;  %v1194_v59 = vsel %vm5485_vm7, %v1192_v38, %v1193_v15  ;;  %v1240_v33 = vrot.slane %v503_v46, 7  ;;  %v1197_v28 = vrot.slane %v508_v14, 5 }
 0x163   : > { %3351 = vrot.lane.b32.xlu1 %v3328_v41, %s5383_s14  ;;  %v7434_v61 = vpop.permute.xlu1 %2260  ;;  %v3314_v39 = vsel %vm2607_vm3, %v3298_v16, %v8646_v48  ;;  %v1130_v29 = vsel %vm5472_vm2, %v4593_v50, %v1129_v26  ;;  %v4756_v13 = vcombine.low %v1191_v24, %v1194_v59  ;;  %v4606_v52 = vrot.slane %v502_v12, 11  ;;  %v510_v24 = vld [vmem:[%s5470_s17 + $0x148] sm:$0xf]  ;;  %v636_v59 = vld [vmem:[%s5470_s17 + $0x3bc] sm:$0xf] }
 0x164   : > { %v7436_v54 = vpop.permute.xlu0 %2222  ;;  %v3330_v22 = vsel %vm2624_vm4, %v3314_v39, %v8647_v6  ;;  %v8650_v6 = vld [vmem:[#allocation26_spill] sm:$0xff]  ;;  %v1243_v26 = vrot.slane %v504_v55, 7  ;;  %v1242_v11 = vrot.slane %v1240_v33, 4  ;;  %v1247_v50 = vrot.slane %v509_v42, 7 }
 0x165   : > { %v1241_v38 = vsel %vm5472_vm2, %v4606_v52, %v1240_v33  ;;  %v1250_v10 = vrot.slane %v510_v24, 7 }
 0x166   : > { %1972 = vrot.lane.b32.xlu0 %v8644_v44, %s5370_s20  ;;  %v1244_v12 = vsel %vm5472_vm2, %v1242_v11, %v1243_v26 }
 0x167   : > { %2196 = vrot.lane.b32.xlu1 %v4735_v51, %s5375_s25  ;;  %v7454_v4 = vpop.permute.xlu1 %2038  ;;  %v507_v51 = vld [vmem:[%s5470_s17 + $0x13c] sm:$0xf]  ;;  %v4762_v55 = vcombine.low %v1241_v38, %v1244_v12 }
 0x168   : > { %v7456_v17 = vpop.permute.xlu0 %2000  ;;  %v1132_v60 = vrot.slane %v507_v51, 7  ;;  %v4601_v46 = vrot.slane %v507_v51, 9 }
 0x16a   : > { %2228 = vrot.lane.b32.xlu0 %v4740_v19, %s5376_s26  ;;  %v1133_v16 = vsel %vm5472_vm2, %v1131_v9, %v1132_v60  ;;  %v1198_v51 = vsel %vm5485_vm7, %v4601_v46, %v1197_v28  ;;  %v5302_v46 = vld [vmem:[%s5470_s17 + $0x3c0] sm:$0xf] }
 0x16b   : > { %3353 = vrot.lane.b32.xlu1 %v3330_v22, %s5383_s14  ;;  %v7468_v3 = vpop.permute.xlu1 %2294  ;;  %v8651_v22 = vld [vmem:[#allocation4_spill] sm:$0xff]  ;;  %v4749_v25 = vcombine.low %v1130_v29, %v1133_v16  ;;  %v8653_v29 = vld [vmem:[#allocation58_spill] sm:$0xff]  ;;  %v8654_v16 = vld [vmem:[#allocation23_spill] sm:$0xff] }
 0x16c   : > { %v7470_v41 = vpop.permute.xlu0 %2262 }
 0x16e   : > { %1974 = vrot.lane.b32.xlu0 %v8649_v7, %s5370_s20  ;;  %v1200_v7 = vrot.slane %v509_v42, 5  ;;  %s8652_s20 = smov 44   ;;  %v635_v42 = vld [vmem:[%s5470_s17 + $0x3b8] sm:$0xf] }
 0x16f   : > { %2006 = vrot.lane.b32.xlu1 %v8648_v57, %s5369_s19  ;;  %v7480_v44 = vpop.permute.xlu1 %2072  ;;  %v4630_v26 = vrot.slane %v635_v42, 11 }
 0x170   : > { %v7482_v19 = vpop.permute.xlu0 %2040 }
 0x172   : > { %2230 = vrot.lane.b32.xlu0 %v4741_v62, %s5376_s26  ;;  %v1199_v62 = vrot.slane %v1197_v28, 4  ;;  %v4607_v28 = vrot.slane %v508_v14, 11 }
 0x173   : > { %2268 = vrot.lane.b32.xlu1 %v4748_v18, %s5377_s12  ;;  %v7496_v48 = vpop.permute.xlu1 %2334 }
 0x174   : > { %v7498_v39 = vpop.permute.xlu0 %2296  ;;  %v1201_v15 = vsel %vm5485_vm7, %v1199_v62, %v1200_v7  ;;  %v1248_v11 = vsel %vm5472_vm2, %v4607_v28, %v1247_v50  ;;  %v1447_v62 = vrot.slane %v5302_v46, 7  ;;  %vm8440_vm7 = vcmask 457728  }
 0x175   : > { %v4757_v33 = vcombine.low %v1198_v51, %v1201_v15  ;;  %v7546_v51 = vld [vmem:[%s5470_s17 + $0x3d8] sm:$0xf]  ;;  %v5303_v15 = vld [vmem:[%s5470_s17 + $0x350] sm:$0xf] }
 0x176   : > { %2008 = vrot.lane.b32.xlu0 %v8651_v22, %s5369_s19  ;;  %s8655_s19 = smov 48   ;;  %v1009_v24 = vrot.slane %v5303_v15, 6 }
 0x177   : > { %2046 = vrot.lane.b32.xlu1 %v8650_v6, %s5368_s18  ;;  %v7505_v18 = vpop.permute.xlu1 %2088  ;;  %v1249_v6 = vrot.slane %v1247_v50, 4  ;;  %v2449_v50 = vsel %vm2446_vm9, %v8648_v57, %v7237_v30  ;;  %v7567_v30 = vld [vmem:[%s5470_s17 + $0x3d4] sm:$0xf] }
 0x178   : > { %v7507_v23 = vpop.permute.xlu0 %2074  ;;  %v4631_v57 = vrot.slane %v7567_v30, 11 }
 0x179   : > { %v1251_v14 = vsel %vm5472_vm2, %v1249_v6, %v1250_v10 }
 0x17a   : > { %2270 = vrot.lane.b32.xlu0 %v4749_v25, %s5377_s12 }
 0x17b   : > { %2302 = vrot.lane.b32.xlu1 %v4756_v13, %s8652_s20  ;;  %v1444_v13 = vrot.slane %v636_v59, 7  ;;  %v8656_v59 = vld [vmem:[#allocation38_spill] sm:$0xff] }
 0x17c   : > { %v7521_v60 = vpop.permute.xlu0 %2336 }
 0x17d   : > { %v7519_v9 = vpop.permute.xlu1 %2374  ;;  %v1446_v7 = vrot.slane %v1444_v13, 4 }
 0x17e   : > { %2048 = vrot.lane.b32.xlu0 %v8654_v16, %s5368_s18  ;;  %v4763_v16 = vcombine.low %v1248_v11, %v1251_v14  ;;  %v1011_v11 = vrot.slane %v1009_v24, 4  ;;  %v7580_v14 = vld [vmem:[%s5470_s17 + $0x354] sm:$0xf] }
 0x17f   : > { %2080 = vrot.lane.b32.xlu1 %v8653_v29, %s8626_s15  ;;  %v8657_v29 = vld [vmem:[#allocation57_spill] sm:$0xff]  ;;  %v7564_v28 = vsel %vm5472_vm2, %v1446_v7, %v1447_v62  ;;  %v1012_v46 = vrot.slane %v7580_v14, 6  ;;  %v1368_v62 = vrot.slane %v7290_v20, 7 }
 0x180   : > { %v7532_v52 = vpop.permute.xlu0 %2090  ;;  %v5306_v7 = vld [vmem:[%s5470_s17 + $0x3dc] sm:$0xf] }
 0x181   : > { %v7530_v25 = vpop.permute.xlu1 %2122  ;;  %v1454_v15 = vrot.slane %v5306_v7, 7  ;;  %v8661_v7 = vrot.slane %v7546_v51, 7  ;;  %v1370_v30 = vrot.slane %v1368_v62, 4 }
 0x182   : > { %2304 = vrot.lane.b32.xlu0 %v4757_v33, %s8652_s20  ;;  %v2473_v33 = vsel %vm2471_vm10, %v2449_v50, %v7250_v37  ;;  %v8658_v50 = vld [vmem:[#allocation75_spill] sm:$0xff] }
 0x183   : > { %2342 = vrot.lane.b32.xlu1 %v4762_v55, %s8655_s19  ;;  %v7558_v55 = vsel %vm5472_vm2, %v4630_v26, %v1444_v13  ;;  %v2490_v6 = vsel %vm2488_vm11, %v2473_v33, %v7261_v47  ;;  %v5304_v13 = vld [vmem:[%s5470_s17 + $0x34c] sm:$0xf] }
 0x184   : > { %v7543_v12 = vpop.permute.xlu0 %2376  ;;  %v4580_v26 = vrot.slane %v5304_v13, 10  ;;  %v2507_v37 = vsel %vm2505_vm12, %v2490_v6, %v7273_v5  ;;  %v5307_v5 = vld [vmem:[%s5470_s17 + $0x27c] sm:$0xf]  ;;  %v4786_v13 = vcombine.low %v7558_v55, %v7564_v28  ;;  %v4622_v28 = vrot.slane %v7165_v32, 11 }
 0x185   : > { %v7541_v38 = vpop.permute.xlu1 %2390  ;;  %v2524_v47 = vsel %vm8444_vm13, %v2507_v37, %v7298_v49  ;;  %v1371_v6 = vrot.slane %v5307_v5, 7  ;;  %v1453_v49 = vrot.slane %v8661_v7, 4 }
 0x186   : > { %2082 = vrot.lane.b32.xlu0 %v8657_v29, %s8626_s15  ;;  %v8659_v29 = vld [vmem:[#allocation78_spill] sm:$0xff]  ;;  %v2541_v20 = vsel %vm8439_vm14, %v2524_v47, %v7322_v40  ;;  %v1013_v40 = vsel %vm5530_vm8, %v1011_v11, %v1012_v46 }
 0x187   : > { %2096 = vrot.lane.b32.xlu1 %v8656_v59, %s8627_s13  ;;  %v8660_v33 = vcombine.low %v8658_v50, %v8659_v29  ;;  %v2558_v37 = vsel %vm8441_vm15, %v2541_v20, %v7352_v27  ;;  %v1010_v29 = vsel %vm5530_vm8, %v4580_v26, %v1009_v24  ;;  %v2452_v27 = vsel %vm2446_vm9, %v8651_v22, %v7235_v31  ;;  %v8663_v24 = vld [vmem:[#allocation37_spill] sm:$0xff] }
 0x188   : > { %v7574_v42 = vpop.permute.xlu0 %2124  ;;  %v2575_v55 = vsel %vm8437_vm0, %v2558_v37, %v7377_v36  ;;  %v5308_v36 = vld [vmem:[%s5470_s17 + $0x36c] sm:$0xf]  ;;  %v2475_v32 = vsel %vm2471_vm10, %v2452_v27, %v7248_v43  ;;  %vm2692_vm0 = vcmask 490496   ;;  %v4730_v5 = vcombine.low %v1010_v29, %v1013_v40  ;;  %v8664_v37 = vld [vmem:[#allocation9_spill] sm:$0xff]  ;;  %v8666_v29 = vld [vmem:[#allocation6_spill] sm:$0xff] }
 0x189   : > { %v7572_v10 = vpop.permute.xlu1 %2156  ;;  %v2592_v47 = vsel %vm8438_vm1, %v2575_v55, %v7395_v1  ;;  %v1016_v26 = vrot.slane %v5308_v36, 6  ;;  %v2492_v31 = vsel %vm2488_vm11, %v2475_v32, %v7259_v2  ;;  %vm8443_vm1 = vcmask 523264   ;;  %v8669_v27 = vld [vmem:[#allocation29_spill] sm:$0xff] }
 0x18a   : > { %2344 = vrot.lane.b32.xlu0 %v4763_v16, %s8655_s19  ;;  %v2609_v11 = vsel %vm2607_vm3, %v2592_v47, %v7434_v61  ;;  %v2509_v43 = vsel %vm2505_vm12, %v2492_v31, %v7271_v63  ;;  %v1369_v20 = vsel %vm5472_vm2, %v4622_v28, %v1368_v62  ;;  %v1372_v2 = vsel %vm5472_vm2, %v1370_v30, %v1371_v6  ;;  %v8665_v63 = vld [vmem:[#allocation13_spill] sm:$0xff]  ;;  %v8668_v28 = vld [vmem:[#allocation90_spill] sm:$0xff]  ;;  %v7657_v30 = vld [vmem:[%s5470_s17 + $0x370] sm:$0xf] }
 0x18b   : > { %2382 = vrot.lane.b32.xlu1 %v8660_v33, %s5380_s21  ;;  %v8662_v33 = vld [vmem:[#allocation31_spill] sm:$0xff]  ;;  %v2626_v1 = vsel %vm2624_vm4, %v2609_v11, %v7468_v3  ;;  %v2526_v3 = vsel %vm8444_vm13, %v2509_v43, %v7296_v8  ;;  %v8667_v55 = vcombine.low %v8665_v63, %v8666_v29  ;;  %v1018_v62 = vrot.slane %v1016_v26, 4 }
 0x18c   : > { %v7602_v16 = vpop.permute.xlu0 %2392  ;;  %v2643_v61 = vsel %vm2641_vm5, %v2626_v1, %v7496_v48  ;;  %v5309_v48 = vld [vmem:[%s5470_s17 + $0x368] sm:$0xf]  ;;  %v2543_v6 = vsel %vm8439_vm14, %v2526_v3, %v8668_v28  ;;  %v1375_v47 = vrot.slane %v8669_v27, 7  ;;  %vm8442_vm14 = vcmask 916480  }
 0x18d   : > { %v2431_v50 = vpop.permute.xlu1 %2430  ;;  %v2660_v7 = vsel %vm2658_vm6, %v2643_v61, %v7519_v9  ;;  %v4581_v40 = vrot.slane %v5309_v48, 10  ;;  %v1019_v9 = vrot.slane %v7657_v30, 6  ;;  %v2560_v32 = vsel %vm8441_vm15, %v2543_v6, %v7350_v34 }
 0x18e   : > { %2098 = vrot.lane.b32.xlu0 %v8663_v24, %s8627_s13  ;;  %v2677_v8 = vsel %vm8440_vm7, %v2660_v7, %v7541_v38  ;;  %v8671_v38 = vld [vmem:[#allocation54_spill] sm:$0xff]  ;;  %v1455_v61 = vsel %vm5472_vm2, %v1453_v49, %v1454_v15  ;;  %vm8672_vm7 = vcmask 261120   ;;  %vm8673_vm15 = vcmask 293888   ;;  %v8675_v49 = vld [vmem:[#allocation89_spill] sm:$0xff]  ;;  %s4533_s13 = sshll.u32 %s5350_s27, 4 }
 0x18f   : > { %2130 = vrot.lane.b32.xlu1 %v8662_v33, %s8630_s16  ;;  %v8670_v33 = vrot.slane %v7546_v51, 7  ;;  %v2694_v11 = vsel %vm2692_vm0, %v2677_v8, %v2431_v50  ;;  %v3169_v43 = vsel %vm2446_vm9, %v4786_v13, %v8671_v38  ;;  %v2577_v51 = vsel %vm8672_vm7, %v2560_v32, %v7397_v21  ;;  %v8674_v50 = vld [vmem:[#allocation28_spill] sm:$0xff]  ;;  %p386_p6 = scmp.lt.s32.totalorder %s4533_s13, 31 }
 0x190   : > { %v7631_v46 = vpop.permute.xlu0 %2158  ;;  %v2594_v34 = vsel %vm8673_vm15, %v2577_v51, %v7436_v54  ;;  %v4778_v63 = vcombine.low %v1369_v20, %v1372_v2  ;;  %v1017_v13 = vsel %vm5530_vm8, %v4581_v40, %v1016_v26  ;;  %v1020_v21 = vsel %vm5530_vm8, %v1018_v62, %v1019_v9  ;;  %v8678_v62 = vld [vmem:[#allocation63_spill] sm:$0xff]  ;;  %v8680_v9 = vld [vmem:[#allocation68_spill] sm:$0xff] }
 0x191   : > { %v7629_v22 = vpop.permute.xlu1 %2190  ;;  %v1452_v36 = vsel %vm5472_vm2, %v4631_v57, %v8670_v33  ;;  %v5311_v57 = vld [vmem:[%s5470_s17 + $0x298] sm:$0xf]  ;;  %v2611_v15 = vsel %vm2607_vm3, %v2594_v34, %v7470_v41  ;;  %v4623_v29 = vrot.slane %v8675_v49, 11  ;;  %v1377_v54 = vrot.slane %v1375_v47, 4  ;;  %v8677_v41 = vld [vmem:[#allocation60_spill] sm:$0xff]  ;;  %s8812_s13 = smov (!%p386_p6, %s4533_s13), 31 }
 0x192   : > { %2384 = vrot.lane.b32.xlu0 %v8667_v55, %s5380_s21  ;;  %v1378_v7 = vrot.slane %v5311_v57, 7  ;;  %v8676_v55 = vld [vmem:[#allocation55_spill] sm:$0xff]  ;;  %v2628_v20 = vsel %vm2624_vm4, %v2611_v15, %v7498_v39  ;;  %v4787_v48 = vcombine.low %v1452_v36, %v1455_v61  ;;  %v8679_v39 = vld [vmem:[#allocation8_spill] sm:$0xff]  ;;  %v4731_v8 = vcombine.low %v1017_v13, %v1020_v21 }
 0x193   : > { %2398 = vrot.lane.b32.xlu1 %v8664_v37, %s5381_s22  ;;  %v2645_v58 = vsel %vm2641_vm5, %v2628_v20, %v7521_v60  ;;  %vm8681_vm8 = vcmask 457728   ;;  %v1376_v60 = vsel %vm5472_vm2, %v4623_v29, %v1375_v47  ;;  %vm8683_vm15 = vcmask 195584   ;;  %v5313_v15 = vld [vmem:[%s5470_s17 + $0x154] sm:$0xf]  ;;  %v8694_v20 = vld [vmem:[#allocation65_spill] sm:$0xff] }
 0x194   : > { %v2433_v1 = vpop.permute.xlu0 %2432  ;;  %v2662_v6 = vsel %vm2658_vm6, %v2645_v58, %v7543_v12  ;;  %v1379_v36 = vsel %vm5472_vm2, %v1377_v54, %v1378_v7  ;;  %v8682_v12 = vld [vmem:[#allocation70_spill] sm:$0xff]  ;;  %vm8686_vm7 = vcmask 228352   ;;  %v8687_v7 = vld [vmem:[#allocation61_spill] sm:$0xff]  ;;  %v1136_v21 = vrot.slane %v5313_v15, 7  ;;  %v8691_v49 = vld [vmem:[#allocation64_spill] sm:$0xff] }
 0x195   : > { %v3348_v31 = vpop.permute.xlu1 %3347  ;;  %v2679_v33 = vsel %vm8681_vm8, %v2662_v6, %v7602_v16  ;;  %v8685_v16 = vld [vmem:[#allocation71_spill] sm:$0xff]  ;;  %vm8689_vm8 = vcmask 261120   ;;  %v4779_v13 = vcombine.low %v1376_v60, %v1379_v36  ;;  %v5314_v36 = vld [vmem:[%s5470_s17 + $0x358] sm:$0xf] }
 0x196   : > { %v3365_v3 = vsel %vm8443_vm1, %v2694_v11, %v3348_v31  ;;  %2132 = vrot.lane.b32.xlu0 %v8674_v50, %s8630_s16  ;;  %v2696_v11 = vsel %vm2692_vm0, %v2679_v33, %v2433_v1  ;;  %v8688_v50 = vld [vmem:[#allocation73_spill] sm:$0xff]  ;;  %v8692_v54 = vld [vmem:[#allocation27_spill] sm:$0xff]  ;;  %s4534_s16 = sshll.u32 %s8810_s28, 5 }
 0x197   : > { %2164 = vrot.lane.b32.xlu1 %v4730_v5, %s5374_s24  ;;  %4992 = vmatprep.mubr.msk.bf16.mxu0 %vm8442_vm14, %v3365_v3  ;;  %v3188_v5 = vsel %vm2471_vm10, %v3169_v43, %v8676_v55  ;;  %v8684_v43 = vld [vmem:[#allocation56_spill] sm:$0xff]  ;;  %v8696_v6 = vld [vmem:[#allocation67_spill] sm:$0xff]  ;;  %v8698_v33 = vld [vmem:[#allocation69_spill] sm:$0xff] }
 0x198   : > { %v7695_v26 = vpop.permute.xlu0 %1968  ;;  %v3204_v40 = vsel %vm2488_vm11, %v3188_v5, %v8677_v41  ;;  %v3172_v61 = vsel %vm2446_vm9, %v4787_v48, %v8684_v43  ;;  %v5312_v3 = vld [vmem:[%s5470_s17 + $0x170] sm:$0xf]  ;;  %v517_v5 = vld [vmem:[%s5470_s17 + $0x16c] sm:$0xf] }
 0x199   : > { %v7693_v2 = vpop.permute.xlu1 %2192  ;;  %v3220_v28 = vsel %vm2505_vm12, %v3204_v40, %v8678_v62  ;;  %v1143_v57 = vrot.slane %v5312_v3, 7  ;;  %v3190_v34 = vsel %vm2471_vm10, %v3172_v61, %v8687_v7  ;;  %v8695_v41 = vld [vmem:[#allocation79_spill] sm:$0xff]  ;;  %v8700_v3 = vld [vmem:[#allocation22_spill] sm:$0xff] }
 0x19a   : > { %2400 = vrot.lane.b32.xlu0 %v8679_v39, %s5381_s22  ;;  %v3236_v27 = vsel %vm8444_vm13, %v3220_v28, %v8680_v9  ;;  %v3206_v29 = vsel %vm2488_vm11, %v3190_v34, %v8691_v49  ;;  %v511_v28 = vld [vmem:[%s5470_s17 + $0x150] sm:$0xf]  ;;  %v8697_v9 = vld [vmem:[#allocation15_spill] sm:$0xff]  ;;  %v5317_v49 = vld [vmem:[%s5470_s17 + $0x374] sm:$0xf] }
 0x19b   : > { %2438 = vrot.lane.b32.xlu1 %v4778_v63, %s5382_s23  ;;  %v3252_v32 = vsel %vm8683_vm15, %v3236_v27, %v8682_v12  ;;  %v8690_v63 = vld [vmem:[#allocation2_spill] sm:$0xff]  ;;  %vm8693_vm15 = vcmask 293888   ;;  %v3222_v48 = vsel %vm2505_vm12, %v3206_v29, %v8694_v20  ;;  %v4742_v12 = vcombine.low %v7580_v14, %v5314_v36  ;;  %v8706_v15 = vld [vmem:[#allocation3_spill] sm:$0xff] }
 0x19c   : > { %v7719_v38 = vpop.permute.xlu0 %2224  ;;  %v3268_v51 = vsel %vm8686_vm7, %v3252_v32, %v8685_v16  ;;  %vm8699_vm7 = vcmask 195584   ;;  %v4595_v32 = vrot.slane %v517_v5, 11  ;;  %v4594_v61 = vrot.slane %v511_v28, 11 }
 0x19d   : > { %v3350_v31 = vpop.permute.xlu1 %3349  ;;  %v3284_v1 = vsel %vm8689_vm8, %v3268_v51, %v8688_v50  ;;  %v1138_v16 = vrot.slane %v1136_v21, 4  ;;  %v5316_v51 = vld [vmem:[%s5470_s17 + $0x158] sm:$0xf]  ;;  %vm8701_vm8 = vcmask 228352   ;;  %v4743_v29 = vcombine.low %v7657_v30, %v5317_v49  ;;  %v8709_v49 = vld [vmem:[#allocation48_spill] sm:$0xff] }
 0x19e   : > { %v3367_v47 = vsel %vm8443_vm1, %v2696_v11, %v3350_v31  ;;  %2166 = vrot.lane.b32.xlu0 %v4731_v8, %s5374_s24  ;;  %v3300_v55 = vsel %vm8693_vm15, %v3284_v1, %v8692_v54  ;;  %v3238_v8 = vsel %vm8444_vm13, %v3222_v48, %v8696_v6  ;;  %v1145_v11 = vrot.slane %v1143_v57, 4  ;;  %v5315_v31 = vld [vmem:[%s5470_s17 + $0x174] sm:$0xf]  ;;  %v8702_v1 = vld [vmem:[#allocation74_spill] sm:$0xff]  ;;  %v8707_v6 = vld [vmem:[#allocation11_spill] sm:$0xff] }
 0x19f   : > { %2198 = vrot.lane.b32.xlu1 %v8690_v63, %s5375_s25  ;;  %4993 = vmatmul.mubr.msk.bf16.vlgmr.msra.gmra.mxu0 %vm8442_vm14, %v3367_v47  ;;  %v3316_v40 = vsel %vm2607_vm3, %v3300_v55, %v8695_v41  ;;  %v3254_v60 = vsel %vm8699_vm7, %v3238_v8, %v8698_v33  ;;  %v1146_v43 = vrot.slane %v5315_v31, 7  ;;  %v1139_v47 = vrot.slane %v5316_v51, 7  ;;  %v8704_v63 = vld [vmem:[#allocation80_spill] sm:$0xff]  ;;  %v5318_v55 = vld [vmem:[%s5470_s17 + $0x17c] sm:$0xf]  ;;  %v8708_v33 = vld [vmem:[#allocation10_spill] sm:$0xff] }
 0x1a0   : > { %v7747_v62 = vpop.permute.xlu0 %1970  ;;  %v3332_v27 = vsel %vm2624_vm4, %v3316_v40, %v8697_v9  ;;  %v3270_v7 = vsel %vm8701_vm8, %v3254_v60, %v8700_v3  ;;  %vm8703_vm15 = vcmask 261120   ;;  %vm8705_vm7 = vcmask 293888   ;;  %v5319_v40 = vld [vmem:[%s5470_s17 + $0x160] sm:$0xf] }
 0x1a1   : > { %v7745_v58 = vpop.permute.xlu1 %2002  ;;  %v3286_v14 = vsel %vm8703_vm15, %v3270_v7, %v8702_v1  ;;  %v1144_v54 = vsel %vm5472_vm2, %v4595_v32, %v1143_v57  ;;  %v1261_v5 = vrot.slane %v5318_v55, 7  ;;  %v1147_v20 = vsel %vm5472_vm2, %v1145_v11, %v1146_v43  ;;  %v522_v9 = vld [vmem:[%s5470_s17 + $0x180] sm:$0xf]  ;;  %v5321_v43 = vld [vmem:[%s5470_s17 + $0x15c] sm:$0xf] }
 0x1a2   : > { %2440 = vrot.lane.b32.xlu0 %v4779_v13, %s5382_s23  ;;  %v3302_v13 = vsel %vm8705_vm7, %v3286_v14, %v8704_v63  ;;  %v1137_v48 = vsel %vm5472_vm2, %v4594_v61, %v1136_v21  ;;  %v1140_v41 = vsel %vm5472_vm2, %v1138_v16, %v1139_v47  ;;  %v1254_v28 = vrot.slane %v5319_v40, 7 }
 0x1a3   : > { %3355 = vrot.lane.b32.xlu1 %v3332_v27, %s5383_s14  ;;  %v3318_v30 = vsel %vm2607_vm3, %v3302_v13, %v8707_v6  ;;  %v516_v27 = vld [vmem:[%s5470_s17 + $0x164] sm:$0xf]  ;;  %v4751_v21 = vcombine.low %v1144_v54, %v1147_v20  ;;  %v4750_v36 = vcombine.low %v1137_v48, %v1140_v41  ;;  %v1263_v11 = vrot.slane %v1261_v5, 4  ;;  %v5323_v48 = vld [vmem:[%s5470_s17 + $0x2b0] sm:$0xf] }
 0x1a4   : > { %v7766_v50 = vpop.permute.xlu0 %2226  ;;  %v3334_v60 = vsel %vm2624_vm4, %v3318_v30, %v8708_v33  ;;  %v1264_v31 = vrot.slane %v522_v9, 7  ;;  %v4608_v61 = vrot.slane %v5321_v43, 11  ;;  %v1256_v16 = vrot.slane %v1254_v28, 4  ;;  %v5324_v6 = vld [vmem:[%s5470_s17 + $0x2d0] sm:$0xf] }
 0x1a5   : > { %v7764_v34 = vpop.permute.xlu1 %2264  ;;  %v1257_v51 = vrot.slane %v516_v27, 7  ;;  %v1382_v41 = vrot.slane %v5323_v48, 7  ;;  %v1392_v30 = vrot.slane %v5324_v6, 7  ;;  %v5325_v9 = vld [vmem:[%s5470_s17 + $0x2c8] sm:$0xf]  ;;  %v8713_v43 = vld [vmem:[#allocation44_spill] sm:$0xff] }
 0x1a6   : > { %2200 = vrot.lane.b32.xlu0 %v8706_v15, %s5375_s25  ;;  %v1265_v1 = vsel %vm5472_vm2, %v1263_v11, %v1264_v31  ;;  %v1255_v14 = vsel %vm5472_vm2, %v4608_v61, %v1254_v28  ;;  %v4625_v27 = vrot.slane %v5325_v9, 11  ;;  %v8711_v11 = vld [vmem:[#allocation72_spill] sm:$0xff]  ;;  %v8712_v31 = vld [vmem:[#allocation43_spill] sm:$0xff]  ;;  %v8721_v48 = vld [vmem:[#allocation86_spill] sm:$0xff]  ;;  %vm8738_vm15 = vcmask 228352  }
 0x1a7   : > { %2232 = vrot.lane.b32.xlu1 %v4742_v12, %s5376_s26  ;;  %v5320_v12 = vld [vmem:[%s5470_s17 + $0x178] sm:$0xf]  ;;  %v1258_v63 = vsel %vm5472_vm2, %v1256_v16, %v1257_v51  ;;  %v8714_v61 = vcombine.low %v8712_v31, %v8713_v43  ;;  %v8723_v9 = vld [vmem:[#allocation87_spill] sm:$0xff]  ;;  %v8726_v43 = vld [vmem:[#allocation12_spill] sm:$0xff]  ;;  %vm8746_vm1 = vcmask 293888  }
 0x1a8   : > { %v7791_v57 = vpop.permute.xlu0 %2004  ;;  %v4609_v32 = vrot.slane %v5320_v12, 11  ;;  %v4764_v55 = vcombine.low %v1255_v14, %v1258_v63  ;;  %v8716_v63 = vld [vmem:[#allocation77_spill] sm:$0xff]  ;;  %vm8740_vm7 = vmmov %vm8738_vm15 }
 0x1a9   : > { %v7789_v8 = vpop.permute.xlu1 %2042  ;;  %v3175_v16 = vsel %vm2446_vm9, %v8714_v61, %v8711_v11 }
 0x1aa   : > { %3357 = vrot.lane.b32.xlu0 %v3334_v60, %s5383_s14  ;;  %v1262_v7 = vsel %vm5472_vm2, %v4609_v32, %v1261_v5  ;;  %v5322_v5 = vld [vmem:[%s5470_s17 + $0x2cc] sm:$0xf]  ;;  %v5326_v60 = vld [vmem:[%s5470_s17 + $0x2b4] sm:$0xf]  ;;  %v1384_v32 = vrot.slane %v1382_v41, 4 }
 0x1ab   : > { %2234 = vrot.lane.b32.xlu1 %v4743_v29, %s5376_s26  ;;  %v8710_v29 = vld [vmem:[#allocation49_spill] sm:$0xff]  ;;  %v4765_v54 = vcombine.low %v1262_v7, %v1265_v1  ;;  %v1389_v20 = vrot.slane %v5322_v5, 7  ;;  %v8715_v1 = vld [vmem:[#allocation76_spill] sm:$0xff] }
 0x1ac   : > { %v7803_v3 = vpop.permute.xlu0 %2266  ;;  %v3192_v14 = vsel %vm2471_vm10, %v3175_v16, %v8715_v1  ;;  %v8720_v5 = vld [vmem:[#allocation85_spill] sm:$0xff] }
 0x1ad   : > { %v7801_v47 = vpop.permute.xlu1 %2298  ;;  %v1391_v33 = vrot.slane %v1389_v20, 4  ;;  %v8722_v6 = vcombine.low %v8720_v5, %v8721_v48  ;;  %v1390_v11 = vsel %vm5472_vm2, %v4625_v27, %v1389_v20  ;;  %v3208_v61 = vsel %vm2488_vm11, %v3192_v14, %v8726_v43  ;;  %v8727_v16 = vld [vmem:[#allocation81_spill] sm:$0xff]  ;;  %v8728_v20 = vld [vmem:[#allocation14_spill] sm:$0xff] }
 0x1ae   : > { %2272 = vrot.lane.b32.xlu0 %v4750_v36, %s5377_s12  ;;  %v5327_v36 = vld [vmem:[%s5470_s17 + $0x2ac] sm:$0xf]  ;;  %v3224_v27 = vsel %vm2505_vm12, %v3208_v61, %v8728_v20  ;;  %v2461_v14 = vsel %vm2446_vm9, %v8664_v37, %v7695_v26 }
 0x1af   : > { %2274 = vrot.lane.b32.xlu1 %v4751_v21, %s5377_s12  ;;  %v1385_v21 = vrot.slane %v5326_v60, 7  ;;  %v4624_v12 = vrot.slane %v5327_v36, 11  ;;  %v8724_v60 = vld [vmem:[#allocation88_spill] sm:$0xff]  ;;  %v1393_v31 = vsel %vm5472_vm2, %v1391_v33, %v1392_v30  ;;  %v8729_v30 = vld [vmem:[#allocation17_spill] sm:$0xff] }
 0x1b0   : > { %v2045_v15 = vpop.permute.xlu0 %2044  ;;  %v8725_v36 = vcombine.low %v8723_v9, %v8724_v60  ;;  %v4781_v5 = vcombine.low %v1390_v11, %v1393_v31  ;;  %v8732_v9 = vld [vmem:[#allocation16_spill] sm:$0xff]  ;;  %v8733_v60 = vld [vmem:[#allocation25_spill] sm:$0xff] }
 0x1b1   : > { %v2077_v13 = vpop.permute.xlu1 %2076 }
 0x1b2   : > { %2306 = vrot.lane.b32.xlu0 %v8710_v29, %s8652_s20  ;;  %v8718_v29 = vld [vmem:[#allocation46_spill] sm:$0xff] }
 0x1b3   : > { %2308 = vrot.lane.b32.xlu1 %v8709_v49, %s8652_s20  ;;  %v8717_v49 = vld [vmem:[#allocation45_spill] sm:$0xff]  ;;  %s395_s20 = scalar_lea.vmem %s8369_s5, %s8810_s28 }
 0x1b4   : > { %v7823_v28 = vpop.permute.xlu0 %2300 }
 0x1b5   : > { %v7821_v40 = vpop.permute.xlu1 %2338 }
 0x1b6   : > { %2346 = vrot.lane.b32.xlu0 %v4764_v55, %s8655_s19 }
 0x1b7   : > { %2348 = vrot.lane.b32.xlu1 %v4765_v54, %s8655_s19  ;;  %v8719_v54 = vcombine.low %v8717_v49, %v8718_v29  ;;  %v1386_v49 = vsel %vm5472_vm2, %v1384_v32, %v1385_v21  ;;  %v5182_v29 = vld [vmem:[%s8367_s3 + $0x38] sm:$0xff]   ;;  %v8730_v21 = vld [vmem:[#allocation19_spill] sm:$0xff]  ;;  %v2481_v32 = vsel %vm2471_vm10, %v2461_v14, %v7745_v58  ;;  %s8098_s19 = sadd.s32 %s4534_s16, %s8812_s13  ;;  %s5384_s13 = smov 1  }
 0x1b8   : > { %v2079_v7 = vpop.permute.xlu0 %2078  ;;  %5008 = vmatprep.subr.bf16.mxu1 %v5182_v29  ;;  %v2498_v37 = vsel %vm2488_vm11, %v2481_v32, %v7789_v8  ;;  %v8731_v58 = vld [vmem:[#allocation21_spill] sm:$0xff]  ;;  %v8749_v32 = vld [vmem:[#allocation40_spill] sm:$0xff]  ;;  %s4538_s17 = sshll.u32 %s8098_s19, 2  ;;  %s8165_s28 = sshll.u32 %s8098_s19, 3 }
 0x1b9   : > { %v2093_v51 = vpop.permute.xlu1 %2092  ;;  %v3178_v55 = vsel %vm2446_vm9, %v8719_v54, %v8716_v63  ;;  %v1383_v63 = vsel %vm5472_vm2, %v4624_v12, %v1382_v41  ;;  %5009 = vmatpush3.bf16.msra.mxu1 %v5182_v29  ;;  %vm8734_vm2 = vcmask 195584   ;;  %s8171_s25 = scalar_lea.vmem %s8365_s1, %s8165_s28  ;;  %s5385_s16 = smov 127  }
 0x1ba   : > { %2386 = vrot.lane.b32.xlu0 %v8725_v36, %s5380_s21  ;;  %v3194_v1 = vsel %vm2471_vm10, %v3178_v55, %v8727_v16  ;;  %v2464_v55 = vsel %vm2446_vm9, %v8679_v39, %v7747_v62  ;;  %v4780_v48 = vcombine.low %v1383_v63, %v1386_v49  ;;  %v3240_v39 = vsel %vm8444_vm13, %v3224_v27, %v8732_v9  ;;  %v8735_v36 = vld [vmem:[#allocation18_spill] sm:$0xff]  ;;  %vm8736_vm8 = vmmov %vm8734_vm2  ;;  %v8739_v63 = vld [vmem:[#allocation33_spill] sm:$0xff] }
 0x1bb   : > { %2388 = vrot.lane.b32.xlu1 %v8722_v6, %s5380_s21  ;;  %v3210_v33 = vsel %vm2488_vm11, %v3194_v1, %v8729_v30  ;;  %v2483_v26 = vsel %vm2471_vm10, %v2464_v55, %v7791_v57  ;;  %v2515_v62 = vsel %vm2505_vm12, %v2498_v37, %v2077_v13  ;;  %v3256_v11 = vsel %vm8736_vm8, %v3240_v39, %v8735_v36  ;;  %v5184_v13 = vld [vmem:[%s8367_s3 + $0x28] sm:$0xff]   ;;  %v8737_v1 = vld [vmem:[#allocation30_spill] sm:$0xff]  ;;  %v8752_v39 = vld [vmem:[#allocation84_spill] sm:$0xff]  ;;  %s8108_s21 = scalar_lea.vmem %s8370_s6, %s4538_s17 }
 0x1bc   : > { %v7875_v41 = vpop.permute.xlu0 %2340  ;;  %v3226_v12 = vsel %vm2505_vm12, %v3210_v33, %v8730_v21  ;;  %v2500_v8 = vsel %vm2488_vm11, %v2483_v26, %v2045_v15  ;;  %v2532_v31 = vsel %vm8444_vm13, %v2515_v62, %v2093_v51  ;;  %5010 = vmatprep.subr.bf16.mxu1 %v5183_v0  ;;  %v3272_v49 = vsel %vm8740_vm7, %v3256_v11, %v8739_v63  ;;  %v8741_v51 = vld [vmem:[#allocation20_spill] sm:$0xff]  ;;  %v8743_v27 = vld [vmem:[#allocation39_spill] sm:$0xff]  ;;  %v8747_v21 = vld [vmem:[#allocation34_spill] sm:$0xff] }
 0x1bd   : > { %v7873_v54 = vpop.permute.xlu1 %2378  ;;  %v3242_v6 = vsel %vm8444_vm13, %v3226_v12, %v8731_v58  ;;  %v2517_v43 = vsel %vm2505_vm12, %v2500_v8, %v2079_v7  ;;  %vm8742_vm8 = vcmask 261120   ;;  %v8745_v33 = vld [vmem:[#allocation24_spill] sm:$0xff]  ;;  %5011 = vmatpush3.bf16.msra.mxu1 %v5183_v0  ;;  %v8750_v37 = vld [vmem:[#allocation82_spill] sm:$0xff]  ;;  %v8753_v0 = vld [vmem:[#allocation7_spill] sm:$0xff] }
 0x1be   : > { %2402 = vrot.lane.b32.xlu0 %v8656_v59, %s5381_s22  ;;  %v3258_v57 = vsel %vm8734_vm2, %v3242_v6, %v8733_v60  ;;  %vm8744_vm14 = vmmov %vm8742_vm8  ;;  %5012 = vmatprep.subr.bf16.mxu1 %v5184_v13  ;;  %v2455_v8 = vsel %vm2446_vm9, %v8753_v0, %v7375_v45 }
 0x1bf   : > { %2404 = vrot.lane.b32.xlu1 %v8663_v24, %s5381_s22  ;;  %v3274_v15 = vsel %vm8738_vm15, %v3258_v57, %v8737_v1  ;;  %v3288_v30 = vsel %vm8744_vm14, %v3272_v49, %v8743_v27  ;;  %vm8748_vm15 = vmmov %vm8746_vm1  ;;  %v2477_v60 = vsel %vm2471_vm10, %v2455_v8, %v7417_v35 }
 0x1c0   : > { %v2095_v16 = vpop.permute.xlu0 %2094  ;;  %v3290_v7 = vsel %vm8742_vm8, %v3274_v15, %v8741_v51  ;;  %v3304_v12 = vsel %vm8748_vm15, %v3288_v30, %v8747_v21  ;;  %v2494_v57 = vsel %vm2488_vm11, %v2477_v60, %v7454_v4  ;;  %vm8754_vm14 = vmmov %vm8740_vm7  ;;  %v2458_v15 = vsel %vm2446_vm9, %v8577_v53, %v7419_v56 }
 0x1c1   : > { %v2127_v61 = vpop.permute.xlu1 %2126  ;;  %v2534_v20 = vsel %vm8444_vm13, %v2517_v43, %v2095_v16  ;;  %v3306_v14 = vsel %vm8746_vm1, %v3290_v7, %v8745_v33  ;;  %v3320_v26 = vsel %vm2607_vm3, %v3304_v12, %v8750_v37  ;;  %5013 = vmatpush3.bf16.msra.mxu1 %v5184_v13  ;;  %v2511_v45 = vsel %vm2505_vm12, %v2494_v57, %v7480_v44  ;;  %vm8755_vm1 = vmmov %vm8734_vm2 }
 0x1c2   : > { %v2549_v29 = vsel %vm8734_vm2, %v2532_v31, %v2127_v61  ;;  %2442 = vrot.lane.b32.xlu0 %v4780_v48, %s5382_s23  ;;  %v3322_v55 = vsel %vm2607_vm3, %v3306_v14, %v8749_v32  ;;  %v8751_v48 = vld [vmem:[#allocation83_spill] sm:$0xff]  ;;  %v3336_v62 = vsel %vm2624_vm4, %v3320_v26, %v8752_v39  ;;  %v5186_v31 = vld [vmem:[%s8367_s3 + $0x18] sm:$0xff]   ;;  %v2528_v35 = vsel %vm8444_vm13, %v2511_v45, %v7505_v18  ;;  %vm8756_vm7 = vmmov %vm8755_vm1 }
 0x1c3   : > { %2444 = vrot.lane.b32.xlu1 %v4781_v5, %s5382_s23  ;;  %v5185_v5 = vld [vmem:[%s8367_s3 + $0x20] sm:$0xff]   ;;  %v3338_v9 = vsel %vm2624_vm4, %v3322_v55, %v8751_v48  ;;  %v2545_v4 = vsel %vm8756_vm7, %v2528_v35, %v7530_v25  ;;  %vm8757_vm2 = vmmov %vm8754_vm14  ;;  %v2479_v25 = vsel %vm2471_vm10, %v2458_v15, %v7456_v17  ;;  %vm8759_vm7 = vcmask 457728   ;;  %v5188_v26 = vld [vmem:[%s8367_s3 + $0x8] sm:$0xff]   ;;  %s8177_s23 = scalar_lea.vmem %s8371_s7, %s8165_s28 }
 0x1c4   : > { %v2381_v6 = vpop.permute.xlu0 %2380  ;;  %5014 = vmatprep.subr.bf16.mxu1 %v5185_v5  ;;  %v2562_v16 = vsel %vm8757_vm2, %v2545_v4, %v7572_v10  ;;  %v2496_v10 = vsel %vm2488_vm11, %v2479_v25, %v7482_v19 }
 0x1c5   : > { %v2395_v58 = vpop.permute.xlu1 %2394  ;;  %5015 = vmatpush3.bf16.msra.mxu1 %v5185_v5  ;;  %v2579_v44 = vsel %vm8742_vm8, %v2562_v16, %v7629_v22  ;;  %v2513_v53 = vsel %vm2505_vm12, %v2496_v10, %v7507_v23  ;;  %v5189_v5 = vld [vmem:[%s8367_s3] sm:$0xff]  }
 0x1c6   : > { %3359 = vrot.lane.b32.xlu0 %v3336_v62, %s5383_s14  ;;  %5016 = vmatprep.subr.bf16.mxu1 %v5186_v31  ;;  %v2596_v18 = vsel %vm8748_vm15, %v2579_v44, %v7719_v38  ;;  %v2530_v38 = vsel %vm8444_vm13, %v2513_v53, %v7532_v52  ;;  %vm8760_vm15 = vcmask 523264   ;;  %vm8762_vm13 = vcmask 916480  }
 0x1c7   : > { %3361 = vrot.lane.b32.xlu1 %v3338_v9, %s5383_s14  ;;  %v2613_v63 = vsel %vm2607_vm3, %v2596_v18, %v7764_v34  ;;  %v2547_v34 = vsel %vm8755_vm1, %v2530_v38, %v7574_v42 }
 0x1c8   : > { %v2129_v11 = vpop.permute.xlu0 %2128  ;;  %v2630_v22 = vsel %vm2624_vm4, %v2613_v63, %v7801_v47  ;;  %v2564_v23 = vsel %vm8757_vm2, %v2547_v34, %v7631_v46 }
 0x1c9   : > { %v2161_v36 = vpop.permute.xlu1 %2160  ;;  %v2551_v61 = vsel %vm8755_vm1, %v2534_v20, %v2129_v11  ;;  %5017 = vmatpush3.bf16.msra.mxu1 %v5186_v31  ;;  %v2647_v56 = vsel %vm2641_vm5, %v2630_v22, %v7821_v40  ;;  %v2581_v7 = vsel %vm8742_vm8, %v2564_v23, %v7693_v2  ;;  %vm8763_vm1 = vmmov %vm8759_vm7 }
 0x1ca   : > { %v7952_v43 = vsel %vm8754_vm14, %v2549_v29, %v2161_v36  ;;  %vm8758_vm14 = vmmov %vm8757_vm2  ;;  %v2664_v19 = vsel %vm2658_vm6, %v2647_v56, %v7873_v54 }
 0x1cb   : > { %v2681_v47 = vsel %vm8759_vm7, %v2664_v19, %v2395_v58  ;;  %vm8765_vm7 = vcmask 916480   ;;  %vm8768_vm2 = vmmov %vm8763_vm1 }
 0x1cc   : > { %v2397_v1 = vpop.permute.xlu0 %2396 }
 0x1cd   : > { %v2435_v13 = vpop.permute.xlu1 %2434 }
 0x1ce   : > { %v2698_v20 = vsel %vm2692_vm0, %v2681_v47, %v2435_v13 }
 0x1d0   : > { %v2163_v29 = vpop.permute.xlu0 %2162 }
 0x1d1   : > { %v7976_v49 = vpop.permute.xlu1 %2194  ;;  %v7983_v17 = vsel %vm8758_vm14, %v2551_v61, %v2163_v29  ;;  %vm8761_vm14 = vcmask 293888  }
 0x1d2   : > { %v2598_v54 = vsel %vm8761_vm14, %v2581_v7, %v7766_v50 }
 0x1d3   : > { %v2615_v42 = vsel %vm2607_vm3, %v2598_v54, %v7803_v3  ;;  %v5187_v3 = vld [vmem:[%s8367_s3 + $0x10] sm:$0xff]  }
 0x1d4   : > { %v2437_v51 = vpop.permute.xlu0 %2436  ;;  %v2632_v46 = vsel %vm2624_vm4, %v2615_v42, %v7823_v28  ;;  %5018 = vmatprep.subr.bf16.mxu1 %v5187_v3 }
 0x1d5   : > { %v3352_v40 = vpop.permute.xlu1 %3351  ;;  %v2649_v33 = vsel %vm2641_vm5, %v2632_v46, %v7875_v41  ;;  %5019 = vmatpush3.bf16.msra.mxu1 %v5187_v3 }
 0x1d6   : > { %v3369_v52 = vsel %vm8760_vm15, %v2698_v20, %v3352_v40  ;;  %v2666_v2 = vsel %vm2658_vm6, %v2649_v33, %v2381_v6  ;;  %5020 = vmatprep.subr.bf16.mxu1 %v5188_v26 }
 0x1d7   : > { %4996 = vmatprep.mubr.msk.bf16.mxu0 %vm8762_vm13, %v3369_v52  ;;  %v2683_v14 = vsel %vm8763_vm1, %v2666_v2, %v2397_v1  ;;  %vm8764_vm13 = vmmov %vm8760_vm15 }
 0x1d8   : > { %v1973_v30 = vpop.permute.xlu0 %1972  ;;  %v2700_v21 = vsel %vm2692_vm0, %v2683_v14, %v2437_v51  ;;  %vm8769_vm15 = vmmov %vm8764_vm13 }
 0x1d9   : > { %v2197_v27 = vpop.permute.xlu1 %2196  ;;  %v2467_v28 = vsel %vm2446_vm9, %v8656_v59, %v1973_v30  ;;  %5021 = vmatpush3.bf16.msra.mxu1 %v5188_v26  ;;  %vm8771_vm1 = vmmov %vm8765_vm7 }
 0x1da   : > { %5022 = vmatprep.subr.bf16.mxu1 %v5189_v5 }
 0x1dc   : > { %v2229_v12 = vpop.permute.xlu0 %2228 }
 0x1dd   : > { %v3354_v50 = vpop.permute.xlu1 %3353  ;;  %5023 = vmatpush3.bf16.msra.mxu1 %v5189_v5 }
 0x1de   : > { %v3371_v32 = vsel %vm8764_vm13, %v2700_v21, %v3354_v50  ;;  %vm8772_vm13 = vmmov %vm8768_vm2 }
 0x1df   : > { %4997 = vmatmul.mubr.msk.bf16.gmra.mxu0 %vm8765_vm7, %v3371_v32  ;;  %vm8773_vm7 = vmmov %vm8769_vm15 }
 0x1e0   : > { %v1975_v55 = vpop.permute.xlu0 %1974 }
 0x1e1   : > { %v2007_v41 = vpop.permute.xlu1 %2006  ;;  %v2470_v59 = vsel %vm2446_vm9, %v8663_v24, %v1975_v55  ;;  %vm8766_vm9 = vmmov %vm8742_vm8 }
 0x1e2   : > { %v2485_v37 = vsel %vm2471_vm10, %v2467_v28, %v2007_v41  ;;  %v2583_v25 = vsel %vm8766_vm9, %v7952_v43, %v7976_v49  ;;  %v2585_v43 = vsel %vm8742_vm8, %v7983_v17, %v2197_v27  ;;  %vm8774_vm9 = vmmov %vm8771_vm1  ;;  %vm8777_vm8 = vcmask 195584  }
 0x1e4   : > { %v2231_v6 = vpop.permute.xlu0 %2230 }
 0x1e5   : > { %v2269_v58 = vpop.permute.xlu1 %2268 }
 0x1e8   : > { %v2009_v9 = vpop.permute.xlu0 %2008 }
 0x1e9   : > { %v2047_v48 = vpop.permute.xlu1 %2046  ;;  %v2487_v62 = vsel %vm2471_vm10, %v2470_v59, %v2009_v9  ;;  %vm8767_vm10 = vmmov %vm8761_vm14 }
 0x1ea   : > { %v2502_v39 = vsel %vm2488_vm11, %v2485_v37, %v2047_v48  ;;  %v2600_v63 = vsel %vm8767_vm10, %v2583_v25, %v2229_v12  ;;  %vm8770_vm14 = vmmov %vm8767_vm10  ;;  %vm8775_vm10 = vcmask 162816  }
 0x1eb   : > { %v2617_v10 = vsel %vm2607_vm3, %v2600_v63, %v2269_v58  ;;  %v2602_v20 = vsel %vm8770_vm14, %v2585_v43, %v2231_v6  ;;  %vm8779_vm14 = vcmask 228352  }
 0x1ec   : > { %v2271_v8 = vpop.permute.xlu0 %2270 }
 0x1ed   : > { %v2303_v0 = vpop.permute.xlu1 %2302  ;;  %v2619_v40 = vsel %vm2607_vm3, %v2602_v20, %v2271_v8 }
 0x1ee   : > { %v2634_v22 = vsel %vm2624_vm4, %v2617_v10, %v2303_v0 }
 0x1f0   : > { %v2049_v57 = vpop.permute.xlu0 %2048 }
 0x1f1   : > { %v2081_v60 = vpop.permute.xlu1 %2080  ;;  %v2504_v3 = vsel %vm2488_vm11, %v2487_v62, %v2049_v57  ;;  %vm8781_vm11 = vcmask 261120  }
 0x1f2   : > { %v2519_v55 = vsel %vm2505_vm12, %v2502_v39, %v2081_v60 }
 0x1f4   : > { %v2305_v11 = vpop.permute.xlu0 %2304 }
 0x1f5   : > { %v2343_v36 = vpop.permute.xlu1 %2342  ;;  %v2636_v51 = vsel %vm2624_vm4, %v2619_v40, %v2305_v11 }
 0x1f6   : > { %v2651_v56 = vsel %vm2641_vm5, %v2634_v22, %v2343_v36 }
 0x1f8   : > { %v2083_v45 = vpop.permute.xlu0 %2082 }
 0x1f9   : > { %v2097_v31 = vpop.permute.xlu1 %2096  ;;  %v2521_v37 = vsel %vm2505_vm12, %v2504_v3, %v2083_v45 }
 0x1fa   : > { %v2536_v26 = vsel %vm8775_vm10, %v2519_v55, %v2097_v31 }
 0x1fc   : > { %v2345_v35 = vpop.permute.xlu0 %2344 }
 0x1fd   : > { %v2383_v61 = vpop.permute.xlu1 %2382  ;;  %v2653_v54 = vsel %vm2641_vm5, %v2636_v51, %v2345_v35 }
 0x1fe   : > { %v2668_v38 = vsel %vm2658_vm6, %v2651_v56, %v2383_v61 }
 0x200   : > { %v2099_v16 = vpop.permute.xlu0 %2098 }
 0x201   : > { %v2131_v4 = vpop.permute.xlu1 %2130 }
 0x202   : > { %v2553_v6 = vsel %vm8777_vm8, %v2536_v26, %v2131_v4 }
 0x204   : > { %v2385_v13 = vpop.permute.xlu0 %2384 }
 0x205   : > { %v2399_v24 = vpop.permute.xlu1 %2398  ;;  %v2670_v42 = vsel %vm2658_vm6, %v2653_v54, %v2385_v13 }
 0x206   : > { %v2685_v19 = vsel %vm8768_vm2, %v2668_v38, %v2399_v24  ;;  %vm8776_vm2 = vmmov %vm8775_vm10 }
 0x207   : > { %v2538_v58 = vsel %vm8776_vm2, %v2521_v37, %v2099_v16  ;;  %vm8789_vm2 = vcmask 916480  }
 0x208   : > { %v2133_v44 = vpop.permute.xlu0 %2132 }
 0x209   : > { %v2165_v1 = vpop.permute.xlu1 %2164 }
 0x20a   : > { %v2570_v59 = vsel %vm8779_vm14, %v2553_v6, %v2165_v1 }
 0x20c   : > { %v2401_v18 = vpop.permute.xlu0 %2400 }
 0x20d   : > { %v2439_v15 = vpop.permute.xlu1 %2438  ;;  %v2687_v46 = vsel %vm8772_vm13, %v2670_v42, %v2401_v18  ;;  %vm8782_vm13 = vmmov %vm8781_vm11 }
 0x20e   : > { %v2702_v34 = vsel %vm2692_vm0, %v2685_v19, %v2439_v15 }
 0x210   : > { %v2167_v53 = vpop.permute.xlu0 %2166 }
 0x211   : > { %v2199_v29 = vpop.permute.xlu1 %2198 }
 0x212   : > { %v2587_v0 = vsel %vm8781_vm11, %v2570_v59, %v2199_v29 }
 0x214   : > { %v2441_v23 = vpop.permute.xlu0 %2440 }
 0x215   : > { %v3356_v47 = vpop.permute.xlu1 %3355  ;;  %v2704_v17 = vsel %vm2692_vm0, %v2687_v46, %v2441_v23 }
 0x216   : > { %v3373_v49 = vsel %vm8769_vm15, %v2702_v34, %v3356_v47  ;;  %vm8778_vm15 = vmmov %vm8777_vm8 }
 0x217   : > { %5000 = vmatprep.mubr.msk.bf16.mxu0 %vm8771_vm1, %v3373_v49  ;;  %v2555_v5 = vsel %vm8778_vm15, %v2538_v58, %v2133_v44  ;;  %vm8780_vm1 = vmmov %vm8779_vm14  ;;  %v5190_v49 = vld [vmem:[%s8368_s4 + $0x18] sm:$0xff]  }
 0x218   : > { %v2201_v52 = vpop.permute.xlu0 %2200  ;;  %v2572_v48 = vsel %vm8780_vm1, %v2555_v5, %v2167_v53  ;;  %5040 = vmatprep.subr.bf16.mxu0 %v5190_v49  ;;  %5064 = vmatprep.subr.bf16.mxu1 %v5190_v49 }
 0x219   : > { %v2233_v7 = vpop.permute.xlu1 %2232  ;;  %v2589_v39 = vsel %vm8782_vm13, %v2572_v48, %v2201_v52  ;;  %5041 = vmatpush3.bf16.msra.mxu0 %v5190_v49 }
 0x21c   : > { %v3358_v30 = vpop.permute.xlu0 %3357 }
 0x21d   : > { %v2235_v27 = vpop.permute.xlu1 %2234  ;;  %v3375_v33 = vsel %vm8773_vm7, %v2704_v17, %v3358_v30  ;;  %vm8783_vm7 = vcmask 293888   ;;  %v5191_v30 = vld [vmem:[%s8368_s4 + $0x10] sm:$0xff]  }
 0x21e   : > { %5001 = vmatmul.mubr.msk.bf16.gmra.mxu0 %vm8774_vm9, %v3375_v33  ;;  %v2604_v8 = vsel %vm8783_vm7, %v2587_v0, %v2233_v7  ;;  %vm8784_vm12 = vmmov %vm8783_vm7  ;;  %vm8785_vm9 = vcmask 457728   ;;  %5042 = vmatprep.subr.bf16.mxu0 %v5191_v30  ;;  %v5192_v33 = vld [vmem:[%s8368_s4 + $0x8] sm:$0xff]  }
 0x21f   : > { %v2606_v60 = vsel %vm8784_vm12, %v2589_v39, %v2235_v27  ;;  %vm8786_vm10 = vmmov %vm8785_vm9  ;;  %5043 = vmatpush3.bf16.msra.mxu0 %v5191_v30  ;;  %vm3992_vm12 = vcmask 15360  }
 0x220   : > { %v2273_v14 = vpop.permute.xlu0 %2272  ;;  %5044 = vmatprep.subr.bf16.mxu0 %v5192_v33 }
 0x221   : > { %v2275_v2 = vpop.permute.xlu1 %2274  ;;  %v2621_v36 = vsel %vm2607_vm3, %v2604_v8, %v2273_v14  ;;  %v8100_v8 = vld [vmem:[%s395_s20] ss:$0 sm:$0xff]  ;;  %s8307_s20 = scalar_lea.vmem %s8372_s8, %s8165_s28 }
 0x222   : > { %v2623_v57 = vsel %vm2607_vm3, %v2606_v60, %v2275_v2  ;;  %vm8787_vm3 = vcmask 523264   ;;  %v5193_v2 = vld [vmem:[%s8368_s4] sm:$0xff]  }
 0x223   : > { %5045 = vmatpush3.bf16.msra.mxu0 %v5192_v33  ;;  %vm8792_vm8 = vmmov %vm8787_vm3 }
 0x224   : > { %v2307_v50 = vpop.permute.xlu0 %2306  ;;  %5046 = vmatprep.subr.bf16.mxu0 %v5193_v2  ;;  %vm8793_vm15 = vmmov %vm8787_vm3 }
 0x225   : > { %v2309_v21 = vpop.permute.xlu1 %2308  ;;  %v2638_v31 = vsel %vm2624_vm4, %v2621_v36, %v2307_v50  ;;  %vm8794_vm14 = vmmov %vm8787_vm3 }
 0x226   : > { %v2640_v11 = vsel %vm2624_vm4, %v2623_v57, %v2309_v21  ;;  %vm8788_vm4 = vmmov %vm8787_vm3 }
 0x227   : > { %5047 = vmatpush3.bf16.msra.mxu0 %v5193_v2  ;;  %vm8795_vm1 = vmmov %vm8787_vm3 }
 0x228   : > { %v2347_v32 = vpop.permute.xlu0 %2346  ;;  %vm8796_vm11 = vmmov %vm8795_vm1 }
 0x229   : > { %v2349_v12 = vpop.permute.xlu1 %2348  ;;  %v2655_v4 = vsel %vm2641_vm5, %v2638_v31, %v2347_v32  ;;  %vm8797_vm13 = vmmov %vm8795_vm1 }
 0x22a   : > { %v2657_v35 = vsel %vm2641_vm5, %v2640_v11, %v2349_v12  ;;  %vm8790_vm5 = vmmov %vm8789_vm2 }
 0x22b   : > { %vm8798_vm7 = vmmov %vm8795_vm1 }
 0x22c   : > { %v2387_v41 = vpop.permute.xlu0 %2386 }
 0x22d   : > { %v2389_v28 = vpop.permute.xlu1 %2388  ;;  %v2672_v24 = vsel %vm2658_vm6, %v2655_v4, %v2387_v41 }
 0x22e   : > { %v2674_v16 = vsel %vm2658_vm6, %v2657_v35, %v2389_v28  ;;  %vm8791_vm6 = vmmov %vm8787_vm3 }
 0x230   : > { %v2403_v62 = vpop.permute.xlu0 %2402 }
 0x231   : > { %v2405_v9 = vpop.permute.xlu1 %2404  ;;  %v2689_v1 = vsel %vm8786_vm10, %v2672_v24, %v2403_v62 }
 0x232   : > { %v2691_v13 = vsel %vm8785_vm9, %v2674_v16, %v2405_v9  ;;  %vm4297_vm9 = vcmask 7168  }
 0x234   : > { %v2443_v61 = vpop.permute.xlu0 %2442 }
 0x235   : > { %v2445_v45 = vpop.permute.xlu1 %2444  ;;  %v2706_v15 = vsel %vm2692_vm0, %v2689_v1, %v2443_v61 }
 0x236   : > { %v2708_v44 = vsel %vm2692_vm0, %v2691_v13, %v2445_v45  ;;  %vm3822_vm0 = vcmask 519168  }
 0x238   : > { %v3360_v25 = vpop.permute.xlu0 %3359 }
 0x239   : > { %v3362_v18 = vpop.permute.xlu1 %3361  ;;  %v3377_v10 = vsel %vm8788_vm4, %v2706_v15, %v3360_v25 }
 0x23a   : > { %v3379_v63 = vsel %vm8787_vm3, %v2708_v44, %v3362_v18  ;;  %5004 = vmatprep.mubr.msk.bf16.mxu0 %vm8789_vm2, %v3377_v10 }
 0x23b   : > { %5005 = vmatmul.mubr.msk.bf16.gmra.mxu0 %vm8790_vm5, %v3379_v63 }
 0x25f   : > { %v4994_v22 = vpop.f32.mrf.mxu0 }
 0x260   : > { %v3552_v47 = vmax.f32 %v4994_v22, 0.0 }
 0x261   : > { %v3487_v29 = vpop.f32.mrf.mxu0 }
 0x262   : > { %v3550_v19 = vmax.f32 %v3487_v29, 0.0 }
 0x263   : > { %v4995_v53 = vpop.f32.mrf.mxu0 }
 0x264   : > { %v3553_v56 = vmax.f32 %v4995_v53, 0.0 }
 0x265   : > { %v3490_v38 = vpop.f32.mrf.mxu0 }
 0x266   : > { %v3551_v34 = vmax.f32 %v3490_v38, 0.0  ;;  %v3567_v43 = vpack.c.bf16 %v3553_v56, %v3552_v47 }
 0x268   : > { %v3566_v23 = vpack.c.bf16 %v3551_v34, %v3550_v19 }
 0x26a   : > { %5024 = vmatprep.mubr.bf16.mxu1 %v3566_v23 }
 0x26b   : > { %5025 = vmatmul.mubr.bf16.vlgmr.msra.gmra.mxu1 %v3567_v43 }
 0x26c   : > { %5068 = vmatpush3.bf16.msra.mxu1 %v5190_v49 }
 0x26d   : > { %5065 = vmatprep.subr.bf16.mxu1 %v5191_v30 }
 0x270   : > { %5069 = vmatpush3.bf16.msra.mxu1 %v5191_v30 }
 0x271   : > { %5066 = vmatprep.subr.bf16.mxu1 %v5192_v33 }
 0x274   : > { %5070 = vmatpush3.bf16.msra.mxu1 %v5192_v33 }
 0x275   : > { %5067 = vmatprep.subr.bf16.mxu1 %v5193_v2 }
 0x278   : > { %5071 = vmatpush3.bf16.msra.mxu1 %v5193_v2 }
 0x29f   : > { %v4998_v20 = vpop.f32.mrf.mxu0 }
 0x2a0   : > { %v3556_v46 = vmax.f32 %v4998_v20, 0.0 }
 0x2a1   : > { %v3503_v40 = vpop.f32.mrf.mxu0 }
 0x2a2   : > { %v3554_v54 = vmax.f32 %v3503_v40, 0.0 }
 0x2a3   : > { %v4999_v51 = vpop.f32.mrf.mxu0 }
 0x2a4   : > { %v3557_v7 = vmax.f32 %v4999_v51, 0.0 }
 0x2a5   : > { %v3506_v52 = vpop.f32.mrf.mxu0 }
 0x2a6   : > { %v3555_v42 = vmax.f32 %v3506_v52, 0.0  ;;  %v3569_v27 = vpack.c.bf16 %v3557_v7, %v3556_v46 }
 0x2a8   : > { %v3568_v17 = vpack.c.bf16 %v3555_v42, %v3554_v54 }
 0x2aa   : > { %5028 = vmatprep.mubr.bf16.mxu1 %v3568_v17 }
 0x2ab   : > { %5029 = vmatmul.mubr.bf16.gmra.mxu1 %v3569_v27 }
 0x2de   : > { %v5002_v14 = vpop.f32.mrf.mxu0 }
 0x2df   : > { %v3560_v41 = vmax.f32 %v5002_v14, 0.0 }
 0x2e0   : > { %v3519_v21 = vpop.f32.mrf.mxu0 }
 0x2e1   : > { %v3558_v3 = vmax.f32 %v3519_v21, 0.0 }
 0x2e2   : > { %v5003_v50 = vpop.f32.mrf.mxu0 }
 0x2e3   : > { %v3561_v12 = vmax.f32 %v5003_v50, 0.0 }
 0x2e4   : > { %v3522_v32 = vpop.f32.mrf.mxu0 }
 0x2e5   : > { %v3559_v28 = vmax.f32 %v3522_v32, 0.0  ;;  %v3571_v37 = vpack.c.bf16 %v3561_v12, %v3560_v41 }
 0x2e7   : > { %v3570_v55 = vpack.c.bf16 %v3559_v28, %v3558_v3 }
 0x2e9   : > { %5032 = vmatprep.mubr.bf16.mxu1 %v3570_v55 }
 0x2ea   : > { %5033 = vmatmul.mubr.bf16.gmra.mxu1 %v3571_v37 }
 0x2fb   : > { %v5006_v26 = vpop.f32.mrf.mxu0 }
 0x2fc   : > { %v3564_v62 = vmax.f32 %v5006_v26, 0.0 }
 0x2fd   : > { %v3535_v58 = vpop.f32.mrf.mxu0 }
 0x2fe   : > { %v3562_v48 = vmax.f32 %v3535_v58, 0.0 }
 0x2ff   : > { %v5007_v6 = vpop.f32.mrf.mxu0 }
 0x300   : > { %v3565_v5 = vmax.f32 %v5007_v6, 0.0 }
 0x301   : > { %v3538_v59 = vpop.f32.mrf.mxu0 }
 0x302   : > { %v3563_v9 = vmax.f32 %v3538_v59, 0.0  ;;  %v3573_v39 = vpack.c.bf16 %v3565_v5, %v3564_v62 }
 0x304   : > { %v3572_v0 = vpack.c.bf16 %v3563_v9, %v3562_v48 }
 0x306   : > { %5036 = vmatprep.mubr.bf16.mxu1 %v3572_v0 }
 0x307   : > { %5037 = vmatmul.mubr.bf16.gmra.mxu1 %v3573_v39 }
 0x32b   : > { %v5026_v60 = vpop.f32.mrf.mxu1 }
 0x32c   : > { %v3688_v57 = vadd.f32 %v5026_v60, %v8100_v8 }
 0x32d   : > { %v3679_v36 = vpop.f32.mrf.mxu1 }
 0x32e   : > { %v3744_v11 = vmax.f32 %v3688_v57, 0.0  ;;  %v3680_v31 = vadd.f32 %v8100_v8, %v3679_v36 }
 0x32f   : > { %v5027_v45 = vpop.f32.mrf.mxu1 }
 0x330   : > { %v4921_v61 = vpack.c.bf16 %v3744_v11, %v3744_v11  ;;  %v3742_v35 = vmax.f32 %v3680_v31, 0.0  ;;  %v3691_v4 = vadd.f32 %v5027_v45, %v8100_v8 }
 0x331   : > { %v3682_v16 = vpop.f32.mrf.mxu1 }
 0x332   : > { %3825 = vst.msk [vmem:[%s8108_s21 + $0x8] sm:$0xf] %vm3822_vm0, %v4921_v61  ;;  %v4919_v24 = vpack.c.bf16 %v3742_v35, %v3742_v35  ;;  %v3745_v13 = vmax.f32 %v3691_v4, 0.0  ;;  %v3683_v1 = vadd.f32 %v8100_v8, %v3682_v16 }
 0x334   : > { %3823 = vst.msk [vmem:[%s8108_s21] sm:$0xf] %vm3822_vm0, %v4919_v24  ;;  %v4922_v44 = vpack.c.bf16 %v3745_v13, %v3745_v13  ;;  %v3743_v15 = vmax.f32 %v3683_v1, 0.0  ;;  %v3759_v63 = vpack.c.bf16 %v3745_v13, %v3744_v11  ;;  %v4009_v24 = vld [vmem:[%s8171_s25] sm:$0xff] }
 0x336   : > { %3826 = vst.msk [vmem:[%s8108_s21 + $0xc] sm:$0xf] %vm3822_vm0, %v4922_v44  ;;  %v3758_v18 = vpack.c.bf16 %v3743_v15, %v3742_v35  ;;  %v4920_v25 = vpack.c.bf16 %v3743_v15, %v3743_v15  ;;  %v4012_v44 = vld [vmem:[%s8171_s25 + $0x18] sm:$0xff] }
 0x338   : > { %3824 = vst.msk [vmem:[%s8108_s21 + $0x4] sm:$0xf] %vm3822_vm0, %v4920_v25  ;;  %5048 = vmatprep.mubr.msk.bf16.mxu0 %vm8791_vm6, %v3758_v18 }
 0x339   : > { %5049 = vmatmul.mubr.msk.bf16.vlgmr.msra.gmra.mxu0 %vm8792_vm8, %v3759_v63  ;;  %v4010_v63 = vld [vmem:[%s8171_s25 + $0x8] sm:$0xff] }
 0x36b   : > { %v5030_v10 = vpop.f32.mrf.mxu1 }
 0x36c   : > { %v3704_v22 = vadd.f32 %v5030_v10, %v8100_v8 }
 0x36d   : > { %v3695_v29 = vpop.f32.mrf.mxu1 }
 0x36e   : > { %v3748_v53 = vmax.f32 %v3704_v22, 0.0  ;;  %v3696_v56 = vadd.f32 %v8100_v8, %v3695_v29 }
 0x36f   : > { %v5031_v38 = vpop.f32.mrf.mxu1 }
 0x370   : > { %v4925_v19 = vpack.c.bf16 %v3748_v53, %v3748_v53  ;;  %v3746_v34 = vmax.f32 %v3696_v56, 0.0  ;;  %v3707_v47 = vadd.f32 %v5031_v38, %v8100_v8 }
 0x371   : > { %v3698_v23 = vpop.f32.mrf.mxu1 }
 0x372   : > { %3829 = vst.msk [vmem:[%s8108_s21 + $0x18] sm:$0xf] %vm3822_vm0, %v4925_v19  ;;  %v4923_v43 = vpack.c.bf16 %v3746_v34, %v3746_v34  ;;  %v3749_v49 = vmax.f32 %v3707_v47, 0.0  ;;  %v3699_v20 = vadd.f32 %v8100_v8, %v3698_v23  ;;  %v4015_v19 = vld [vmem:[%s8171_s25 + $0x30] sm:$0xff]  ;;  %v4013_v47 = vld [vmem:[%s8171_s25 + $0x20] sm:$0xff] }
 0x374   : > { %3827 = vst.msk [vmem:[%s8108_s21 + $0x10] sm:$0xf] %vm3822_vm0, %v4923_v43  ;;  %v4926_v40 = vpack.c.bf16 %v3749_v49, %v3749_v49  ;;  %v3747_v51 = vmax.f32 %v3699_v20, 0.0  ;;  %v3761_v54 = vpack.c.bf16 %v3749_v49, %v3748_v53  ;;  %v4016_v49 = vld [vmem:[%s8171_s25 + $0x38] sm:$0xff] }
 0x376   : > { %3830 = vst.msk [vmem:[%s8108_s21 + $0x1c] sm:$0xf] %vm3822_vm0, %v4926_v40  ;;  %v3760_v7 = vpack.c.bf16 %v3747_v51, %v3746_v34  ;;  %v4924_v52 = vpack.c.bf16 %v3747_v51, %v3747_v51 }
 0x378   : > { %3828 = vst.msk [vmem:[%s8108_s21 + $0x14] sm:$0xf] %vm3822_vm0, %v4924_v52  ;;  %5052 = vmatprep.mubr.msk.bf16.mxu0 %vm8793_vm15, %v3760_v7  ;;  %v4014_v7 = vld [vmem:[%s8171_s25 + $0x28] sm:$0xff] }
 0x379   : > { %5053 = vmatmul.mubr.msk.bf16.gmra.mxu0 %vm8794_vm14, %v3761_v54 }
 0x3aa   : > { %v5034_v42 = vpop.f32.mrf.mxu1 }
 0x3ab   : > { %v3720_v46 = vadd.f32 %v5034_v42, %v8100_v8 }
 0x3ac   : > { %v3711_v17 = vpop.f32.mrf.mxu1 }
 0x3ad   : > { %v3752_v27 = vmax.f32 %v3720_v46, 0.0  ;;  %v3712_v30 = vadd.f32 %v8100_v8, %v3711_v17 }
 0x3ae   : > { %v5035_v33 = vpop.f32.mrf.mxu1 }
 0x3af   : > { %v4929_v2 = vpack.c.bf16 %v3752_v27, %v3752_v27  ;;  %v3750_v14 = vmax.f32 %v3712_v30, 0.0  ;;  %v3723_v21 = vadd.f32 %v5035_v33, %v8100_v8 }
 0x3b0   : > { %v3714_v50 = vpop.f32.mrf.mxu1 }
 0x3b1   : > { %3833 = vst.msk [vmem:[%s8108_s21 + $0x28] sm:$0xf] %vm3822_vm0, %v4929_v2  ;;  %v4927_v12 = vpack.c.bf16 %v3750_v14, %v3750_v14  ;;  %v3753_v32 = vmax.f32 %v3723_v21, 0.0  ;;  %v3715_v3 = vadd.f32 %v8100_v8, %v3714_v50  ;;  %v4019_v21 = vld [vmem:[%s8171_s25 + $0x50] sm:$0xff] }
 0x3b3   : > { %3831 = vst.msk [vmem:[%s8108_s21 + $0x20] sm:$0xf] %vm3822_vm0, %v4927_v12  ;;  %v4930_v28 = vpack.c.bf16 %v3753_v32, %v3753_v32  ;;  %v3751_v41 = vmax.f32 %v3715_v3, 0.0  ;;  %v3763_v26 = vpack.c.bf16 %v3753_v32, %v3752_v27  ;;  %v4017_v12 = vld [vmem:[%s8171_s25 + $0x40] sm:$0xff] }
 0x3b5   : > { %3834 = vst.msk [vmem:[%s8108_s21 + $0x2c] sm:$0xf] %vm3822_vm0, %v4930_v28  ;;  %v3762_v55 = vpack.c.bf16 %v3751_v41, %v3750_v14  ;;  %v4928_v37 = vpack.c.bf16 %v3751_v41, %v3751_v41 }
 0x3b7   : > { %3832 = vst.msk [vmem:[%s8108_s21 + $0x24] sm:$0xf] %vm3822_vm0, %v4928_v37  ;;  %5056 = vmatprep.mubr.msk.bf16.mxu0 %vm8795_vm1, %v3762_v55  ;;  %v4020_v37 = vld [vmem:[%s8171_s25 + $0x58] sm:$0xff] }
 0x3b8   : > { %5057 = vmatmul.mubr.msk.bf16.gmra.mxu0 %vm8796_vm11, %v3763_v26 }
 0x3c7   : > { %v5038_v58 = vpop.f32.mrf.mxu1 }
 0x3c8   : > { %v3736_v6 = vadd.f32 %v5038_v58, %v8100_v8 }
 0x3c9   : > { %v3727_v5 = vpop.f32.mrf.mxu1 }
 0x3ca   : > { %v3756_v59 = vmax.f32 %v3736_v6, 0.0  ;;  %v3728_v48 = vadd.f32 %v8100_v8, %v3727_v5 }
 0x3cb   : > { %v5039_v9 = vpop.f32.mrf.mxu1 }
 0x3cc   : > { %v4933_v62 = vpack.c.bf16 %v3756_v59, %v3756_v59  ;;  %v3754_v0 = vmax.f32 %v3728_v48, 0.0  ;;  %v3739_v39 = vadd.f32 %v5039_v9, %v8100_v8 }
 0x3cd   : > { %v3730_v60 = vpop.f32.mrf.mxu1 }
 0x3ce   : > { %3837 = vst.msk [vmem:[%s8108_s21 + $0x38] sm:$0xf] %vm3822_vm0, %v4933_v62  ;;  %v4931_v57 = vpack.c.bf16 %v3754_v0, %v3754_v0  ;;  %v3757_v36 = vmax.f32 %v3739_v39, 0.0  ;;  %v3731_v11 = vadd.f32 %v8100_v8, %v3730_v60  ;;  %v4011_v8 = vld [vmem:[%s8171_s25 + $0x10] sm:$0xff] }
 0x3d0   : > { %3835 = vst.msk [vmem:[%s8108_s21 + $0x30] sm:$0xf] %vm3822_vm0, %v4931_v57  ;;  %v4934_v31 = vpack.c.bf16 %v3757_v36, %v3757_v36  ;;  %v3755_v45 = vmax.f32 %v3731_v11, 0.0  ;;  %v3765_v4 = vpack.c.bf16 %v3757_v36, %v3756_v59  ;;  %v4018_v59 = vld [vmem:[%s8171_s25 + $0x48] sm:$0xff] }
 0x3d2   : > { %3838 = vst.msk [vmem:[%s8108_s21 + $0x3c] sm:$0xf] %vm3822_vm0, %v4934_v31  ;;  %v3764_v61 = vpack.c.bf16 %v3755_v45, %v3754_v0  ;;  %v4932_v35 = vpack.c.bf16 %v3755_v45, %v3755_v45 }
 0x3d4   : > { %3836 = vst.msk [vmem:[%s8108_s21 + $0x34] sm:$0xf] %vm3822_vm0, %v4932_v35  ;;  %5060 = vmatprep.mubr.msk.bf16.mxu1 %vm8797_vm13, %v3764_v61 }
 0x3d5   : > { %5061 = vmatmul.mubr.msk.bf16.vlgmr.msra.gmra.mxu1 %vm8798_vm7, %v3765_v4 }
 0x3f9   : > { %v5050_v16 = vpop.f32.mrf.mxu0 }
 0x3fa   : > { %3995 = vst.msk [vmem:[%s8177_s23 + $0x10] sm:$0xff] %vm3992_vm12, %v5050_v16  ;;  %v4027_v13 = vadd.f32 %v5050_v16, %v4011_v8 }
 0x3fb   : > { %v3929_v1 = vpop.f32.mrf.mxu0 }
 0x3fc   : > { %v4043_v15 = vmul.f32 1.25, %v4027_v13  ;;  %3993 = vst.msk [vmem:[%s8177_s23] sm:$0xff] %vm3992_vm12, %v3929_v1  ;;  %v4025_v18 = vadd.f32 %v4009_v24, %v3929_v1 }
 0x3fd   : > { %v5051_v25 = vpop.f32.mrf.mxu0 }
 0x3fe   : > { %3996 = vst.msk [vmem:[%s8177_s23 + $0x18] sm:$0xff] %vm3992_vm12, %v5051_v25  ;;  %v4028_v10 = vadd.f32 %v5051_v25, %v4012_v44  ;;  %4077 = vrot.lane.b32.xlu0 %v4043_v15, %s5384_s13  ;;  %v4041_v29 = vmul.f32 1.25, %v4025_v18 }
 0x3ff   : > { %v3932_v22 = vpop.f32.mrf.mxu0 }
 0x400   : > { %v4044_v53 = vmul.f32 1.25, %v4028_v10  ;;  %3994 = vst.msk [vmem:[%s8177_s23 + $0x8] sm:$0xff] %vm3992_vm12, %v3932_v22  ;;  %v4026_v56 = vadd.f32 %v4010_v63, %v3932_v22  ;;  %v4023_v63 = vld [vmem:[%s8171_s25 + $0x70] sm:$0xff] }
 0x402   : > { %4073 = vrot.lane.b32.xlu0 %v4041_v29, %s5384_s13  ;;  %4079 = vrot.lane.b32.xlu1 %v4044_v53, %s5384_s13  ;;  %v8194_v38 = vmul.f32 1.25, %v4026_v56 }
 0x406   : > { %4075 = vrot.lane.b32.xlu1 %v8194_v38, %s5384_s13 }
 0x439   : > { %v5054_v34 = vpop.f32.mrf.mxu0 }
 0x43a   : > { %3999 = vst.msk [vmem:[%s8177_s23 + $0x30] sm:$0xff] %vm3992_vm12, %v5054_v34  ;;  %v4031_v23 = vadd.f32 %v5054_v34, %v4015_v19  ;;  %v4024_v34 = vld [vmem:[%s8171_s25 + $0x78] sm:$0xff] }
 0x43b   : > { %v3945_v43 = vpop.f32.mrf.mxu0 }
 0x43c   : > { %v8203_v20 = vmul.f32 1.25, %v4031_v23  ;;  %3997 = vst.msk [vmem:[%s8177_s23 + $0x20] sm:$0xff] %vm3992_vm12, %v3945_v43  ;;  %v4029_v40 = vadd.f32 %v4013_v47, %v3945_v43 }
 0x43d   : > { %v5055_v51 = vpop.f32.mrf.mxu0 }
 0x43e   : > { %4000 = vst.msk [vmem:[%s8177_s23 + $0x38] sm:$0xff] %vm3992_vm12, %v5055_v51  ;;  %v4032_v52 = vadd.f32 %v5055_v51, %v4016_v49  ;;  %4085 = vrot.lane.b32.xlu0 %v8203_v20, %s5384_s13  ;;  %v8212_v42 = vmul.f32 1.25, %v4029_v40 }
 0x43f   : > { %v3948_v54 = vpop.f32.mrf.mxu0 }
 0x440   : > { %v8214_v46 = vmul.f32 1.25, %v4032_v52  ;;  %3998 = vst.msk [vmem:[%s8177_s23 + $0x28] sm:$0xff] %vm3992_vm12, %v3948_v54  ;;  %v4030_v17 = vadd.f32 %v4014_v7, %v3948_v54 }
 0x442   : > { %4081 = vrot.lane.b32.xlu0 %v8212_v42, %s5384_s13  ;;  %4087 = vrot.lane.b32.xlu1 %v8214_v46, %s5384_s13  ;;  %v8222_v27 = vmul.f32 1.25, %v4030_v17 }
 0x446   : > { %4083 = vrot.lane.b32.xlu1 %v8222_v27, %s5384_s13 }
 0x470   : > { %v4078_v30 = vpop.permute.xlu0 %4077 }
 0x471   : > { %v4123_v2 = vsub.f32 %v4043_v15, %v4078_v30  ;;  %v4021_v15 = vld [vmem:[%s8171_s25 + $0x60] sm:$0xff] }
 0x473   : > { %v4139_v28 = vsub.f32 0.0, %v4123_v2 }
 0x474   : > { %v4080_v33 = vpop.permute.xlu1 %4079  ;;  %v4074_v14 = vpop.permute.xlu0 %4073 }
 0x475   : > { %v4121_v32 = vsub.f32 %v4041_v29, %v4074_v14  ;;  %v4124_v41 = vsub.f32 %v4044_v53, %v4080_v33  ;;  %v4157_v62 = vmul.f32 1.442695, %v4139_v28  ;;  %v4022_v53 = vld [vmem:[%s8171_s25 + $0x68] sm:$0xff] }
 0x477   : > { %v4137_v48 = vsub.f32 0.0, %v4121_v32  ;;  %v4140_v0 = vsub.f32 0.0, %v4124_v41  ;;  %5194 = vpow2.f32 %v4157_v62 }
 0x478   : > { %v5058_v50 = vpop.f32.mrf.mxu0  ;;  %v4076_v26 = vpop.permute.xlu1 %4075 }
 0x479   : > { %4003 = vst.msk [vmem:[%s8177_s23 + $0x50] sm:$0xff] %vm3992_vm12, %v5058_v50  ;;  %v4035_v3 = vadd.f32 %v5058_v50, %v4019_v21  ;;  %v4122_v39 = vsub.f32 %v8194_v38, %v4076_v26  ;;  %v4153_v31 = vmul.f32 1.442695, %v4137_v48  ;;  %v4159_v45 = vmul.f32 1.442695, %v4140_v0 }
 0x47a   : > { %v3961_v55 = vpop.f32.mrf.mxu0 }
 0x47b   : > { %v8231_v58 = vmul.f32 1.25, %v4035_v3  ;;  %4001 = vst.msk [vmem:[%s8177_s23 + $0x40] sm:$0xff] %vm3992_vm12, %v3961_v55  ;;  %v4033_v6 = vadd.f32 %v4017_v12, %v3961_v55  ;;  %v4138_v61 = vsub.f32 0.0, %v4122_v39  ;;  %5196 = vpow2.f32 %v4153_v31 }
 0x47c   : > { %v5059_v5 = vpop.f32.mrf.mxu0  ;;  %5198 = vpow2.f32 %v4159_v45 }
 0x47d   : > { %4004 = vst.msk [vmem:[%s8177_s23 + $0x58] sm:$0xff] %vm3992_vm12, %v5059_v5  ;;  %v4036_v9 = vadd.f32 %v5059_v5, %v4020_v37  ;;  %4093 = vrot.lane.b32.xlu0 %v8231_v58, %s5384_s13  ;;  %v8241_v57 = vmul.f32 1.25, %v4033_v6  ;;  %v4155_v4 = vmul.f32 1.442695, %v4138_v61 }
 0x47e   : > { %v3964_v60 = vpop.f32.mrf.mxu0 }
 0x47f   : > { %v8243_v36 = vmul.f32 1.25, %v4036_v9  ;;  %4002 = vst.msk [vmem:[%s8177_s23 + $0x48] sm:$0xff] %vm3992_vm12, %v3964_v60  ;;  %v4034_v11 = vadd.f32 %v4018_v59, %v3964_v60  ;;  %5200 = vpow2.f32 %v4155_v4 }
 0x481   : > { %4089 = vrot.lane.b32.xlu0 %v8241_v57, %s5384_s13  ;;  %4095 = vrot.lane.b32.xlu1 %v8243_v36, %s5384_s13  ;;  %v8251_v35 = vmul.f32 1.25, %v4034_v11 }
 0x484   : > { %v5195_v8 = vpop.eup %5194 }
 0x485   : > { %4091 = vrot.lane.b32.xlu1 %v8251_v35, %s5384_s13  ;;  %v4187_v24 = vadd.f32 1.0, %v5195_v8 }
 0x487   : > { %5202 = vrcp.f32 %v4187_v24 }
 0x488   : > { %v5197_v16 = vpop.eup %5196 }
 0x489   : > { %v5199_v13 = vpop.eup %5198  ;;  %v4185_v1 = vadd.f32 1.0, %v5197_v16 }
 0x48a   : > { %v4188_v18 = vadd.f32 1.0, %v5199_v13 }
 0x48b   : > { %5204 = vrcp.f32 %v4185_v1 }
 0x48c   : > { %v5201_v25 = vpop.eup %5200  ;;  %5206 = vrcp.f32 %v4188_v18 }
 0x48d   : > { %v4186_v56 = vadd.f32 1.0, %v5201_v25 }
 0x48f   : > { %5208 = vrcp.f32 %v4186_v56 }
 0x494   : > { %v5203_v7 = vpop.eup %5202 }
 0x495   : > { %v5062_v44 = vpop.f32.mrf.mxu1 }
 0x496   : > { %4007 = vst.msk [vmem:[%s8177_s23 + $0x70] sm:$0xff] %vm3992_vm12, %v5062_v44  ;;  %v4039_v38 = vadd.f32 %v5062_v44, %v4023_v63 }
 0x497   : > { %v3977_v10 = vpop.f32.mrf.mxu1 }
 0x498   : > { %4005 = vst.msk [vmem:[%s8177_s23 + $0x60] sm:$0xff] %vm3992_vm12, %v3977_v10  ;;  %v4037_v22 = vadd.f32 %v4021_v15, %v3977_v10  ;;  %v8271_v43 = vmul.f32 1.25, %v4039_v38  ;;  %v5205_v52 = vpop.eup %5204 }
 0x499   : > { %v5063_v29 = vpop.f32.mrf.mxu1  ;;  %v5207_v54 = vpop.eup %5206 }
 0x49a   : > { %v8262_v19 = vmul.f32 1.25, %v4037_v22  ;;  %4008 = vst.msk [vmem:[%s8177_s23 + $0x78] sm:$0xff] %vm3992_vm12, %v5063_v29  ;;  %v4040_v49 = vadd.f32 %v5063_v29, %v4024_v34 }
 0x49b   : > { %v3980_v47 = vpop.f32.mrf.mxu1 }
 0x49c   : > { %4006 = vst.msk [vmem:[%s8177_s23 + $0x68] sm:$0xff] %vm3992_vm12, %v3980_v47  ;;  %v4038_v23 = vadd.f32 %v4022_v53, %v3980_v47  ;;  %4097 = vrot.lane.b32.xlu0 %v8262_v19, %s5384_s13  ;;  %v8279_v51 = vmul.f32 1.25, %v4040_v49  ;;  %v5209_v17 = vpop.eup %5208 }
 0x49e   : > { %v8273_v40 = vmul.f32 1.25, %v4038_v23 }
 0x4a0   : > { %4101 = vrot.lane.b32.xlu0 %v8271_v43, %s5384_s13  ;;  %4099 = vrot.lane.b32.xlu1 %v8273_v40, %s5384_s13 }
 0x4a4   : > { %4253 = vrot.lane.b32.xlu0 %v5203_v7, %s5385_s16  ;;  %4103 = vrot.lane.b32.xlu1 %v8279_v51, %s5384_s13 }
 0x4a8   : > { %4249 = vrot.lane.b32.xlu0 %v5205_v52, %s5385_s16  ;;  %4255 = vrot.lane.b32.xlu1 %v5207_v54, %s5385_s16 }
 0x4ac   : > { %4251 = vrot.lane.b32.xlu1 %v5209_v17, %s5385_s16 }
 0x4b0   : > { %v4086_v30 = vpop.permute.xlu0 %4085 }
 0x4b1   : > { %v4127_v33 = vsub.f32 %v8203_v20, %v4086_v30 }
 0x4b3   : > { %v4143_v2 = vsub.f32 0.0, %v4127_v33 }
 0x4b4   : > { %v4082_v14 = vpop.permute.xlu0 %4081  ;;  %v4088_v21 = vpop.permute.xlu1 %4087 }
 0x4b5   : > { %v4165_v50 = vmul.f32 1.442695, %v4143_v2  ;;  %v4125_v12 = vsub.f32 %v8212_v42, %v4082_v14  ;;  %v4128_v32 = vsub.f32 %v8214_v46, %v4088_v21 }
 0x4b7   : > { %5210 = vpow2.f32 %v4165_v50  ;;  %v4141_v3 = vsub.f32 0.0, %v4125_v12  ;;  %v4144_v28 = vsub.f32 0.0, %v4128_v32 }
 0x4b8   : > { %v4084_v41 = vpop.permute.xlu1 %4083 }
 0x4b9   : > { %v4161_v55 = vmul.f32 1.442695, %v4141_v3  ;;  %v4167_v37 = vmul.f32 1.442695, %v4144_v28  ;;  %v4126_v26 = vsub.f32 %v8222_v27, %v4084_v41 }
 0x4bb   : > { %5212 = vpow2.f32 %v4161_v55  ;;  %v4142_v6 = vsub.f32 0.0, %v4126_v26 }
 0x4bc   : > { %5214 = vpow2.f32 %v4167_v37 }
 0x4bd   : > { %v4163_v20 = vmul.f32 1.442695, %v4142_v6 }
 0x4bf   : > { %5216 = vpow2.f32 %v4163_v20 }
 0x4c4   : > { %v5211_v5 = vpop.eup %5210 }
 0x4c5   : > { %v4191_v59 = vadd.f32 1.0, %v5211_v5 }
 0x4c7   : > { %5218 = vrcp.f32 %v4191_v59 }
 0x4c8   : > { %v5213_v48 = vpop.eup %5212 }
 0x4c9   : > { %v5215_v42 = vpop.eup %5214  ;;  %v4189_v9 = vadd.f32 1.0, %v5213_v48 }
 0x4ca   : > { %v4192_v46 = vadd.f32 1.0, %v5215_v42 }
 0x4cb   : > { %5220 = vrcp.f32 %v4189_v9 }
 0x4cc   : > { %v5217_v62 = vpop.eup %5216  ;;  %5222 = vrcp.f32 %v4192_v46 }
 0x4cd   : > { %v4190_v0 = vadd.f32 1.0, %v5217_v62 }
 0x4cf   : > { %5224 = vrcp.f32 %v4190_v0 }
 0x4d4   : > { %v5219_v39 = vpop.eup %5218 }
 0x4d5   : > { %4261 = vrot.lane.b32.xlu0 %v5219_v39, %s5385_s16 }
 0x4d8   : > { %v5221_v27 = vpop.eup %5220 }
 0x4d9   : > { %v5223_v60 = vpop.eup %5222  ;;  %4257 = vrot.lane.b32.xlu0 %v5221_v27, %s5385_s16 }
 0x4da   : > { %4263 = vrot.lane.b32.xlu1 %v5223_v60, %s5385_s16 }
 0x4dc   : > { %v5225_v11 = vpop.eup %5224 }
 0x4de   : > { %4259 = vrot.lane.b32.xlu1 %v5225_v11, %s5385_s16 }
 0x4ef   : > { %v4094_v31 = vpop.permute.xlu0 %4093 }
 0x4f0   : > { %v4131_v45 = vsub.f32 %v8231_v58, %v4094_v31 }
 0x4f2   : > { %v4147_v61 = vsub.f32 0.0, %v4131_v45 }
 0x4f3   : > { %v4090_v4 = vpop.permute.xlu0 %4089  ;;  %v4096_v8 = vpop.permute.xlu1 %4095 }
 0x4f4   : > { %v4173_v16 = vmul.f32 1.442695, %v4147_v61  ;;  %v4129_v24 = vsub.f32 %v8241_v57, %v4090_v4  ;;  %v4132_v13 = vsub.f32 %v8243_v36, %v4096_v8 }
 0x4f6   : > { %5226 = vpow2.f32 %v4173_v16  ;;  %v4145_v1 = vsub.f32 0.0, %v4129_v24  ;;  %v4148_v44 = vsub.f32 0.0, %v4132_v13 }
 0x4f7   : > { %v4092_v15 = vpop.permute.xlu1 %4091 }
 0x4f8   : > { %v4169_v18 = vmul.f32 1.442695, %v4145_v1  ;;  %v4175_v25 = vmul.f32 1.442695, %v4148_v44  ;;  %v4130_v63 = vsub.f32 %v8251_v35, %v4092_v15 }
 0x4fa   : > { %5228 = vpow2.f32 %v4169_v18  ;;  %v4146_v10 = vsub.f32 0.0, %v4130_v63 }
 0x4fb   : > { %5230 = vpow2.f32 %v4175_v25 }
 0x4fc   : > { %v4171_v58 = vmul.f32 1.442695, %v4146_v10 }
 0x4fe   : > { %5232 = vpow2.f32 %v4171_v58 }
 0x503   : > { %v5227_v22 = vpop.eup %5226 }
 0x504   : > { %v4195_v29 = vadd.f32 1.0, %v5227_v22 }
 0x506   : > { %5234 = vrcp.f32 %v4195_v29 }
 0x507   : > { %v5229_v53 = vpop.eup %5228 }
 0x508   : > { %v5231_v57 = vpop.eup %5230  ;;  %v4193_v56 = vadd.f32 1.0, %v5229_v53 }
 0x509   : > { %v4196_v36 = vadd.f32 1.0, %v5231_v57 }
 0x50a   : > { %5236 = vrcp.f32 %v4193_v56 }
 0x50b   : > { %v5233_v38 = vpop.eup %5232  ;;  %5238 = vrcp.f32 %v4196_v36 }
 0x50c   : > { %v4194_v34 = vadd.f32 1.0, %v5233_v38 }
 0x50e   : > { %5240 = vrcp.f32 %v4194_v34  ;;  %v4098_v47 = vpop.permute.xlu0 %4097 }
 0x50f   : > { %v4133_v35 = vsub.f32 %v8262_v19, %v4098_v47 }
 0x511   : > { %v4149_v23 = vsub.f32 0.0, %v4133_v35 }
 0x512   : > { %v4102_v49 = vpop.permute.xlu0 %4101  ;;  %v4100_v7 = vpop.permute.xlu1 %4099 }
 0x513   : > { %v5235_v52 = vpop.eup %5234  ;;  %v4177_v54 = vmul.f32 1.442695, %v4149_v23  ;;  %v4135_v17 = vsub.f32 %v8271_v43, %v4102_v49  ;;  %v4134_v30 = vsub.f32 %v8273_v40, %v4100_v7 }
 0x514   : > { %4269 = vrot.lane.b32.xlu0 %v5235_v52, %s5385_s16 }
 0x515   : > { %5242 = vpow2.f32 %v4177_v54  ;;  %v4151_v19 = vsub.f32 0.0, %v4135_v17  ;;  %v4150_v33 = vsub.f32 0.0, %v4134_v30 }
 0x516   : > { %v4254_v2 = vpop.permute.xlu0 %4253  ;;  %v4104_v14 = vpop.permute.xlu1 %4103 }
 0x517   : > { %v5237_v21 = vpop.eup %5236  ;;  %v4181_v43 = vmul.f32 1.442695, %v4151_v19  ;;  %v4179_v50 = vmul.f32 1.442695, %v4150_v33  ;;  %4300 = vst.msk [vmem:[%s8307_s20 + $0x10] sm:$0xff] %vm4297_vm9, %v4254_v2  ;;  %v4136_v40 = vsub.f32 %v8279_v51, %v4104_v14 }
 0x518   : > { %v5239_v12 = vpop.eup %5238  ;;  %4265 = vrot.lane.b32.xlu0 %v5237_v21, %s5385_s16 }
 0x519   : > { %5244 = vpow2.f32 %v4181_v43  ;;  %v4152_v32 = vsub.f32 0.0, %v4136_v40  ;;  %4271 = vrot.lane.b32.xlu1 %v5239_v12, %s5385_s16 }
 0x51a   : > { %5246 = vpow2.f32 %v4179_v50  ;;  %v4250_v3 = vpop.permute.xlu0 %4249  ;;  %v4256_v28 = vpop.permute.xlu1 %4255 }
 0x51b   : > { %v5241_v41 = vpop.eup %5240  ;;  %v4183_v55 = vmul.f32 1.442695, %v4152_v32  ;;  %4298 = vst.msk [vmem:[%s8307_s20] sm:$0xff] %vm4297_vm9, %v4250_v3  ;;  %4301 = vst.msk [vmem:[%s8307_s20 + $0x18] sm:$0xff] %vm4297_vm9, %v4256_v28 }
 0x51d   : > { %5248 = vpow2.f32 %v4183_v55  ;;  %4267 = vrot.lane.b32.xlu1 %v5241_v41, %s5385_s16 }
 0x51e   : > { %v4252_v51 = vpop.permute.xlu1 %4251 }
 0x51f   : > { %4299 = vst.msk [vmem:[%s8307_s20 + $0x8] sm:$0xff] %vm4297_vm9, %v4252_v51 }
 0x522   : > { %v5243_v37 = vpop.eup %5242 }
 0x523   : > { %v4197_v26 = vadd.f32 1.0, %v5243_v37 }
 0x525   : > { %5250 = vrcp.f32 %v4197_v26 }
 0x526   : > { %v5245_v6 = vpop.eup %5244 }
 0x527   : > { %v5247_v20 = vpop.eup %5246  ;;  %v4199_v5 = vadd.f32 1.0, %v5245_v6 }
 0x528   : > { %v4198_v59 = vadd.f32 1.0, %v5247_v20 }
 0x529   : > { %5252 = vrcp.f32 %v4199_v5 }
 0x52a   : > { %v5249_v48 = vpop.eup %5248  ;;  %5254 = vrcp.f32 %v4198_v59 }
 0x52b   : > { %v4200_v42 = vadd.f32 1.0, %v5249_v48 }
 0x52d   : > { %5256 = vrcp.f32 %v4200_v42 }
 0x532   : > { %v5251_v9 = vpop.eup %5250 }
 0x533   : > { %4273 = vrot.lane.b32.xlu0 %v5251_v9, %s5385_s16 }
 0x536   : > { %v5253_v46 = vpop.eup %5252 }
 0x537   : > { %v5255_v62 = vpop.eup %5254  ;;  %4277 = vrot.lane.b32.xlu0 %v5253_v46, %s5385_s16 }
 0x538   : > { %4275 = vrot.lane.b32.xlu1 %v5255_v62, %s5385_s16 }
 0x53a   : > { %v5257_v0 = vpop.eup %5256 }
 0x53c   : > { %4279 = vrot.lane.b32.xlu1 %v5257_v0, %s5385_s16 }
 0x547   : > { %v4262_v39 = vpop.permute.xlu0 %4261 }
 0x548   : > { %4304 = vst.msk [vmem:[%s8307_s20 + $0x30] sm:$0xff] %vm4297_vm9, %v4262_v39 }
 0x54b   : > { %v4258_v27 = vpop.permute.xlu0 %4257 }
 0x54c   : > { %4302 = vst.msk [vmem:[%s8307_s20 + $0x20] sm:$0xff] %vm4297_vm9, %v4258_v27  ;;  %v4264_v60 = vpop.permute.xlu1 %4263 }
 0x54d   : > { %4305 = vst.msk [vmem:[%s8307_s20 + $0x38] sm:$0xff] %vm4297_vm9, %v4264_v60 }
 0x550   : > { %v4260_v11 = vpop.permute.xlu1 %4259 }
 0x551   : > { %4303 = vst.msk [vmem:[%s8307_s20 + $0x28] sm:$0xff] %vm4297_vm9, %v4260_v11 }
 0x586   : > { %v4270_v31 = vpop.permute.xlu0 %4269 }
 0x587   : > { %4308 = vst.msk [vmem:[%s8307_s20 + $0x50] sm:$0xff] %vm4297_vm9, %v4270_v31 }
 0x58a   : > { %v4266_v45 = vpop.permute.xlu0 %4265 }
 0x58b   : > { %4306 = vst.msk [vmem:[%s8307_s20 + $0x40] sm:$0xff] %vm4297_vm9, %v4266_v45  ;;  %v4272_v61 = vpop.permute.xlu1 %4271 }
 0x58c   : > { %4309 = vst.msk [vmem:[%s8307_s20 + $0x58] sm:$0xff] %vm4297_vm9, %v4272_v61 }
 0x58f   : > { %v4268_v4 = vpop.permute.xlu1 %4267 }
 0x590   : > { %4307 = vst.msk [vmem:[%s8307_s20 + $0x48] sm:$0xff] %vm4297_vm9, %v4268_v4 }
 0x5a5   : > { %v4274_v8 = vpop.permute.xlu0 %4273 }
 0x5a6   : > { %4310 = vst.msk [vmem:[%s8307_s20 + $0x60] sm:$0xff] %vm4297_vm9, %v4274_v8 }
 0x5a9   : > { %v4278_v16 = vpop.permute.xlu0 %4277 }
 0x5aa   : > { %4312 = vst.msk [vmem:[%s8307_s20 + $0x70] sm:$0xff] %vm4297_vm9, %v4278_v16  ;;  %v4276_v24 = vpop.permute.xlu1 %4275 }
 0x5ab   : > { %4311 = vst.msk [vmem:[%s8307_s20 + $0x68] sm:$0xff] %vm4297_vm9, %v4276_v24 }
 0x5ae   : > { %v4280_v13 = vpop.permute.xlu1 %4279 }
 0x5af   : > { %4313 = vst.msk [vmem:[%s8307_s20 + $0x78] sm:$0xff] %vm4297_vm9, %v4280_v13 }
 0x5b0 PF: > { %s19_s9 = sadd.s32 1, %s5366_s9   ;;  %s8799_s27 = smov %s5358_s29 }
 0x5b1   : > { %p16_p7 = scmp.ge.s32.totalorder %s19_s9, 6   ;;  %s8800_s28 = smov %s5362_s30 }
 0x5b2   : > { %s8801_s29 = smov %s8804_s10  ;;  %s8802_s30 = smov %s8808_s11 }
 0x5b3   :  { %18 = sbr.rel (!%p16_p7) target bundleno = 3 (0x3), region = 105 }

</bundles_post_ra>
